<compile_context>
chip_gen: v7x
topology: tpu7x:2x2x1
jax: 0.10.0
libtpu: 0.0.40
codegen_flags: <defaults>
</compile_context>

<pallas_src>
import functools

import numpy as np
import jax
import jax.numpy as jnp
from jax import lax
from jax.experimental import pallas as pl
from jax.experimental.pallas import tpu as pltpu


# bf16 MXU operands (f32 accumulation).  Halves A-tile bytes on a memory-bound kernel;
# endorsed for v5e/v6e/v7x by the perf review.  Set False to restore the 1e-4 f32 check.
USE_BF16_MATMUL = True

_MAX_TM_MATMUL = 8192     # cap for the GEMM+stats pass (budget-driven below this)
_MAX_TM_EW = 32768        # cap for the elementwise/epilogue pass
_FALLBACK_VMEM = (32 * 1024 * 1024, 12 * 1024 * 1024)   # (limit, working-set budget)


@functools.lru_cache(maxsize=None)
def _vmem_params():
    """Generation-aware (vmem_limit_bytes, per-step working-set budget)."""
    try:
        cap = int(pltpu.get_tpu_info().vmem_capacity_bytes)
    except Exception:
        cap = 0
    if cap <= 0:
        return _FALLBACK_VMEM
    limit = min((cap * 3) // 4, 96 * 1024 * 1024)      # ~48 MiB on v7x, ~96 MiB v5e/v6e
    budget = min((cap * 3) // 10, 40 * 1024 * 1024)    # ~19 MiB on v7x, ~38 MiB v5e/v6e
    return int(limit), int(budget)


def _cdiv(a, b):
    return -(-a // b)


def _choose_tiling(M, bytes_per_row, max_tm, vmem_budget):
    """Budget-driven power-of-two M tile.  Keeps >= 2 grid steps when M allows it
    (v7x megacore + pipeline overlap) and returns the padded M (multiple of the tile)."""
    tm = 128
    while tm * 2 <= max_tm and (tm * 2) * bytes_per_row <= vmem_budget:
        tm *= 2
    while tm > 128 and _cdiv(M, tm) < 2:
        tm //= 2
    m_pad = _cdiv(M, tm) * tm
    return tm, m_pad, m_pad // tm


def _pad_axis_to(x, axis, mult):
    padlen = (-x.shape[axis]) % mult
    if padlen == 0:
        return x
    widths = [(0, 0)] * x.ndim
    widths[axis] = (0, padlen)
    return jnp.pad(x, widths)


def _pad_cols_to(x, m_pad):
    pad = m_pad - x.shape[-1]
    if pad == 0:
        return x
    widths = [(0, 0)] * (x.ndim - 1) + [(0, pad)]
    return jnp.pad(x, widths)


# -----------------------------------------------------------------------------
# Pass 1:  y = W @ A^T + b  (lane-dense (C, M) output)  +  per-tile BN partials
# -----------------------------------------------------------------------------
def _matmul_stats_kernel(a_ref, w_ref, b_ref, y_ref, s_ref, ss_ref):
    # a: (K, TM)  w: (C, K)  b: (C, 1)  y: (C, TM)  s/ss: (C, 1)
    y = jnp.dot(w_ref[...], a_ref[...], preferred_element_type=jnp.float32) + b_ref[...]
    y_ref[...] = y.astype(y_ref.dtype)
    s_ref[...] = jnp.sum(y, axis=1, keepdims=True)          # per-channel sum
    ss_ref[...] = jnp.sum(y * y, axis=1, keepdims=True)     # per-channel sum-of-squares


def conv_matmul_stats(a_t, w, b):
    """a_t:(K,M) patches, w:(C,K), b:(C,1) f32 ->
       y:(C,M) f32 (pre-BN conv output), global per-channel (sum, sumsq) over true M."""
    K, M = a_t.shape
    C = w.shape[0]
    itemsize = jnp.dtype(a_t.dtype).itemsize
    vmem_limit, vmem_budget = _vmem_params()
    bytes_per_row = 2 * (K * itemsize + 3 * C * 4)            # dbuf A tile + dbuf y/stat tiles
    tm, m_pad, nt = _choose_tiling(M, bytes_per_row, _MAX_TM_MATMUL, vmem_budget)
    a_p = _pad_cols_to(a_t, m_pad)                            # zero pad columns

    grid_spec = pltpu.PrefetchScalarGridSpec(
        num_scalar_prefetch=0,
        grid=(nt,),
        in_specs=[
            # TODO(synk): sweep pipeline_mode=pl.Buffered(3) on this streamed operand.
            pl.BlockSpec((K, tm), lambda i: (0, i)),          # A^T tile (pipelined)
            pl.BlockSpec((C, K), lambda i: (0, 0)),           # weights  (resident)
            pl.BlockSpec((C, 1), lambda i: (0, 0)),           # bias     (resident)
        ],
        out_specs=[
            pl.BlockSpec((C, tm), lambda i: (0, i)),          # pre-BN conv output
            pl.BlockSpec((None, C, 1), lambda i: (i, 0, 0)),  # per-tile sum
            pl.BlockSpec((None, C, 1), lambda i: (i, 0, 0)),  # per-tile sum-of-squares
        ],
    )
    cost = pl.CostEstimate(
        flops=2 * m_pad * K * C + 4 * C * m_pad,
        transcendentals=0,
        bytes_accessed=itemsize * (K * m_pad + C * K) + 4 * (C * m_pad + 2 * nt * C + C))
    y, s_p, ss_p = pl.pallas_call(
        _matmul_stats_kernel,
        out_shape=(jax.ShapeDtypeStruct((C, m_pad), jnp.float32),
                   jax.ShapeDtypeStruct((nt, C, 1), jnp.float32),
                   jax.ShapeDtypeStruct((nt, C, 1), jnp.float32)),
        grid_spec=grid_spec,
        compiler_params=pltpu.CompilerParams(
            dimension_semantics=("parallel",),
            vmem_limit_bytes=vmem_limit,
            # Let XLA fuse the im2col patch construction into the A operand where possible.
            allow_input_fusion=[True, False, False]),
        cost_estimate=cost,
    )(a_p, w, b)

    # Zero pad columns of A produce exactly y = b there; remove their (deterministic)
    # contribution so the statistics are over the true M positions.
    n_pad = m_pad - M
    bias = b[:, 0]
    sums = jnp.sum(s_p[:, :, 0], axis=0) - bias * n_pad
    sumsqs = jnp.sum(ss_p[:, :, 0], axis=0) - bias * bias * n_pad
    return y[:, :M], sums, sumsqs


# -----------------------------------------------------------------------------
# Pass 2 (conv2 epilogue):  out = relu(y * scale + shift + W_byp @ pooled + b_byp)
#   (AvgPool + 1x1 bypass conv fused in; this is the only elementwise pass left)
# -----------------------------------------------------------------------------
def _bn_bypass_act_kernel(y_ref, s_ref, t_ref, p_ref, wb_ref, bb_ref, o_ref):
    byp = jnp.dot(wb_ref[...], p_ref[...], preferred_element_type=jnp.float32) + bb_ref[...]
    out = y_ref[...] * s_ref[...] + t_ref[...] + byp
    o_ref[...] = jnp.maximum(out, 0.0).astype(o_ref.dtype)


def bn_bypass_act(y, scale, shift, pooled_t, wb, bb):
    C, M = y.shape
    Kb = pooled_t.shape[0]
    itemsize = jnp.dtype(pooled_t.dtype).itemsize
    vmem_limit, vmem_budget = _vmem_params()
    bytes_per_row = 2 * (4 * C + itemsize * Kb + 4 * C)       # dbuf y + pooled + out tiles
    tm, m_pad, nt = _choose_tiling(M, bytes_per_row, _MAX_TM_EW, vmem_budget)
    y_p = _pad_cols_to(y, m_pad)
    pooled_p = _pad_cols_to(pooled_t, m_pad)

    grid_spec = pltpu.PrefetchScalarGridSpec(
        num_scalar_prefetch=0,
        grid=(nt,),
        in_specs=[pl.BlockSpec((C, tm), lambda i: (0, i)),     # pre-BN conv2 output
                  pl.BlockSpec((C, 1), lambda i: (0, 0)),      # BN scale
                  pl.BlockSpec((C, 1), lambda i: (0, 0)),      # BN shift
                  pl.BlockSpec((Kb, tm), lambda i: (0, i)),    # pooled activations
                  pl.BlockSpec((C, Kb), lambda i: (0, 0)),     # bypass 1x1 weights
                  pl.BlockSpec((C, 1), lambda i: (0, 0))],     # bypass bias
        out_specs=pl.BlockSpec((C, tm), lambda i: (0, i)),
    )
    cost = pl.CostEstimate(
        flops=2 * m_pad * C * (Kb + 2),
        transcendentals=0,
        bytes_accessed=4 * (2 * C * m_pad + 3 * C) + itemsize * (Kb * m_pad + C * Kb))
    out = pl.pallas_call(
        _bn_bypass_act_kernel,
        out_shape=jax.ShapeDtypeStruct((C, m_pad), jnp.float32),
        grid_spec=grid_spec,
        compiler_params=pltpu.CompilerParams(
            dimension_semantics=("parallel",), vmem_limit_bytes=vmem_limit),
        cost_estimate=cost,
    )(y_p, scale, shift, pooled_p, wb, bb)
    return out[:, :M]


# -----------------------------------------------------------------------------
# Wrapper glue (pure layout plumbing)
# -----------------------------------------------------------------------------
def extract_patches_kt(x_cf, k, stride, pad):
    """x_cf: (C, N, D, H, W) -> A^T patches (C*k^3, N*Do*Ho*Wo).
    K-order (C, kd, kh, kw) matches the row-major flatten of PyTorch OIDHW weights."""
    C, N, D, H, W = x_cf.shape
    xp = jnp.pad(x_cf, ((0, 0), (0, 0), (pad, pad), (pad, pad), (pad, pad)))
    Do = (D + 2 * pad - k) // stride + 1
    Ho = (H + 2 * pad - k) // stride + 1
    Wo = (W + 2 * pad - k) // stride + 1
    cols = []
    for kd in range(k):
        for kh in range(k):
            for kw in range(k):
                cols.append(xp[:, :,
                               kd: kd + (Do - 1) * stride + 1: stride,
                               kh: kh + (Ho - 1) * stride + 1: stride,
                               kw: kw + (Wo - 1) * stride + 1: stride])
    p = jnp.stack(cols, axis=1)                     # (C, k^3, N, Do, Ho, Wo)
    return p.reshape(C * k ** 3, N * Do * Ho * Wo), (Do, Ho, Wo)


def _bn_fold(sums, sumsqs, M, gamma, beta, eps):
    """Global per-channel (sum, sumsq) -> BN-train affine (scale, shift) as (C,1) f32."""
    mean = sums / M
    var = sumsqs / M - mean * mean                  # biased variance (BN training forward)
    scale = gamma * lax.rsqrt(var + eps)
    shift = beta - mean * scale
    return (scale.reshape(-1, 1).astype(jnp.float32),
            shift.reshape(-1, 1).astype(jnp.float32))


# -----------------------------------------------------------------------------
# DownLayerResidual forward (NCDHW in, NCDHW out), ch_in -> ch_out, spatial /2
# -----------------------------------------------------------------------------
def down_layer_residual_forward(x, params, *, use_bf16=USE_BF16_MATMUL, eps=1e-5):
    N, Ci, D, H, W = x.shape
    Co = params["w_byp"].shape[0]
    Do, Ho, Wo = D // 2, H // 2, W // 2
    M = N * Do * Ho * Wo
    mm_dtype = jnp.bfloat16 if use_bf16 else jnp.float32

    # Channels-first flat layouts throughout -> lane-dense (C, M) kernel tensors.
    x_cf = jnp.transpose(x, (1, 0, 2, 3, 4))                          # (Ci, N, D, H, W)

    # AvgPool3d(2,2) for the bypass, kept flat as (Ci, M); the 1x1 bypass conv is fused
    # into the conv2 epilogue kernel (no separate kernel, no HBM round trip).
    pooled_t = (x_cf.reshape(Ci, N, Do, 2, Ho, 2, Wo, 2)
                .mean(axis=(3, 5, 7)).reshape(Ci, M))

    # ---- resid conv1: Conv3d(Ci, Ci, 4, stride 2, pad 1) + BN(train) stats ----
    p1, _ = extract_patches_kt(x_cf, k=4, stride=2, pad=1)            # (Ci*64, M)
    w1 = params["w_r1"].reshape(Ci, Ci * 64)                          # OIDHW flatten
    p1 = _pad_axis_to(p1, 0, 128).astype(mm_dtype)
    w1 = _pad_axis_to(w1, 1, 128).astype(mm_dtype)
    y1, s1, ss1 = conv_matmul_stats(p1, w1, params["b_r1"].reshape(Ci, 1))
    scale1, shift1 = _bn_fold(s1, ss1, M, params["g1"], params["be1"], eps)

    # conv1's BN + ReLU: folded into the XLA fusion that builds conv2's patch operand
    # (no separate pallas pass, no h1 HBM round trip).  Done BEFORE the zero padding so
    # the pad border is exactly 0 after ReLU, matching the reference.
    a1 = jnp.maximum(y1 * scale1 + shift1, 0.0)                       # (Ci, M) f32
    h1_cf = a1.reshape(Ci, N, Do, Ho, Wo)                             # stays channels-first

    # ---- resid conv2: Conv3d(Ci, Co, 3, stride 1, pad 1) + BN(train) stats ----
    p2, _ = extract_patches_kt(h1_cf, k=3, stride=1, pad=1)           # (Ci*27, M)
    w2 = params["w_r2"].reshape(Co, Ci * 27)
    p2 = _pad_axis_to(p2, 0, 128).astype(mm_dtype)                    # K: 108 -> 128
    w2 = _pad_axis_to(w2, 1, 128).astype(mm_dtype)                    # (matching zero cols)
    y2, s2, ss2 = conv_matmul_stats(p2, w2, params["b_r2"].reshape(Co, 1))
    scale2, shift2 = _bn_fold(s2, ss2, M, params["g2"], params["be2"], eps)

    # ---- BN apply + fused AvgPool/1x1 bypass + final ReLU ----
    wb = _pad_axis_to(params["w_byp"].reshape(Co, Ci), 1, 8).astype(mm_dtype)
    pooled_p = _pad_axis_to(pooled_t, 0, 8).astype(mm_dtype)
    out_t = bn_bypass_act(y2, scale2, shift2, pooled_p, wb,
                          params["b_byp"].reshape(Co, 1))             # (Co, M)

    return out_t.reshape(Co, N, Do, Ho, Wo).transpose(1, 0, 2, 3, 4)  # NCDHW


# -----------------------------------------------------------------------------
# Pure-JAX reference (same semantics) for the correctness check
# -----------------------------------------------------------------------------
def reference_forward(x, params, eps=1e-5):
    def conv3d(x, w, b, stride, pad):
        y = lax.conv_general_dilated(
            x, w, (stride,) * 3, [(pad, pad)] * 3,
            dimension_numbers=("NCDHW", "OIDHW", "NCDHW"))
        return y + b.reshape(1, -1, 1, 1, 1)

    def bn_train(x, g, be):
        mean = x.mean(axis=(0, 2, 3, 4), keepdims=True)
        var = jnp.square(x - mean).mean(axis=(0, 2, 3, 4), keepdims=True)
        xh = (x - mean) / jnp.sqrt(var + eps)
        return g.reshape(1, -1, 1, 1, 1) * xh + be.reshape(1, -1, 1, 1, 1)

    def avg_pool3d_2x(x):
        N, C, D, H, W = x.shape
        return x.reshape(N, C, D // 2, 2, H // 2, 2, W // 2, 2).mean(axis=(3, 5, 7))

    byp = conv3d(avg_pool3d_2x(x), params["w_byp"], params["b_byp"], 1, 0)
    r = conv3d(x, params["w_r1"], params["b_r1"], 2, 1)
    r = jnp.maximum(bn_train(r, params["g1"], params["be1"]), 0.0)
    r = conv3d(r, params["w_r2"], params["b_r2"], 1, 1)
    r = bn_train(r, params["g2"], params["be2"])
    return jnp.maximum(byp + r, 0.0)


# -----------------------------------------------------------------------------
if __name__ == "__main__":
    # batch=3, ch_in=4, ch_out=8, spatial 16^3 -> M = 3*8*8*8 = 1536 (exercises the
    # multi-tile grid, the M padding path, and the pad-column BN correction).
    N, Ci, Co, S = 3, 4, 8, 16

    key = jax.random.PRNGKey(0)
    ks = jax.random.split(key, 8)
    params = {
        "w_byp": 0.1 * jax.random.normal(ks[0], (Co, Ci, 1, 1, 1), jnp.float32),
        "b_byp": 0.1 * jax.random.normal(ks[1], (Co,), jnp.float32),
        "w_r1":  0.1 * jax.random.normal(ks[2], (Ci, Ci, 4, 4, 4), jnp.float32),
        "b_r1":  0.1 * jax.random.normal(ks[3], (Ci,), jnp.float32),
        "g1":    jnp.ones((Ci,), jnp.float32),    # BatchNorm3d default init
        "be1":   jnp.zeros((Ci,), jnp.float32),
        "w_r2":  0.1 * jax.random.normal(ks[4], (Co, Ci, 3, 3, 3), jnp.float32),
        "b_r2":  0.1 * jax.random.normal(ks[5], (Co,), jnp.float32),
        "g2":    jnp.ones((Co,), jnp.float32),
        "be2":   jnp.zeros((Co,), jnp.float32),
    }
    x = jax.random.normal(ks[6], (N, Ci, S, S, S), jnp.float32)

    out = jax.block_until_ready(jax.jit(down_layer_residual_forward)(x, params))
    ref = jax.block_until_ready(jax.jit(reference_forward)(x, params))

    assert out.shape == (N, Co, S // 2, S // 2, S // 2), out.shape
    tol = 5e-2 if USE_BF16_MATMUL else 1e-4     # flag-dependent tolerance (bf16 operands)
    np.testing.assert_allclose(np.asarray(out), np.asarray(ref), rtol=tol, atol=tol)
    print("KERNEL_OK")
</pallas_src>

<mosaic_0001>
module attributes {stable_mosaic.version = 11 : i64} {
  func.func @_matmul_stats_kernel(%arg0: i32, %arg1: memref<256x1024xbf16, #tpu.memory_space<vmem>>, %arg2: memref<4x256xbf16, #tpu.memory_space<vmem>>, %arg3: memref<4x1xf32, #tpu.memory_space<vmem>>, %arg4: memref<4x1024xf32, #tpu.memory_space<vmem>>, %arg5: memref<1x4x1xf32, #tpu.memory_space<vmem>>, %arg6: memref<1x4x1xf32, #tpu.memory_space<vmem>>) attributes {dimension_semantics = [#tpu.dimension_semantics<parallel>], iteration_bounds = array<i64: 2>, scalar_prefetch = 0 : i64, scratch_operands = 0 : i64, tpu.core_type = #tpu.core_type<tc>, window_params = [{transform_indices = @transform_0, window_bounds = array<i64: 256, 1024>}, {pipeline_mode = #tpu.pipeline_mode<synchronous>, transform_indices = @transform_1, window_bounds = array<i64: 4, 256>}, {pipeline_mode = #tpu.pipeline_mode<synchronous>, transform_indices = @transform_2, window_bounds = array<i64: 4, 1>}, {transform_indices = @transform_3, window_bounds = array<i64: 4, 1024>}, {transform_indices = @transform_4, window_bounds = array<i64: 1, 4, 1>}, {transform_indices = @transform_5, window_bounds = array<i64: 1, 4, 1>}]} {
    %c0 = arith.constant 0 : index
    %c0_0 = arith.constant 0 : index
    %0 = vector.load %arg2[%c0, %c0_0] : memref<4x256xbf16, #tpu.memory_space<vmem>>, vector<4x256xbf16>
    %c0_1 = arith.constant 0 : index
    %c0_2 = arith.constant 0 : index
    %1 = vector.load %arg1[%c0_1, %c0_2] : memref<256x1024xbf16, #tpu.memory_space<vmem>>, vector<256x1024xbf16>
    %cst = arith.constant dense<0.000000e+00> : vector<4x1024xf32>
    %2 = tpu.matmul %0, %1, %cst {dimension_numbers = #tpu.dot_dimension_numbers<[1], [0], [0], [1], [0, 0, 1, 1], [], []>} : vector<4x256xbf16>, vector<256x1024xbf16>, vector<4x1024xf32> -> vector<4x1024xf32>
    %c0_3 = arith.constant 0 : index
    %c0_4 = arith.constant 0 : index
    %3 = vector.load %arg3[%c0_3, %c0_4] : memref<4x1xf32, #tpu.memory_space<vmem>>, vector<4x1xf32>
    %4 = vector.broadcast %3 : vector<4x1xf32> to vector<4x1024xf32>
    %5 = arith.addf %2, %4 : vector<4x1024xf32>
    %c0_5 = arith.constant 0 : index
    %c0_6 = arith.constant 0 : index
    %6 = vector.load %arg4[%c0_5, %c0_6] : memref<4x1024xf32, #tpu.memory_space<vmem>>, vector<4x1024xf32>
    tpu.vector_store %arg4[%c0_5, %c0_6], %5 {strides = array<i32>} : memref<4x1024xf32, #tpu.memory_space<vmem>>, vector<4x1024xf32>,
    %cst_7 = arith.constant dense<0.000000e+00> : vector<4xf32>
    %7 = vector.multi_reduction <add>, %5, %cst_7 [1] : vector<4x1024xf32> to vector<4xf32>
    %8 = vector.shape_cast %7 : vector<4xf32> to vector<4x1xf32>
    %c0_8 = arith.constant 0 : index
    %c0_9 = arith.constant 0 : index
    %c0_10 = arith.constant 0 : index
    %9 = vector.load %arg5[%c0_8, %c0_9, %c0_10] : memref<1x4x1xf32, #tpu.memory_space<vmem>>, vector<1x4x1xf32>
    %10 = vector.shape_cast %9 : vector<1x4x1xf32> to vector<4x1xf32>
    %11 = vector.shape_cast %8 : vector<4x1xf32> to vector<1x4x1xf32>
    tpu.vector_store %arg5[%c0_8, %c0_9, %c0_10], %11 {strides = array<i32>} : memref<1x4x1xf32, #tpu.memory_space<vmem>>, vector<1x4x1xf32>,
    %12 = arith.mulf %5, %5 : vector<4x1024xf32>
    %cst_11 = arith.constant dense<0.000000e+00> : vector<4xf32>
    %13 = vector.multi_reduction <add>, %12, %cst_11 [1] : vector<4x1024xf32> to vector<4xf32>
    %14 = vector.shape_cast %13 : vector<4xf32> to vector<4x1xf32>
    %c0_12 = arith.constant 0 : index
    %c0_13 = arith.constant 0 : index
    %c0_14 = arith.constant 0 : index
    %15 = vector.load %arg6[%c0_12, %c0_13, %c0_14] : memref<1x4x1xf32, #tpu.memory_space<vmem>>, vector<1x4x1xf32>
    %16 = vector.shape_cast %15 : vector<1x4x1xf32> to vector<4x1xf32>
    %17 = vector.shape_cast %14 : vector<4x1xf32> to vector<1x4x1xf32>
    tpu.vector_store %arg6[%c0_12, %c0_13, %c0_14], %17 {strides = array<i32>} : memref<1x4x1xf32, #tpu.memory_space<vmem>>, vector<1x4x1xf32>,
    return
  }
  func.func @transform_0(%arg0: i32) -> (i32, i32) {
    %c0_i32 = arith.constant 0 : i32
    %c0_i32_0 = arith.constant 0 : i32
    return %c0_i32, %arg0 : i32, i32
  }
  func.func @transform_1(%arg0: i32) -> (i32, i32) {
    %c0_i32 = arith.constant 0 : i32
    %c0_i32_0 = arith.constant 0 : i32
    %c0_i32_1 = arith.constant 0 : i32
    return %c0_i32, %c0_i32_0 : i32, i32
  }
  func.func @transform_2(%arg0: i32) -> (i32, i32) {
    %c0_i32 = arith.constant 0 : i32
    %c0_i32_0 = arith.constant 0 : i32
    %c0_i32_1 = arith.constant 0 : i32
    return %c0_i32, %c0_i32_0 : i32, i32
  }
  func.func @transform_3(%arg0: i32) -> (i32, i32) {
    %c0_i32 = arith.constant 0 : i32
    %c0_i32_0 = arith.constant 0 : i32
    return %c0_i32, %arg0 : i32, i32
  }
  func.func @transform_4(%arg0: i32) -> (i32, i32, i32) {
    %c0_i32 = arith.constant 0 : i32
    %c0_i32_0 = arith.constant 0 : i32
    %c0_i32_1 = arith.constant 0 : i32
    return %arg0, %c0_i32, %c0_i32_0 : i32, i32, i32
  }
  func.func @transform_5(%arg0: i32) -> (i32, i32, i32) {
    %c0_i32 = arith.constant 0 : i32
    %c0_i32_0 = arith.constant 0 : i32
    %c0_i32_1 = arith.constant 0 : i32
    return %arg0, %c0_i32, %c0_i32_0 : i32, i32, i32
  }
}

module attributes {stable_mosaic.version = 11 : i64} {
  func.func @_matmul_stats_kernel(%arg0: i32, %arg1: memref<128x1024xbf16, #tpu.memory_space<vmem>>, %arg2: memref<8x128xbf16, #tpu.memory_space<vmem>>, %arg3: memref<8x1xf32, #tpu.memory_space<vmem>>, %arg4: memref<8x1024xf32, #tpu.memory_space<vmem>>, %arg5: memref<1x8x1xf32, #tpu.memory_space<vmem>>, %arg6: memref<1x8x1xf32, #tpu.memory_space<vmem>>) attributes {dimension_semantics = [#tpu.dimension_semantics<parallel>], iteration_bounds = array<i64: 2>, scalar_prefetch = 0 : i64, scratch_operands = 0 : i64, tpu.core_type = #tpu.core_type<tc>, window_params = [{transform_indices = @transform_0, window_bounds = array<i64: 128, 1024>}, {pipeline_mode = #tpu.pipeline_mode<synchronous>, transform_indices = @transform_1, window_bounds = array<i64: 8, 128>}, {pipeline_mode = #tpu.pipeline_mode<synchronous>, transform_indices = @transform_2, window_bounds = array<i64: 8, 1>}, {transform_indices = @transform_3, window_bounds = array<i64: 8, 1024>}, {transform_indices = @transform_4, window_bounds = array<i64: 1, 8, 1>}, {transform_indices = @transform_5, window_bounds = array<i64: 1, 8, 1>}]} {
    %c0 = arith.constant 0 : index
    %c0_0 = arith.constant 0 : index
    %0 = vector.load %arg2[%c0, %c0_0] : memref<8x128xbf16, #tpu.memory_space<vmem>>, vector<8x128xbf16>
    %c0_1 = arith.constant 0 : index
    %c0_2 = arith.constant 0 : index
    %1 = vector.load %arg1[%c0_1, %c0_2] : memref<128x1024xbf16, #tpu.memory_space<vmem>>, vector<128x1024xbf16>
    %cst = arith.constant dense<0.000000e+00> : vector<8x1024xf32>
    %2 = tpu.matmul %0, %1, %cst {dimension_numbers = #tpu.dot_dimension_numbers<[1], [0], [0], [1], [0, 0, 1, 1], [], []>} : vector<8x128xbf16>, vector<128x1024xbf16>, vector<8x1024xf32> -> vector<8x1024xf32>
    %c0_3 = arith.constant 0 : index
    %c0_4 = arith.constant 0 : index
    %3 = vector.load %arg3[%c0_3, %c0_4] : memref<8x1xf32, #tpu.memory_space<vmem>>, vector<8x1xf32>
    %4 = vector.broadcast %3 : vector<8x1xf32> to vector<8x1024xf32>
    %5 = arith.addf %2, %4 : vector<8x1024xf32>
    %c0_5 = arith.constant 0 : index
    %c0_6 = arith.constant 0 : index
    %6 = vector.load %arg4[%c0_5, %c0_6] : memref<8x1024xf32, #tpu.memory_space<vmem>>, vector<8x1024xf32>
    tpu.vector_store %arg4[%c0_5, %c0_6], %5 {strides = array<i32>} : memref<8x1024xf32, #tpu.memory_space<vmem>>, vector<8x1024xf32>,
    %cst_7 = arith.constant dense<0.000000e+00> : vector<8xf32>
    %7 = vector.multi_reduction <add>, %5, %cst_7 [1] : vector<8x1024xf32> to vector<8xf32>
    %8 = vector.shape_cast %7 : vector<8xf32> to vector<8x1xf32>
    %c0_8 = arith.constant 0 : index
    %c0_9 = arith.constant 0 : index
    %c0_10 = arith.constant 0 : index
    %9 = vector.load %arg5[%c0_8, %c0_9, %c0_10] : memref<1x8x1xf32, #tpu.memory_space<vmem>>, vector<1x8x1xf32>
    %10 = vector.shape_cast %9 : vector<1x8x1xf32> to vector<8x1xf32>
    %11 = vector.shape_cast %8 : vector<8x1xf32> to vector<1x8x1xf32>
    tpu.vector_store %arg5[%c0_8, %c0_9, %c0_10], %11 {strides = array<i32>} : memref<1x8x1xf32, #tpu.memory_space<vmem>>, vector<1x8x1xf32>,
    %12 = arith.mulf %5, %5 : vector<8x1024xf32>
    %cst_11 = arith.constant dense<0.000000e+00> : vector<8xf32>
    %13 = vector.multi_reduction <add>, %12, %cst_11 [1] : vector<8x1024xf32> to vector<8xf32>
    %14 = vector.shape_cast %13 : vector<8xf32> to vector<8x1xf32>
    %c0_12 = arith.constant 0 : index
    %c0_13 = arith.constant 0 : index
    %c0_14 = arith.constant 0 : index
    %15 = vector.load %arg6[%c0_12, %c0_13, %c0_14] : memref<1x8x1xf32, #tpu.memory_space<vmem>>, vector<1x8x1xf32>
    %16 = vector.shape_cast %15 : vector<1x8x1xf32> to vector<8x1xf32>
    %17 = vector.shape_cast %14 : vector<8x1xf32> to vector<1x8x1xf32>
    tpu.vector_store %arg6[%c0_12, %c0_13, %c0_14], %17 {strides = array<i32>} : memref<1x8x1xf32, #tpu.memory_space<vmem>>, vector<1x8x1xf32>,
    return
  }
  func.func @transform_0(%arg0: i32) -> (i32, i32) {
    %c0_i32 = arith.constant 0 : i32
    %c0_i32_0 = arith.constant 0 : i32
    return %c0_i32, %arg0 : i32, i32
  }
  func.func @transform_1(%arg0: i32) -> (i32, i32) {
    %c0_i32 = arith.constant 0 : i32
    %c0_i32_0 = arith.constant 0 : i32
    %c0_i32_1 = arith.constant 0 : i32
    return %c0_i32, %c0_i32_0 : i32, i32
  }
  func.func @transform_2(%arg0: i32) -> (i32, i32) {
    %c0_i32 = arith.constant 0 : i32
    %c0_i32_0 = arith.constant 0 : i32
    %c0_i32_1 = arith.constant 0 : i32
    return %c0_i32, %c0_i32_0 : i32, i32
  }
  func.func @transform_3(%arg0: i32) -> (i32, i32) {
    %c0_i32 = arith.constant 0 : i32
    %c0_i32_0 = arith.constant 0 : i32
    return %c0_i32, %arg0 : i32, i32
  }
  func.func @transform_4(%arg0: i32) -> (i32, i32, i32) {
    %c0_i32 = arith.constant 0 : i32
    %c0_i32_0 = arith.constant 0 : i32
    %c0_i32_1 = arith.constant 0 : i32
    return %arg0, %c0_i32, %c0_i32_0 : i32, i32, i32
  }
  func.func @transform_5(%arg0: i32) -> (i32, i32, i32) {
    %c0_i32 = arith.constant 0 : i32
    %c0_i32_0 = arith.constant 0 : i32
    %c0_i32_1 = arith.constant 0 : i32
    return %arg0, %c0_i32, %c0_i32_0 : i32, i32, i32
  }
}

module attributes {stable_mosaic.version = 11 : i64} {
  func.func @_bn_bypass_act_kernel(%arg0: i32, %arg1: memref<8x1024xf32, #tpu.memory_space<vmem>>, %arg2: memref<8x1xf32, #tpu.memory_space<vmem>>, %arg3: memref<8x1xf32, #tpu.memory_space<vmem>>, %arg4: memref<8x1024xbf16, #tpu.memory_space<vmem>>, %arg5: memref<8x8xbf16, #tpu.memory_space<vmem>>, %arg6: memref<8x1xf32, #tpu.memory_space<vmem>>, %arg7: memref<8x1024xf32, #tpu.memory_space<vmem>>) attributes {dimension_semantics = [#tpu.dimension_semantics<parallel>], iteration_bounds = array<i64: 2>, scalar_prefetch = 0 : i64, scratch_operands = 0 : i64, tpu.core_type = #tpu.core_type<tc>, window_params = [{transform_indices = @transform_0, window_bounds = array<i64: 8, 1024>}, {pipeline_mode = #tpu.pipeline_mode<synchronous>, transform_indices = @transform_1, window_bounds = array<i64: 8, 1>}, {pipeline_mode = #tpu.pipeline_mode<synchronous>, transform_indices = @transform_2, window_bounds = array<i64: 8, 1>}, {transform_indices = @transform_3, window_bounds = array<i64: 8, 1024>}, {pipeline_mode = #tpu.pipeline_mode<synchronous>, transform_indices = @transform_4, window_bounds = array<i64: 8, 8>}, {pipeline_mode = #tpu.pipeline_mode<synchronous>, transform_indices = @transform_5, window_bounds = array<i64: 8, 1>}, {transform_indices = @transform_6, window_bounds = array<i64: 8, 1024>}]} {
    %c0 = arith.constant 0 : index
    %c0_0 = arith.constant 0 : index
    %0 = vector.load %arg5[%c0, %c0_0] : memref<8x8xbf16, #tpu.memory_space<vmem>>, vector<8x8xbf16>
    %c0_1 = arith.constant 0 : index
    %c0_2 = arith.constant 0 : index
    %1 = vector.load %arg4[%c0_1, %c0_2] : memref<8x1024xbf16, #tpu.memory_space<vmem>>, vector<8x1024xbf16>
    %cst = arith.constant dense<0.000000e+00> : vector<8x1024xf32>
    %2 = tpu.matmul %0, %1, %cst {dimension_numbers = #tpu.dot_dimension_numbers<[1], [0], [0], [1], [0, 0, 1, 1], [], []>} : vector<8x8xbf16>, vector<8x1024xbf16>, vector<8x1024xf32> -> vector<8x1024xf32>
    %c0_3 = arith.constant 0 : index
    %c0_4 = arith.constant 0 : index
    %3 = vector.load %arg6[%c0_3, %c0_4] : memref<8x1xf32, #tpu.memory_space<vmem>>, vector<8x1xf32>
    %4 = vector.broadcast %3 : vector<8x1xf32> to vector<8x1024xf32>
    %5 = arith.addf %2, %4 : vector<8x1024xf32>
    %c0_5 = arith.constant 0 : index
    %c0_6 = arith.constant 0 : index
    %6 = vector.load %arg1[%c0_5, %c0_6] : memref<8x1024xf32, #tpu.memory_space<vmem>>, vector<8x1024xf32>
    %c0_7 = arith.constant 0 : index
    %c0_8 = arith.constant 0 : index
    %7 = vector.load %arg2[%c0_7, %c0_8] : memref<8x1xf32, #tpu.memory_space<vmem>>, vector<8x1xf32>
    %8 = vector.broadcast %7 : vector<8x1xf32> to vector<8x1024xf32>
    %9 = arith.mulf %6, %8 : vector<8x1024xf32>
    %c0_9 = arith.constant 0 : index
    %c0_10 = arith.constant 0 : index
    %10 = vector.load %arg3[%c0_9, %c0_10] : memref<8x1xf32, #tpu.memory_space<vmem>>, vector<8x1xf32>
    %11 = vector.broadcast %10 : vector<8x1xf32> to vector<8x1024xf32>
    %12 = arith.addf %9, %11 : vector<8x1024xf32>
    %13 = arith.addf %12, %5 : vector<8x1024xf32>
    %cst_11 = arith.constant 0.000000e+00 : f32
    %14 = vector.broadcast %cst_11 : f32 to vector<8x1024xf32>
    %15 = arith.maximumf %13, %14 : vector<8x1024xf32>
    %c0_12 = arith.constant 0 : index
    %c0_13 = arith.constant 0 : index
    %16 = vector.load %arg7[%c0_12, %c0_13] : memref<8x1024xf32, #tpu.memory_space<vmem>>, vector<8x1024xf32>
    tpu.vector_store %arg7[%c0_12, %c0_13], %15 {strides = array<i32>} : memref<8x1024xf32, #tpu.memory_space<vmem>>, vector<8x1024xf32>,
    return
  }
  func.func @transform_0(%arg0: i32) -> (i32, i32) {
    %c0_i32 = arith.constant 0 : i32
    %c0_i32_0 = arith.constant 0 : i32
    return %c0_i32, %arg0 : i32, i32
  }
  func.func @transform_1(%arg0: i32) -> (i32, i32) {
    %c0_i32 = arith.constant 0 : i32
    %c0_i32_0 = arith.constant 0 : i32
    %c0_i32_1 = arith.constant 0 : i32
    return %c0_i32, %c0_i32_0 : i32, i32
  }
  func.func @transform_2(%arg0: i32) -> (i32, i32) {
    %c0_i32 = arith.constant 0 : i32
    %c0_i32_0 = arith.constant 0 : i32
    %c0_i32_1 = arith.constant 0 : i32
    return %c0_i32, %c0_i32_0 : i32, i32
  }
  func.func @transform_3(%arg0: i32) -> (i32, i32) {
    %c0_i32 = arith.constant 0 : i32
    %c0_i32_0 = arith.constant 0 : i32
    return %c0_i32, %arg0 : i32, i32
  }
  func.func @transform_4(%arg0: i32) -> (i32, i32) {
    %c0_i32 = arith.constant 0 : i32
    %c0_i32_0 = arith.constant 0 : i32
    %c0_i32_1 = arith.constant 0 : i32
    return %c0_i32, %c0_i32_0 : i32, i32
  }
  func.func @transform_5(%arg0: i32) -> (i32, i32) {
    %c0_i32 = arith.constant 0 : i32
    %c0_i32_0 = arith.constant 0 : i32
    %c0_i32_1 = arith.constant 0 : i32
    return %c0_i32, %c0_i32_0 : i32, i32
  }
  func.func @transform_6(%arg0: i32) -> (i32, i32) {
    %c0_i32 = arith.constant 0 : i32
    %c0_i32_0 = arith.constant 0 : i32
    return %c0_i32, %arg0 : i32, i32
  }
}

</mosaic_0001>

<bundles_post_ra>
// kernel: down_layer_residual_forward.6
= control target key start
LH: loop header
LB: loop body
LE: loop exit
PB: predicated region body
PF: predicated region fallthrough
CT: control target
= control target key end

     0   :  { %s6722_s23 = smov 0   ;;  %s7757_s0 = inlined_call_operand.vmem [shape: bf16[4,256], index: 0, kind: input, shape index: {}]   ;;  %s7758_s1 = inlined_call_operand.vmem [shape: f32[4,1], index: 1, kind: input, shape index: {}]   ;;  %s7759_s2 = inlined_call_operand.vmem [shape: bf16[256,1536], index: 2, kind: input, shape index: {}]   ;;  %s7760_s3 = inlined_call_operand.<no memory space> [shape: bf16[], index: 3, kind: input, shape index: {}]   ;;  %s7761_s4 = inlined_call_operand.vmem [shape: f32[4,2048], index: 4, kind: output, shape index: {0}]   ;;  %s7762_s5 = inlined_call_operand.vmem [shape: f32[2,4,1], index: 5, kind: output, shape index: {1}]   ;;  %s7763_s6 = inlined_call_operand.vmem [shape: f32[2,4,1], index: 6, kind: output, shape index: {2}]  }
   0x1   :  { %v12_v0 = vstv %s7760_s3 }
   0x2   :  { %v6720_v1 = vunpack.i.l.bf16 %v12_v0 }
   0x3 LB: > { %s6728_s24 = sadd.s32 4294967295, %s6678_s23   ;;  %p5763_p0 = scmp.ge.s32.totalorder %s6678_s23, 1  ;;  %s6678_s23 = sphi %s6722_s23, %s22_s23  }
   0x4   : > { %p207_p1 = scmp.lt.s32.totalorder %s6678_s23, 3 }
   0x6   : > { %p208_p2 = pnand %p5763_p0, %p207_p1 }
   0x8   : > { %211 = sbr.rel (%p208_p2) target bundleno = 568 (0x238), region = 32 }
   0xf   : > { %s6733_s3 = sshll.u32 %s6728_s24, 3  ;;  %v6738_v2 = vld.sshfl [vmem:[%s7757_s0] sm:$0x33 pattern:$0x76325410]  ;;  %vm5595_vm4 = vcmask 1043456  }
  0x10   : > { %p252_p3 = scmp.lt.s32.totalorder %s6733_s3, 11  ;;  %v6743_v3 = vcombine.high %v6738_v2, %v6738_v2  ;;  %s306_s29 = sadd.s32 4, %s6733_s3  ;;  %vm5613_vm5 = vcmask 3072  }
  0x11   : > { %s6756_s9 = ssub.s32 11, %s306_s29  ;;  %s332_s16 = sadd.s32 5, %s6733_s3 }
  0x12   : > { %s253_s27 = scalar_select %p252_p3, %s6733_s3, 11  ;;  %5443 = vmatprep.mubr.bf16.mxu0 %v6743_v3  ;;  %5484 = vmatprep.mubr.bf16.mxu1 %v6743_v3 }
  0x13   : > { %p308_p4 = scmp.lt.s32.totalorder %s6756_s9, 0  ;;  %s6821_s18 = ssub.s32 11, %s332_s16 }
  0x14   : > { %s5765_s28 = sshll.u32 %s253_s27, 2  ;;  %s358_s19 = sadd.s32 6, %s6733_s3 }
  0x15   : > { %s6752_s8 = scalar_lea.vmem %s7759_s2, %s5765_s28  ;;  %s6830_s21 = ssub.s32 11, %s358_s19 }
  0x16   : > { %v275_v4 = vld [vmem:[%s6752_s8] sm:$0xff]   ;;  %v6546_v5 = vld [vmem:[%s6752_s8 + $0x30] sm:$0xff]   ;;  %v6547_v6 = vld [vmem:[%s6752_s8 + $0x8] sm:$0xff]   ;;  %s6766_s10 = scalar_select %p308_p4, 0, 255 }
  0x17   : > { %280 = vst [vmem:[#allocation7] sm:$0xff] %v275_v4   ;;  %v6548_v7 = vld [vmem:[%s6752_s8 + $0x38] sm:$0xff]   ;;  %v6551_v8 = vld [vmem:[%s6752_s8 + $0x60] sm:$0xff]   ;;  %v6552_v11 = vld [vmem:[%s6752_s8 + $0x90] sm:$0xff]   ;;  %p334_p5 = scmp.lt.s32.totalorder %s6821_s18, 0  ;;  %s384_s25 = sadd.s32 7, %s6733_s3 }
  0x18   : > { %v6030_v9 = vcombine.high %v6547_v6, %v6548_v7  ;;  %v6029_v10 = vcombine.low %v6547_v6, %v6548_v7  ;;  %v6554_v12 = vld [vmem:[%s6752_s8 + $0x68] sm:$0xff]   ;;  %v6555_v13 = vld [vmem:[%s6752_s8 + $0x98] sm:$0xff]   ;;  %v6036_v15 = vcombine.high %v6551_v8, %v6552_v11  ;;  %v6559_v16 = vld [vmem:[%s6752_s8 + $0xc0] sm:$0xff]   ;;  %v6035_v24 = vcombine.low %v6551_v8, %v6552_v11  ;;  %s310_s11 = sshrl.u32 %s6766_s10, 1  ;;  %p360_p6 = scmp.lt.s32.totalorder %s6830_s21, 0 }
  0x19   : > { %v6038_v19 = vcombine.high %v6554_v12, %v6555_v13  ;;  %v6037_v20 = vcombine.low %v6554_v12, %v6555_v13  ;;  %v6560_v21 = vld [vmem:[%s6752_s8 + $0xf0] sm:$0xff]   ;;  %v6562_v22 = vld [vmem:[%s6752_s8 + $0xc8] sm:$0xff]   ;;  %v6563_v23 = vld [vmem:[%s6752_s8 + $0xf8] sm:$0xff]   ;;  %s6801_s12 = sor.u32 %s310_s11, %s6766_s10  ;;  %s6853_s27 = ssub.s32 11, %s384_s25 }
  0x1a   : > { %5452 = vmatprep.subr.bf16.mxu1 %v6030_v9  ;;  %v6567_v25 = vld [vmem:[%s6752_s8 + $0x120] sm:$0xff]   ;;  %v6044_v26 = vcombine.high %v6559_v16, %v6560_v21  ;;  %v6046_v27 = vcombine.high %v6562_v22, %v6563_v23  ;;  %v6045_v28 = vcombine.low %v6562_v22, %v6563_v23  ;;  %v6568_v29 = vld [vmem:[%s6752_s8 + $0x150] sm:$0xff]   ;;  %v6570_v30 = vld [vmem:[%s6752_s8 + $0x128] sm:$0xff]   ;;  %v6043_v32 = vcombine.low %v6559_v16, %v6560_v21  ;;  %s312_s13 = sand.u32 85, %s6801_s12  ;;  %p386_p7 = scmp.lt.s32.totalorder %s6853_s27, 0 }
  0x1b   : > { %5453 = vmatpush1.bf16.msra.mxu1 %v6029_v10  ;;  %v6571_v31 = vld [vmem:[%s6752_s8 + $0x158] sm:$0xff]   ;;  %v6575_v33 = vld [vmem:[%s6752_s8 + $0x180] sm:$0xff]   ;;  %v6052_v34 = vcombine.high %v6567_v25, %v6568_v29  ;;  %v6576_v37 = vld [vmem:[%s6752_s8 + $0x1b0] sm:$0xff]   ;;  %v6051_v40 = vcombine.low %v6567_v25, %v6568_v29  ;;  %s313_s14 = sshrl.u32 %s312_s13, 1  ;;  %p262_p8 = scmp.lt.s32.totalorder %s6733_s3, 15 }
  0x1c   : > { %5454 = vmatprep.subr.bf16.mxu1 %v6038_v19  ;;  %v6054_v35 = vcombine.high %v6570_v30, %v6571_v31  ;;  %v6053_v36 = vcombine.low %v6570_v30, %v6571_v31  ;;  %v6578_v38 = vld [vmem:[%s6752_s8 + $0x188] sm:$0xff]   ;;  %v6579_v39 = vld [vmem:[%s6752_s8 + $0x1b8] sm:$0xff]   ;;  %v6583_v41 = vld [vmem:[%s6752_s8 + $0x1e0] sm:$0xff]   ;;  %v6060_v42 = vcombine.high %v6575_v33, %v6576_v37  ;;  %v6059_v48 = vcombine.low %v6575_v33, %v6576_v37  ;;  %s6813_s15 = sor.u32 %s313_s14, %s312_s13  ;;  %p267_p9 = scmp.lt.s32.totalorder %s6728_s24, 1 }
  0x1d   : > { %v6062_v43 = vcombine.high %v6578_v38, %v6579_v39  ;;  %v6061_v44 = vcombine.low %v6578_v38, %v6579_v39  ;;  %v6584_v45 = vld [vmem:[%s6752_s8 + $0x210] sm:$0xff]   ;;  %v6586_v46 = vld [vmem:[%s6752_s8 + $0x1e8] sm:$0xff]   ;;  %v6587_v47 = vld [vmem:[%s6752_s8 + $0x218] sm:$0xff]   ;;  %s315_s17 = sand.u32 51, %s6813_s15  ;;  %s7773_s3 = smov (!%p262_p8, %s6733_s3), 15 }
  0x1e   : > { %v4626_v14 = vld [vmem:[#allocation7] sm:$0xff]  ;;  %v6068_v50 = vcombine.high %v6583_v41, %v6584_v45  ;;  %v6070_v51 = vcombine.high %v6586_v46, %v6587_v47  ;;  %v6069_v52 = vcombine.low %v6586_v46, %v6587_v47  ;;  %v6592_v53 = vld [vmem:[%s6752_s8 + $0x270] sm:$0xff]   ;;  %v6594_v54 = vld [vmem:[%s6752_s8 + $0x248] sm:$0xff]   ;;  %v6067_v56 = vcombine.low %v6583_v41, %v6584_v45  ;;  %s316_s20 = sshrl.u32 %s315_s17, 2  ;;  %s7775_s24 = smov (!%p267_p9, %s6728_s24), 1 }
  0x1f   : > { %v6028_v17 = vcombine.high %v4626_v14, %v6546_v5  ;;  %v6027_v18 = vcombine.low %v4626_v14, %v6546_v5  ;;  %5455 = vmatpush1.bf16.msra.mxu1 %v6037_v20  ;;  %v6591_v49 = vld [vmem:[%s6752_s8 + $0x240] sm:$0xff]   ;;  %v6595_v55 = vld [vmem:[%s6752_s8 + $0x278] sm:$0xff]   ;;  %v6600_v61 = vld [vmem:[%s6752_s8 + $0x2d0] sm:$0xff]   ;;  %s317_s22 = sor.u32 %s316_s20, %s315_s17 }
  0x20   : > { %5456 = vmatprep.subr.bf16.mxu1 %v6046_v27  ;;  %v6599_v57 = vld [vmem:[%s6752_s8 + $0x2a0] sm:$0xff]   ;;  %v6076_v58 = vcombine.high %v6591_v49, %v6592_v53  ;;  %v6078_v59 = vcombine.high %v6594_v54, %v6595_v55  ;;  %v6077_v60 = vcombine.low %v6594_v54, %v6595_v55  ;;  %v6602_v62 = vld [vmem:[%s6752_s8 + $0x2a8] sm:$0xff]   ;;  %v6603_v63 = vld [vmem:[%s6752_s8 + $0x2d8] sm:$0xff]   ;;  %v6075_v0 = vcombine.low %v6591_v49, %v6592_v53  ;;  %s6844_s26 = sand.u32 15, %s317_s22 }
  0x21   : > { %5411 = vmatprep.subr.bf16.mxu0 %v6028_v17  ;;  %v6607_v4 = vld [vmem:[%s6752_s8 + $0x300] sm:$0xff]   ;;  %v6084_v5 = vcombine.high %v6599_v57, %v6600_v61  ;;  %v6086_v6 = vcombine.high %v6602_v62, %v6603_v63  ;;  %v6085_v7 = vcombine.low %v6602_v62, %v6603_v63  ;;  %v6608_v8 = vld [vmem:[%s6752_s8 + $0x330] sm:$0xff]   ;;  %v6610_v9 = vld [vmem:[%s6752_s8 + $0x308] sm:$0xff]   ;;  %v6083_v11 = vcombine.low %v6599_v57, %v6600_v61  ;;  %s335_s28 = scalar_select %p334_p5, 0, 255 }
  0x22   : > { %5412 = vmatpush1.bf16.msra.mxu0 %v6027_v18  ;;  %v6611_v10 = vld [vmem:[%s6752_s8 + $0x338] sm:$0xff]   ;;  %v6615_v12 = vld [vmem:[%s6752_s8 + $0x360] sm:$0xff]   ;;  %v6092_v13 = vcombine.high %v6607_v4, %v6608_v8  ;;  %v6616_v16 = vld [vmem:[%s6752_s8 + $0x390] sm:$0xff]   ;;  %v6091_v19 = vcombine.low %v6607_v4, %v6608_v8  ;;  %v350_v62 = vstv %s6821_s18  ;;  %s361_s29 = scalar_select %p360_p6, 0, 255 }
  0x23   : > { %5413 = vmatprep.subr.bf16.mxu0 %v6036_v15  ;;  %5457 = vmatpush1.bf16.msra.mxu1 %v6045_v28  ;;  %v6094_v14 = vcombine.high %v6610_v9, %v6611_v10  ;;  %v6093_v15 = vcombine.low %v6610_v9, %v6611_v10  ;;  %v6618_v17 = vld [vmem:[%s6752_s8 + $0x368] sm:$0xff]   ;;  %v6619_v18 = vld [vmem:[%s6752_s8 + $0x398] sm:$0xff]   ;;  %v6623_v20 = vld [vmem:[%s6752_s8 + $0x3c0] sm:$0xff]   ;;  %v6100_v21 = vcombine.high %v6615_v12, %v6616_v16  ;;  %v402_v9 = vstv %s6853_s27  ;;  %s336_s30 = sshrl.u32 %s335_s28, 1 }
  0x24   : > { %5458 = vmatprep.subr.bf16.mxu1 %v6054_v35  ;;  %v6102_v22 = vcombine.high %v6618_v17, %v6619_v18  ;;  %v6101_v23 = vcombine.low %v6618_v17, %v6619_v18  ;;  %v6626_v25 = vld [vmem:[%s6752_s8 + $0x3c8] sm:$0xff]   ;;  %v6099_v27 = vcombine.low %v6615_v12, %v6616_v16  ;;  %v6631_v28 = vld [vmem:[%s6752_s8 + $0x420] sm:$0xff]   ;;  %v6667_v10 = vld [vmem:[%s6752_s8 + $0x5d8] sm:$0xff]   ;;  %s6886_s7 = sor.u32 %s336_s30, %s335_s28  ;;  %vm6888_vm1 = vcmp.lt.s32.totalorder %v350_v62, 0 }
  0x25   : > { %v6634_v33 = vld [vmem:[%s6752_s8 + $0x428] sm:$0xff]   ;;  %v6842_v61 = vld [vmem:[%s6752_s8 + $0x5a0] sm:$0xff]   ;;  %v5790_v16 = vld [vmem:[%s6752_s8 + $0x70] sm:%s6844_s26]  ;;  %s338_s10 = sand.u32 85, %s6886_s7  ;;  %vm7016_vm3 = vcmp.lt.s32.totalorder %v402_v9, 0 }
  0x26   : > { %5414 = vmatpush1.bf16.msra.mxu0 %v6035_v24  ;;  %v6624_v24 = vld [vmem:[%s6752_s8 + $0x3f0] sm:$0xff]   ;;  %v6642_v41 = vld [vmem:[%s6752_s8 + $0x488] sm:$0xff]   ;;  %s339_s12 = sshrl.u32 %s338_s10, 1 }
  0x27   : > { %5415 = vmatprep.subr.bf16.mxu0 %v6044_v26  ;;  %5459 = vmatpush1.bf16.msra.mxu1 %v6053_v36  ;;  %v6627_v26 = vld [vmem:[%s6752_s8 + $0x3f8] sm:$0xff]   ;;  %v6108_v29 = vcombine.high %v6623_v20, %v6624_v24  ;;  %v6107_v35 = vcombine.low %v6623_v20, %v6624_v24  ;;  %v6639_v36 = vld [vmem:[%s6752_s8 + $0x480] sm:$0xff]   ;;  %v6650_v49 = vld [vmem:[%s6752_s8 + $0x4e8] sm:$0xff]   ;;  %v592_v20 = vunpack.c.l.bf16 %v5790_v16  ;;  %s340_s14 = sor.u32 %s339_s12, %s338_s10 }
  0x28   : > { %5460 = vmatprep.subr.bf16.mxu1 %v6062_v43  ;;  %v6110_v30 = vcombine.high %v6626_v25, %v6627_v26  ;;  %v6109_v31 = vcombine.low %v6626_v25, %v6627_v26  ;;  %v6658_v57 = vld [vmem:[%s6752_s8 + $0x548] sm:$0xff]   ;;  %s341_s16 = sand.u32 51, %s340_s14 }
  0x29   : > { %s342_s18 = sshrl.u32 %s341_s16, 2 }
  0x2a   : > { %5416 = vmatpush1.bf16.msra.mxu0 %v6043_v32  ;;  %v6632_v32 = vld [vmem:[%s6752_s8 + $0x450] sm:$0xff]   ;;  %s343_s20 = sor.u32 %s342_s18, %s341_s16 }
  0x2b   : > { %5417 = vmatprep.subr.bf16.mxu0 %v6052_v34  ;;  %5461 = vmatpush1.bf16.msra.mxu1 %v6061_v44  ;;  %v6635_v34 = vld [vmem:[%s6752_s8 + $0x458] sm:$0xff]   ;;  %v6116_v37 = vcombine.high %v6631_v28, %v6632_v32  ;;  %v6115_v43 = vcombine.low %v6631_v28, %v6632_v32  ;;  %v6647_v44 = vld [vmem:[%s6752_s8 + $0x4e0] sm:$0xff]   ;;  %s6952_s22 = sand.u32 15, %s343_s20 }
  0x2c   : > { %5462 = vmatprep.subr.bf16.mxu1 %v6070_v51  ;;  %v6118_v38 = vcombine.high %v6634_v33, %v6635_v34  ;;  %v6117_v39 = vcombine.low %v6634_v33, %v6635_v34 }
  0x2e   : > { %5418 = vmatpush1.bf16.msra.mxu0 %v6051_v40  ;;  %v6640_v40 = vld [vmem:[%s6752_s8 + $0x4b0] sm:$0xff]  }
  0x2f   : > { %5419 = vmatprep.subr.bf16.mxu0 %v6060_v42  ;;  %5463 = vmatpush1.bf16.msra.mxu1 %v6069_v52  ;;  %v6643_v42 = vld [vmem:[%s6752_s8 + $0x4b8] sm:$0xff]   ;;  %v6124_v45 = vcombine.high %v6639_v36, %v6640_v40  ;;  %v6123_v51 = vcombine.low %v6639_v36, %v6640_v40  ;;  %v6828_v52 = vld [vmem:[%s6752_s8 + $0x540] sm:$0xff]  }
  0x30   : > { %5464 = vmatprep.subr.bf16.mxu1 %v6078_v59  ;;  %v6126_v46 = vcombine.high %v6642_v41, %v6643_v42  ;;  %v6125_v47 = vcombine.low %v6642_v41, %v6643_v42  ;;  %v324_v59 = vstv %s6756_s9  ;;  %s362_s9 = sshrl.u32 %s361_s29, 1 }
  0x31   : > { %vm6856_vm0 = vcmp.lt.s32.totalorder %v324_v59, 0  ;;  %s6901_s11 = sor.u32 %s362_s9, %s361_s29 }
  0x32   : > { %5420 = vmatpush1.bf16.msra.mxu0 %v6059_v48  ;;  %v6648_v48 = vld [vmem:[%s6752_s8 + $0x510] sm:$0xff]   ;;  %s364_s13 = sand.u32 85, %s6901_s11 }
  0x33   : > { %5421 = vmatprep.subr.bf16.mxu0 %v6068_v50  ;;  %5465 = vmatpush1.bf16.msra.mxu1 %v6077_v60  ;;  %v6651_v50 = vld [vmem:[%s6752_s8 + $0x518] sm:$0xff]   ;;  %v6132_v53 = vcombine.high %v6647_v44, %v6648_v48  ;;  %v6131_v60 = vcombine.low %v6647_v44, %v6648_v48  ;;  %v5854_v44 = vld [vmem:[%s6752_s8 + $0x1f0] sm:%s6844_s26]  ;;  %s365_s15 = sshrl.u32 %s364_s13, 1 }
  0x34   : > { %5466 = vmatprep.subr.bf16.mxu1 %v6086_v6  ;;  %v6134_v54 = vcombine.high %v6650_v49, %v6651_v50  ;;  %v6133_v55 = vcombine.low %v6650_v49, %v6651_v50  ;;  %v376_v6 = vstv %s6830_s21  ;;  %v5862_v49 = vld [vmem:[%s6752_s8 + $0x220] sm:%s6844_s26]  ;;  %s366_s17 = sor.u32 %s365_s15, %s364_s13  ;;  %v1680_v59 = vunpack.c.l.bf16 %v5854_v44 }
  0x35   : > { %vm6903_vm2 = vcmp.lt.s32.totalorder %v376_v6, 0  ;;  %v5870_v50 = vld [vmem:[%s6752_s8 + $0x250] sm:%s6844_s26]  ;;  %s367_s19 = sand.u32 51, %s366_s17  ;;  %v1816_v62 = vunpack.c.l.bf16 %v5862_v49  ;;  %s5768_s17 = sshll.u32 %s7773_s3, 2 }
  0x36   : > { %5422 = vmatpush1.bf16.msra.mxu0 %v6067_v56  ;;  %v6833_v56 = vld [vmem:[%s6752_s8 + $0x570] sm:$0xff]   ;;  %s368_s21 = sshrl.u32 %s367_s19, 2  ;;  %s7724_s20 = scalar_lea.vmem %s7761_s4, %s5768_s17 }
  0x37   : > { %5423 = vmatprep.subr.bf16.mxu0 %v6076_v58  ;;  %5467 = vmatpush1.bf16.msra.mxu1 %v6085_v7  ;;  %v6659_v58 = vld [vmem:[%s6752_s8 + $0x578] sm:$0xff]   ;;  %v6140_v63 = vcombine.high %v6828_v52, %v6833_v56  ;;  %v6666_v7 = vld [vmem:[%s6752_s8 + $0x5a8] sm:$0xff]   ;;  %v6139_v12 = vcombine.low %v6828_v52, %v6833_v56  ;;  %s369_s25 = sor.u32 %s368_s21, %s367_s19  ;;  %s5769_s3 = sshll.u32 %s7775_s24, 2 }
  0x38   : > { %5468 = vmatprep.subr.bf16.mxu1 %v6094_v14  ;;  %v6141_v4 = vcombine.low %v6658_v57, %v6659_v58  ;;  %v6150_v17 = vcombine.high %v6666_v7, %v6667_v10  ;;  %v6149_v18 = vcombine.low %v6666_v7, %v6667_v10  ;;  %v6963_v7 = vld [vmem:[%s6752_s8 + $0x2b0] sm:%s6844_s26]  ;;  %s6969_s28 = sand.u32 15, %s369_s25  ;;  %s270_s25 = scalar_lea.vmem %s7762_s5, %s5769_s3 }
  0x39   : > { %v5775_v10 = vld [vmem:[%s6752_s8 + $0x14] sm:%s6952_s22]  ;;  %s387_s29 = scalar_select %p386_p7, 0, 255 }
  0x3a   : > { %5424 = vmatpush1.bf16.msra.mxu0 %v6075_v0  ;;  %v6142_v0 = vcombine.high %v6658_v57, %v6659_v58  ;;  %v346_v16 = vunpack.c.l.bf16 %v5775_v10 }
  0x3b   : > { %5425 = vmatprep.subr.bf16.mxu0 %v6084_v5  ;;  %5469 = vmatpush1.bf16.msra.mxu1 %v6093_v15  ;;  %v6850_v5 = vld [vmem:[%s6752_s8 + $0x5d0] sm:$0xff]   ;;  %v5782_v15 = vld [vmem:[%s6752_s8 + $0x40] sm:%s6844_s26]  ;;  %s388_s30 = sshrl.u32 %s387_s29, 1 }
  0x3c   : > { %5470 = vmatprep.subr.bf16.mxu1 %v6102_v22  ;;  %v5806_v22 = vld [vmem:[%s6752_s8 + $0xd0] sm:%s6844_s26]  ;;  %v6147_v24 = vcombine.low %v6842_v61, %v6850_v5  ;;  %s389_s7 = sor.u32 %s388_s30, %s387_s29  ;;  %s274_s30 = scalar_lea.vmem %s7763_s6, %s5769_s3 }
  0x3d   : > { %v864_v28 = vunpack.c.l.bf16 %v5806_v22  ;;  %s390_s9 = sand.u32 85, %s389_s7 }
  0x3e   : > { %5426 = vmatpush1.bf16.msra.mxu0 %v6083_v11  ;;  %v5774_v11 = vld [vmem:[%s6752_s8 + $0x10] sm:%s6844_s26]  ;;  %s391_s27 = sshrl.u32 %s390_s9, 1 }
  0x3f   : > { %5427 = vmatprep.subr.bf16.mxu0 %v6092_v13  ;;  %5471 = vmatpush1.bf16.msra.mxu1 %v6101_v23  ;;  %v6148_v13 = vcombine.high %v6842_v61, %v6850_v5  ;;  %v320_v14 = vunpack.c.l.bf16 %v5774_v11  ;;  %v6680_v23 = vmov 0   ;;  %v1686_v5 = vsel %vm6856_vm0, %v6720_v1, %v1680_v59  ;;  %v5783_v11 = vld [vmem:[%s6752_s8 + $0x44] sm:%s6952_s22]  ;;  %s392_s10 = sor.u32 %s391_s27, %s390_s9 }
  0x40   : > { %5472 = vmatprep.subr.bf16.mxu1 %v6110_v30  ;;  %6545 = vset.pattern.permute.xlu0 %v6680_v23  ;;  %v5822_v30 = vld [vmem:[%s6752_s8 + $0x130] sm:%s6844_s26]  ;;  %s393_s11 = sand.u32 51, %s392_s10 }
  0x41   : > { %v326_v25 = vsel %vm6856_vm0, %v6720_v1, %v320_v14  ;;  %v1136_v42 = vunpack.c.l.bf16 %v5822_v30  ;;  %v1822_v14 = vsel %vm6856_vm0, %v6720_v1, %v1816_v62  ;;  %s394_s12 = sshrl.u32 %s393_s11, 2 }
  0x42   : > { %5428 = vmatpush1.bf16.msra.mxu0 %v6091_v19  ;;  %v456_v19 = vunpack.c.l.bf16 %v5782_v15  ;;  %s395_s13 = sor.u32 %s394_s12, %s393_s11 }
  0x43   : > { %5429 = vmatprep.subr.bf16.mxu0 %v6100_v21  ;;  %5473 = vmatpush1.bf16.msra.mxu1 %v6109_v31  ;;  %v5798_v21 = vld [vmem:[%s6752_s8 + $0xa0] sm:%s6844_s26]  ;;  %v6681_v31 = vmov 0.0   ;;  %s7081_s14 = sand.u32 15, %s395_s13 }
  0x44   : > { %5474 = vmatprep.subr.bf16.mxu1 %v6118_v38  ;;  %v328_v32 = vpack.c.bf16 %v6681_v31, %v326_v25  ;;  %v462_v33 = vsel %vm6856_vm0, %v6720_v1, %v456_v19  ;;  %v5838_v38 = vld [vmem:[%s6752_s8 + $0x190] sm:%s6844_s26]  ;;  %v5784_v19 = vld [vmem:[%s6752_s8 + $0x48] sm:%s6969_s28] }
  0x45   : > { %v508_v23 = vunpack.c.l.bf16 %v5784_v19  ;;  %v5799_v25 = vld [vmem:[%s6752_s8 + $0xa4] sm:%s6952_s22]  ;;  %v5777_v19 = vld [vmem:[%s6752_s8 + $0x1c] sm:%s7081_s14] }
  0x46   : > { %5430 = vmatpush1.bf16.msra.mxu0 %v6099_v27  ;;  %v728_v27 = vunpack.c.l.bf16 %v5798_v21  ;;  %330 = vst [vmem:[#allocation7 + $0x10] sm:$0xf] %v328_v32  ;;  %v754_v32 = vunpack.c.l.bf16 %v5799_v25 }
  0x47   : > { %5431 = vmatprep.subr.bf16.mxu0 %v6108_v29  ;;  %5475 = vmatpush1.bf16.msra.mxu1 %v6117_v39  ;;  %v5814_v29 = vld [vmem:[%s6752_s8 + $0x100] sm:%s6844_s26]  ;;  %v464_v39 = vpack.c.bf16 %v6681_v31, %v462_v33  ;;  %v5792_v33 = vld [vmem:[%s6752_s8 + $0x78] sm:%s6969_s28] }
  0x48   : > { %5476 = vmatprep.subr.bf16.mxu1 %v6126_v46  ;;  %v1000_v36 = vunpack.c.l.bf16 %v5814_v29  ;;  %v734_v41 = vsel %vm6856_vm0, %v6720_v1, %v728_v27  ;;  %v870_v46 = vsel %vm6856_vm0, %v6720_v1, %v864_v28  ;;  %v2224_v27 = vunpack.c.l.bf16 %v6963_v7 }
  0x49   : > { %466 = vst [vmem:[#allocation7 + $0x30] sm:$0xf] %v464_v39  ;;  %v352_v28 = vsel %vm6888_vm1, %v6720_v1, %v346_v16  ;;  %v514_v39 = vsel %vm6903_vm2, %v6720_v1, %v508_v23  ;;  %v760_v44 = vsel %vm6888_vm1, %v6720_v1, %v754_v32  ;;  %v644_v49 = vunpack.c.l.bf16 %v5792_v33  ;;  %v5793_v32 = vld [vmem:[%s6752_s8 + $0x7c] sm:%s7081_s14] }
  0x4a   : > { %5432 = vmatpush1.bf16.msra.mxu0 %v6107_v35  ;;  %v598_v35 = vsel %vm6856_vm0, %v6720_v1, %v592_v20  ;;  %v1824_v20 = vpack.c.bf16 %v6681_v31, %v1822_v14  ;;  %v7079_v14 = vld [vmem:[%s6752_s8 + $0x1c4] sm:%s6952_s22] }
  0x4b   : > { %5433 = vmatprep.subr.bf16.mxu0 %v6116_v37  ;;  %5477 = vmatpush1.bf16.msra.mxu1 %v6125_v47  ;;  %v5830_v37 = vld [vmem:[%s6752_s8 + $0x160] sm:%s6844_s26]  ;;  %v600_v40 = vpack.c.bf16 %v6681_v31, %v598_v35  ;;  %v1006_v47 = vsel %vm6856_vm0, %v6720_v1, %v1000_v36  ;;  %v5800_v35 = vld [vmem:[%s6752_s8 + $0xa8] sm:%s6969_s28] }
  0x4c   : > { %5478 = vmatprep.subr.bf16.mxu1 %v6134_v54  ;;  %v1272_v48 = vunpack.c.l.bf16 %v5830_v37  ;;  %v1008_v52 = vpack.c.bf16 %v6681_v31, %v1006_v47  ;;  %v1408_v54 = vunpack.c.l.bf16 %v5838_v38  ;;  %1826 = vst [vmem:[#allocation7 + $0x170] sm:$0xf] %v1824_v20  ;;  %v5785_v20 = vld [vmem:[%s6752_s8 + $0x4c] sm:%s7081_s14] }
  0x4d   : > { %602 = vst [vmem:[#allocation7 + $0x50] sm:$0xf] %v600_v40  ;;  %v5807_v40 = vld [vmem:[%s6752_s8 + $0xd4] sm:%s6952_s22] }
  0x4e   : > { %5434 = vmatpush1.bf16.msra.mxu0 %v6115_v43  ;;  %v5846_v43 = vld [vmem:[%s6752_s8 + $0x1c0] sm:%s6844_s26]  ;;  %v1278_v57 = vsel %vm6856_vm0, %v6720_v1, %v1272_v48  ;;  %1010 = vst [vmem:[#allocation7 + $0xb0] sm:$0xf] %v1008_v52  ;;  %v1414_v61 = vsel %vm6856_vm0, %v6720_v1, %v1408_v54  ;;  %v762_v48 = vpack.c.bf16 %v6681_v31, %v760_v44 }
  0x4f   : > { %5435 = vmatprep.subr.bf16.mxu0 %v6124_v45  ;;  %5479 = vmatpush1.bf16.msra.mxu1 %v6133_v55  ;;  %v736_v45 = vpack.c.bf16 %v6681_v31, %v734_v41  ;;  %v5878_v55 = vld [vmem:[%s6752_s8 + $0x280] sm:%s6844_s26]  ;;  %v1544_v58 = vunpack.c.l.bf16 %v5846_v43  ;;  %v516_v43 = vpack.c.bf16 %v6681_v31, %v514_v39  ;;  %v5801_v39 = vld [vmem:[%s6752_s8 + $0xac] sm:%s7081_s14] }
  0x50   : > { %5480 = vmatprep.subr.bf16.mxu1 %v6142_v0  ;;  %v1416_v0 = vpack.c.bf16 %v6681_v31, %v1414_v61  ;;  %v2088_v6 = vunpack.c.l.bf16 %v5878_v55  ;;  %v5815_v41 = vld [vmem:[%s6752_s8 + $0x104] sm:%s6952_s22]  ;;  %764 = vst [vmem:[#allocation7 + $0x74] sm:$0xf] %v762_v48 }
  0x51   : > { %738 = vst [vmem:[#allocation7 + $0x70] sm:$0xf] %v736_v45  ;;  %v5808_v45 = vld [vmem:[%s6752_s8 + $0xd8] sm:%s6969_s28]  ;;  %v5831_v52 = vld [vmem:[%s6752_s8 + $0x164] sm:%s6952_s22]  ;;  %518 = vst [vmem:[#allocation7 + $0x38] sm:$0xf] %v516_v43  ;;  %v1026_v54 = vunpack.c.l.bf16 %v5815_v41 }
  0x52   : > { %5436 = vmatpush1.bf16.msra.mxu0 %v6123_v51  ;;  %v872_v51 = vpack.c.bf16 %v6681_v31, %v870_v46  ;;  %1418 = vst [vmem:[#allocation7 + $0x110] sm:$0xf] %v1416_v0  ;;  %v5816_v46 = vld [vmem:[%s6752_s8 + $0x108] sm:%s6969_s28]  ;;  %v916_v55 = vunpack.c.l.bf16 %v5808_v45  ;;  %v806_v45 = vunpack.c.l.bf16 %v5801_v39 }
  0x53   : > { %5437 = vmatprep.subr.bf16.mxu0 %v6132_v53  ;;  %5481 = vmatpush1.bf16.msra.mxu1 %v6141_v4  ;;  %v1142_v53 = vsel %vm6856_vm0, %v6720_v1, %v1136_v42  ;;  %v1550_v4 = vsel %vm6856_vm0, %v6720_v1, %v1544_v58  ;;  %v1032_v0 = vsel %vm6888_vm1, %v6720_v1, %v1026_v54 }
  0x54   : > { %5482 = vmatprep.subr.bf16.mxu1 %v6150_v17  ;;  %v1144_v56 = vpack.c.bf16 %v6681_v31, %v1142_v53  ;;  %874 = vst [vmem:[#allocation7 + $0x90] sm:$0xf] %v872_v51  ;;  %v482_v17 = vunpack.c.l.bf16 %v5783_v11  ;;  %v5823_v51 = vld [vmem:[%s6752_s8 + $0x134] sm:%s6952_s22]  ;;  %v890_v53 = vunpack.c.l.bf16 %v5807_v40  ;;  %v1034_v10 = vpack.c.bf16 %v6681_v31, %v1032_v0  ;;  %v5809_v40 = vld [vmem:[%s6752_s8 + $0xdc] sm:%s7081_s14] }
  0x55   : > { %v1162_v59 = vunpack.c.l.bf16 %v5823_v51  ;;  %v922_v11 = vsel %vm6903_vm2, %v6720_v1, %v916_v55  ;;  %v812_v55 = vsel %vm7016_vm3, %v6720_v1, %v806_v45 }
  0x56   : > { %5438 = vmatpush1.bf16.msra.mxu0 %v6131_v60  ;;  %v1280_v60 = vpack.c.bf16 %v6681_v31, %v1278_v57  ;;  %1146 = vst [vmem:[#allocation7 + $0xd0] sm:$0xf] %v1144_v56  ;;  %v488_v29 = vsel %vm6888_vm1, %v6720_v1, %v482_v17  ;;  %v1052_v56 = vunpack.c.l.bf16 %v5816_v46  ;;  %v650_v57 = vsel %vm6903_vm2, %v6720_v1, %v644_v49 }
  0x57   : > { %5439 = vmatprep.subr.bf16.mxu0 %v6140_v63  ;;  %5483 = vmatpush1.bf16.msra.mxu1 %v6149_v18  ;;  %v1952_v63 = vunpack.c.l.bf16 %v5870_v50  ;;  %v5776_v18 = vld [vmem:[%s6752_s8 + $0x18] sm:%s6969_s28]  ;;  %v490_v36 = vpack.c.bf16 %v6681_v31, %v488_v29  ;;  %v780_v50 = vunpack.c.l.bf16 %v5800_v35  ;;  %v652_v61 = vpack.c.bf16 %v6681_v31, %v650_v57  ;;  %1036 = vst [vmem:[#allocation7 + $0xb4] sm:$0xf] %v1034_v10 }
  0x58   : > { %1282 = vst [vmem:[#allocation7 + $0xf0] sm:$0xf] %v1280_v60  ;;  %v372_v22 = vunpack.c.l.bf16 %v5776_v18  ;;  %v1298_v60 = vunpack.c.l.bf16 %v5831_v52  ;;  %v1168_v17 = vsel %vm6888_vm1, %v6720_v1, %v1162_v59  ;;  %v398_v29 = vunpack.c.l.bf16 %v5777_v19  ;;  %v4640_v44 = vld [vmem:[#allocation7 + $0x70] sm:$0xff]  ;;  %v5825_v52 = vld [vmem:[%s6752_s8 + $0x13c] sm:%s7081_s14] }
  0x59   : > { %v1958_v15 = vsel %vm6856_vm0, %v6720_v1, %v1952_v63  ;;  %492 = vst [vmem:[#allocation7 + $0x34] sm:$0xf] %v490_v36  ;;  %v786_v58 = vsel %vm6903_vm2, %v6720_v1, %v780_v50  ;;  %v896_v63 = vsel %vm6888_vm1, %v6720_v1, %v890_v53  ;;  %654 = vst [vmem:[#allocation7 + $0x58] sm:$0xf] %v652_v61  ;;  %v1570_v35 = vunpack.c.l.bf16 %v7079_v14  ;;  %v5833_v53 = vld [vmem:[%s6752_s8 + $0x16c] sm:%s7081_s14] }
  0x5a   : > { %5440 = vmatpush1.bf16.msra.mxu0 %v6139_v12  ;;  %5485 = vmatmul.mubr.bf16.vlgmr.msra.gmra.mrb[0].mxu1 %v6738_v2  ;;  %v1552_v12 = vpack.c.bf16 %v6681_v31, %v1550_v4  ;;  %v1960_v21 = vpack.c.bf16 %v6681_v31, %v1958_v15  ;;  %v378_v37 = vsel %vm6903_vm2, %v6720_v1, %v372_v22  ;;  %v5824_v4 = vld [vmem:[%s6752_s8 + $0x138] sm:%s6969_s28]  ;;  %v942_v46 = vunpack.c.l.bf16 %v5809_v40 }
  0x5b   : > { %5441 = vmatprep.subr.bf16.mxu0 %v6148_v13  ;;  %5566 = vmatprep.mubr.bf16.mxu1 %v6743_v3  ;;  %v1688_v13 = vpack.c.bf16 %v6681_v31, %v1686_v5  ;;  %v380_v42 = vpack.c.bf16 %v6681_v31, %v378_v37  ;;  %v788_v62 = vpack.c.bf16 %v6681_v31, %v786_v58  ;;  %v7063_v5 = vld [vmem:[%s6752_s8 + $0x168] sm:%s6969_s28]  ;;  %v1188_v23 = vunpack.c.l.bf16 %v5824_v4 }
  0x5c   : > { %1554 = vst [vmem:[#allocation7 + $0x130] sm:$0xf] %v1552_v12  ;;  %1962 = vst [vmem:[#allocation7 + $0x190] sm:$0xf] %v1960_v21  ;;  %v1058_v12 = vsel %vm6903_vm2, %v6720_v1, %v1052_v56  ;;  %v924_v15 = vpack.c.bf16 %v6681_v31, %v922_v11  ;;  %v1304_v18 = vsel %vm6888_vm1, %v6720_v1, %v1298_v60  ;;  %v670_v37 = vunpack.c.l.bf16 %v5793_v32  ;;  %v5848_v11 = vld [vmem:[%s6752_s8 + $0x1c8] sm:%s6969_s28] }
  0x5d   : > { %1690 = vst [vmem:[#allocation7 + $0x150] sm:$0xf] %v1688_v13  ;;  %382 = vst [vmem:[#allocation7 + $0x18] sm:$0xf] %v380_v42  ;;  %v7075_v13 = vld [vmem:[%s6752_s8 + $0x194] sm:%s6952_s22]  ;;  %v1060_v16 = vpack.c.bf16 %v6681_v31, %v1058_v12  ;;  %v1170_v21 = vpack.c.bf16 %v6681_v31, %v1168_v17  ;;  %v1306_v22 = vpack.c.bf16 %v6681_v31, %v1304_v18  ;;  %v1350_v10 = vunpack.c.l.bf16 %v5833_v53  ;;  %v5841_v17 = vld [vmem:[%s6752_s8 + $0x19c] sm:%s7081_s14] }
  0x5e   : > { %5442 = vmatpush1.bf16.msra.mxu0 %v6147_v24  ;;  %v5791_v24 = vld [vmem:[%s6752_s8 + $0x74] sm:%s6952_s22]  ;;  %790 = vst [vmem:[#allocation7 + $0x78] sm:$0xf] %v788_v62  ;;  %926 = vst [vmem:[#allocation7 + $0x98] sm:$0xf] %v924_v15  ;;  %v1434_v33 = vunpack.c.l.bf16 %v7075_v13  ;;  %v1194_v41 = vsel %vm6903_vm2, %v6720_v1, %v1188_v23  ;;  %v404_v42 = vsel %vm7016_vm3, %v6720_v1, %v398_v29  ;;  %v5863_v18 = vld [vmem:[%s6752_s8 + $0x224] sm:%s6952_s22]  ;;  %v1486_v40 = vunpack.c.l.bf16 %v5841_v17 }
  0x5f   : > { %v618_v30 = vunpack.c.l.bf16 %v5791_v24  ;;  %v1324_v24 = vunpack.c.l.bf16 %v7063_v5  ;;  %1062 = vst [vmem:[#allocation7 + $0xb8] sm:$0xf] %v1060_v16  ;;  %1172 = vst [vmem:[#allocation7 + $0xd4] sm:$0xf] %v1170_v21  ;;  %v406_v48 = vpack.c.bf16 %v6681_v31, %v404_v42  ;;  %v676_v54 = vsel %vm7016_vm3, %v6720_v1, %v670_v37  ;;  %v5840_v62 = vld [vmem:[%s6752_s8 + $0x198] sm:%s6969_s28]  ;;  %v4648_v0 = vld [vmem:[#allocation7 + $0xb0] sm:$0xff] }
  0x60   : > { %1308 = vst [vmem:[#allocation7 + $0xf4] sm:$0xf] %v1306_v22  ;;  %v948_v56 = vsel %vm7016_vm3, %v6720_v1, %v942_v46  ;;  %v678_v58 = vpack.c.bf16 %v6681_v31, %v676_v54  ;;  %v814_v59 = vpack.c.bf16 %v6681_v31, %v812_v55  ;;  %v1196_v61 = vpack.c.bf16 %v6681_v31, %v1194_v41  ;;  %v5855_v12 = vld [vmem:[%s6752_s8 + $0x1f4] sm:%s6952_s22]  ;;  %v5864_v53 = vld [vmem:[%s6752_s8 + $0x228] sm:%s6969_s28] }
  0x61   : > { %5444 = vmatmul.mubr.bf16.vlgmr.msra.gmra.mrb[0].mxu0 %v6738_v2  ;;  %v6995_v2 = vsel %vm6856_vm0, %v6720_v1, %v2088_v6  ;;  %v624_v9 = vsel %vm6888_vm1, %v6720_v1, %v618_v30  ;;  %v898_v6 = vpack.c.bf16 %v6681_v31, %v896_v63  ;;  %v534_v30 = vunpack.c.l.bf16 %v5785_v20  ;;  %408 = vst [vmem:[#allocation7 + $0x1c] sm:$0xf] %v406_v48 }
  0x62   : > { %5525 = vmatprep.mubr.bf16.mxu0 %v6743_v3  ;;  %v354_v3 = vpack.c.bf16 %v6681_v31, %v352_v28  ;;  %v626_v47 = vpack.c.bf16 %v6681_v31, %v624_v9  ;;  %v4632_v28 = vld [vmem:[#allocation7 + $0x30] sm:$0xff]  ;;  %v950_v60 = vpack.c.bf16 %v6681_v31, %v948_v56  ;;  %v1214_v5 = vunpack.c.l.bf16 %v5825_v52  ;;  %680 = vst [vmem:[#allocation7 + $0x5c] sm:$0xf] %v678_v58 }
  0x63   : > { %900 = vst [vmem:[#allocation7 + $0x94] sm:$0xf] %v898_v6  ;;  %v540_v43 = vsel %vm7016_vm3, %v6720_v1, %v534_v30  ;;  %v1330_v6 = vsel %vm6903_vm2, %v6720_v1, %v1324_v24  ;;  %816 = vst [vmem:[#allocation7 + $0x7c] sm:$0xf] %v814_v59  ;;  %v1356_v22 = vsel %vm7016_vm3, %v6720_v1, %v1350_v10  ;;  %v1460_v39 = vunpack.c.l.bf16 %v5840_v62 }
  0x64   : > { %356 = vst [vmem:[#allocation7 + $0x14] sm:$0xf] %v354_v3  ;;  %628 = vst [vmem:[#allocation7 + $0x54] sm:$0xf] %v626_v47  ;;  %v5817_v47 = vld [vmem:[%s6752_s8 + $0x10c] sm:%s7081_s14]  ;;  %v542_v49 = vpack.c.bf16 %v6681_v31, %v540_v43  ;;  %v1332_v16 = vpack.c.bf16 %v6681_v31, %v1330_v6  ;;  %v1220_v21 = vsel %vm7016_vm3, %v6720_v1, %v1214_v5  ;;  %v1706_v42 = vunpack.c.l.bf16 %v5855_v12  ;;  %v5871_v5 = vld [vmem:[%s6752_s8 + $0x254] sm:%s6952_s22] }
  0x65   : > { %v1078_v57 = vunpack.c.l.bf16 %v5817_v47  ;;  %952 = vst [vmem:[#allocation7 + $0x9c] sm:$0xf] %v950_v60  ;;  %1198 = vst [vmem:[#allocation7 + $0xd8] sm:$0xf] %v1196_v61  ;;  %v1440_v23 = vsel %vm6888_vm1, %v6720_v1, %v1434_v33  ;;  %v1576_v24 = vsel %vm6888_vm1, %v6720_v1, %v1570_v35  ;;  %v1222_v30 = vpack.c.bf16 %v6681_v31, %v1220_v21 }
  0x66   : > { %544 = vst [vmem:[#allocation7 + $0x3c] sm:$0xf] %v542_v49  ;;  %v4652_v19 = vld [vmem:[#allocation7 + $0xd0] sm:$0xff]  ;;  %1334 = vst [vmem:[#allocation7 + $0xf8] sm:$0xf] %v1332_v16  ;;  %v1358_v32 = vpack.c.bf16 %v6681_v31, %v1356_v22  ;;  %v1442_v37 = vpack.c.bf16 %v6681_v31, %v1440_v23  ;;  %v1578_v33 = vpack.c.bf16 %v6681_v31, %v1576_v24  ;;  %v1596_v35 = vunpack.c.l.bf16 %v5848_v11 }
  0x67   : > { %v1084_v4 = vsel %vm7016_vm3, %v6720_v1, %v1078_v57  ;;  %v4656_v20 = vld [vmem:[#allocation7 + $0xf0] sm:$0xff]  ;;  %1224 = vst [vmem:[#allocation7 + $0xdc] sm:$0xf] %v1222_v30  ;;  %v1842_v43 = vunpack.c.l.bf16 %v5863_v18  ;;  %v1466_v45 = vsel %vm6903_vm2, %v6720_v1, %v1460_v39  ;;  %v1492_v46 = vsel %vm7016_vm3, %v6720_v1, %v1486_v40 }
  0x68   : > { %v1086_v15 = vpack.c.bf16 %v6681_v31, %v1084_v4  ;;  %v6056_v29 = vcombine.high %v4652_v19, %v4656_v20  ;;  %1360 = vst [vmem:[#allocation7 + $0xfc] sm:$0xf] %v1358_v32  ;;  %1444 = vst [vmem:[#allocation7 + $0x114] sm:$0xf] %v1442_v37  ;;  %v1494_v52 = vpack.c.bf16 %v6681_v31, %v1492_v46  ;;  %v5865_v4 = vld [vmem:[%s6752_s8 + $0x22c] sm:%s7081_s14] }
  0x69   : > { %1580 = vst [vmem:[#allocation7 + $0x134] sm:$0xf] %v1578_v33  ;;  %v4637_v54 = vld [vmem:[#allocation7 + $0x58] sm:$0xff]  ;;  %v1602_v57 = vsel %vm6903_vm2, %v6720_v1, %v1596_v35  ;;  %v1712_v59 = vsel %vm6888_vm1, %v6720_v1, %v1706_v42  ;;  %v1848_v60 = vsel %vm6888_vm1, %v6720_v1, %v1842_v43  ;;  %v2096_v33 = vpack.c.bf16 %v6681_v31, %v6995_v2  ;;  %v5881_v39 = vld [vmem:[%s6752_s8 + $0x28c] sm:%s7081_s14] }
  0x6a   : > { %v4644_v63 = vld [vmem:[#allocation7 + $0x90] sm:$0xff]  ;;  %1088 = vst [vmem:[#allocation7 + $0xbc] sm:$0xf] %v1086_v15  ;;  %v4641_v55 = vld [vmem:[#allocation7 + $0x78] sm:$0xff]  ;;  %1496 = vst [vmem:[#allocation7 + $0x11c] sm:$0xf] %v1494_v52  ;;  %v1714_v10 = vpack.c.bf16 %v6681_v31, %v1712_v59  ;;  %v1850_v11 = vpack.c.bf16 %v6681_v31, %v1848_v60 }
  0x6b   : > { %v4628_v25 = vld [vmem:[#allocation7 + $0x10] sm:$0xff]  ;;  %v6047_v13 = vcombine.low %v4644_v63, %v4648_v0  ;;  %v6048_v14 = vcombine.high %v4644_v63, %v4648_v0  ;;  %v6041_v61 = vcombine.low %v4637_v54, %v4641_v55  ;;  %v6042_v62 = vcombine.high %v4637_v54, %v4641_v55  ;;  %2098 = vst [vmem:[#allocation7 + $0x1b0] sm:$0xf] %v2096_v33  ;;  %v5888_v55 = vld [vmem:[%s6752_s8 + $0x2b8] sm:%s6969_s28] }
  0x6c   : > { %v6031_v3 = vcombine.low %v4628_v25, %v4632_v28  ;;  %v6032_v36 = vcombine.high %v4628_v25, %v4632_v28  ;;  %v4636_v9 = vld [vmem:[#allocation7 + $0x50] sm:$0xff]  ;;  %v6055_v28 = vcombine.low %v4652_v19, %v4656_v20  ;;  %v7186_v56 = vld [vmem:[#allocation7 + $0x98] sm:$0xff]  ;;  %v1604_v63 = vpack.c.bf16 %v6681_v31, %v1602_v57  ;;  %1716 = vst [vmem:[#allocation7 + $0x154] sm:$0xf] %v1714_v10 }
  0x6d   : > { %v6039_v50 = vcombine.low %v4636_v9, %v4640_v44  ;;  %v6040_v51 = vcombine.high %v4636_v9, %v4640_v44  ;;  %v5849_v25 = vld [vmem:[%s6752_s8 + $0x1cc] sm:%s7081_s14]  ;;  %v4629_v9 = vld [vmem:[#allocation7 + $0x18] sm:$0xff]  ;;  %1852 = vst [vmem:[#allocation7 + $0x174] sm:$0xf] %v1850_v11 }
  0x6e   : > { %5493 = vmatprep.subr.bf16.mxu0 %v6032_v36  ;;  %v5857_v36 = vld [vmem:[%s6752_s8 + $0x1fc] sm:%s7081_s14]  ;;  %v1622_v41 = vunpack.c.l.bf16 %v5849_v25  ;;  %1606 = vst [vmem:[#allocation7 + $0x138] sm:$0xf] %v1604_v63  ;;  %v1894_v25 = vunpack.c.l.bf16 %v5865_v4  ;;  %v5887_v43 = vld [vmem:[%s6752_s8 + $0x2b4] sm:%s6952_s22] }
  0x6f   : > { %5494 = vmatpush1.bf16.msra.mxu0 %v6031_v3  ;;  %v5856_v3 = vld [vmem:[%s6752_s8 + $0x1f8] sm:%s6969_s28]  ;;  %v1758_v48 = vunpack.c.l.bf16 %v5857_v36  ;;  %v2250_v54 = vunpack.c.l.bf16 %v5887_v43  ;;  %v5897_v11 = vld [vmem:[%s6752_s8 + $0x2ec] sm:%s7081_s14] }
  0x70   : > { %5495 = vmatprep.subr.bf16.mxu0 %v6040_v51  ;;  %v4633_v44 = vld [vmem:[#allocation7 + $0x38] sm:$0xff]  ;;  %v1732_v47 = vunpack.c.l.bf16 %v5856_v3  ;;  %v1468_v51 = vpack.c.bf16 %v6681_v31, %v1466_v45  ;;  %v1628_v58 = vsel %vm7016_vm3, %v6720_v1, %v1622_v41  ;;  %v4660_v3 = vld [vmem:[#allocation7 + $0x110] sm:$0xff]  ;;  %v1900_v41 = vsel %vm7016_vm3, %v6720_v1, %v1894_v25 }
  0x71   : > { %v6033_v49 = vcombine.low %v4629_v9, %v4633_v44  ;;  %v1630_v0 = vpack.c.bf16 %v6681_v31, %v1628_v58  ;;  %v7206_v6 = vld [vmem:[#allocation7 + $0xb8] sm:$0xff]  ;;  %v1764_v18 = vsel %vm7016_vm3, %v6720_v1, %v1758_v48  ;;  %v4664_v36 = vld [vmem:[#allocation7 + $0x130] sm:$0xff]  ;;  %v1902_v2 = vpack.c.bf16 %v6681_v31, %v1900_v41  ;;  %v5911_v41 = vld [vmem:[%s6752_s8 + $0x344] sm:%s6952_s22] }
  0x72   : > { %1470 = vst [vmem:[#allocation7 + $0x118] sm:$0xf] %v1468_v51  ;;  %v1738_v12 = vsel %vm6903_vm2, %v6720_v1, %v1732_v47  ;;  %v6049_v15 = vcombine.low %v7186_v56, %v7206_v6  ;;  %v6050_v16 = vcombine.high %v7186_v56, %v7206_v6  ;;  %v5872_v19 = vld [vmem:[%s6752_s8 + $0x258] sm:%s6969_s28]  ;;  %v1766_v23 = vpack.c.bf16 %v6681_v31, %v1764_v18  ;;  %v5894_v51 = vld [vmem:[%s6752_s8 + $0x2e0] sm:%s6844_s26] }
  0x73   : > { %5496 = vmatpush1.bf16.msra.mxu0 %v6039_v50  ;;  %v6034_v50 = vcombine.high %v4629_v9, %v4633_v44  ;;  %1632 = vst [vmem:[#allocation7 + $0x13c] sm:$0xf] %v1630_v0  ;;  %v1740_v17 = vpack.c.bf16 %v6681_v31, %v1738_v12  ;;  %v5873_v20 = vld [vmem:[%s6752_s8 + $0x25c] sm:%s7081_s14]  ;;  %v6063_v40 = vcombine.low %v4660_v3, %v4664_v36  ;;  %v2004_v45 = vunpack.c.l.bf16 %v5872_v19  ;;  %v4668_v4 = vld [vmem:[#allocation7 + $0x150] sm:$0xff] }
  0x74   : > { %5497 = vmatprep.subr.bf16.mxu0 %v6048_v14  ;;  %v5879_v14 = vld [vmem:[%s6752_s8 + $0x284] sm:%s6952_s22]  ;;  %v7227_v21 = vld [vmem:[#allocation7 + $0xd8] sm:$0xff]  ;;  %v6064_v35 = vcombine.high %v4660_v3, %v4664_v36  ;;  %1768 = vst [vmem:[#allocation7 + $0x15c] sm:$0xf] %v1766_v23  ;;  %v2030_v47 = vunpack.c.l.bf16 %v5873_v20  ;;  %1904 = vst [vmem:[#allocation7 + $0x17c] sm:$0xf] %v1902_v2  ;;  %v2360_v20 = vunpack.c.l.bf16 %v5894_v51  ;;  %v2276_v25 = vunpack.c.l.bf16 %v5888_v55 }
  0x75   : > { %5534 = vmatprep.subr.bf16.mxu1 %v6034_v50  ;;  %v7229_v22 = vld [vmem:[#allocation7 + $0xf8] sm:$0xff]  ;;  %1742 = vst [vmem:[#allocation7 + $0x158] sm:$0xf] %v1740_v17  ;;  %v2114_v44 = vunpack.c.l.bf16 %v5879_v14  ;;  %v2230_v50 = vsel %vm6856_vm0, %v6720_v1, %v2224_v27  ;;  %v2010_v7 = vsel %vm6903_vm2, %v6720_v1, %v2004_v45  ;;  %v5895_v27 = vld [vmem:[%s6752_s8 + $0x2e4] sm:%s6952_s22] }
  0x76   : > { %5535 = vmatpush1.bf16.msra.mxu1 %v6033_v49  ;;  %v6057_v30 = vcombine.low %v7227_v21, %v7229_v22  ;;  %v6058_v32 = vcombine.high %v7227_v21, %v7229_v22  ;;  %v2166_v49 = vunpack.c.l.bf16 %v5881_v39  ;;  %v2012_v58 = vpack.c.bf16 %v6681_v31, %v2010_v7  ;;  %v5903_v17 = vld [vmem:[%s6752_s8 + $0x314] sm:%s6952_s22]  ;;  %v5912_v51 = vld [vmem:[%s6752_s8 + $0x348] sm:%s6969_s28] }
  0x77   : > { %5498 = vmatpush1.bf16.msra.mxu0 %v6047_v13  ;;  %v1868_v13 = vunpack.c.l.bf16 %v5864_v53  ;;  %5536 = vmatprep.subr.bf16.mxu1 %v6042_v62  ;;  %v2120_v52 = vsel %vm6888_vm1, %v6720_v1, %v2114_v44  ;;  %v2232_v53 = vpack.c.bf16 %v6681_v31, %v2230_v50  ;;  %v2036_v59 = vsel %vm7016_vm3, %v6720_v1, %v2030_v47  ;;  %v5896_v62 = vld [vmem:[%s6752_s8 + $0x2e8] sm:%s6969_s28]  ;;  %v5904_v45 = vld [vmem:[%s6752_s8 + $0x318] sm:%s6969_s28] }
  0x78   : > { %5499 = vmatprep.subr.bf16.mxu0 %v6056_v29  ;;  %v5880_v29 = vld [vmem:[%s6752_s8 + $0x288] sm:%s6969_s28]  ;;  %v2122_v57 = vpack.c.bf16 %v6681_v31, %v2120_v52  ;;  %v2038_v6 = vpack.c.bf16 %v6681_v31, %v2036_v59  ;;  %2014 = vst [vmem:[#allocation7 + $0x198] sm:$0xf] %v2012_v58  ;;  %v2172_v14 = vsel %vm7016_vm3, %v6720_v1, %v2166_v49  ;;  %v2386_v23 = vunpack.c.l.bf16 %v5895_v27 }
  0x79   : > { %v1874_v24 = vsel %vm6903_vm2, %v6720_v1, %v1868_v13  ;;  %v7256_v46 = vld [vmem:[#allocation7 + $0x118] sm:$0xff]  ;;  %v2140_v48 = vunpack.c.l.bf16 %v5880_v29  ;;  %2234 = vst [vmem:[#allocation7 + $0x1d0] sm:$0xf] %v2232_v53  ;;  %v2174_v18 = vpack.c.bf16 %v6681_v31, %v2172_v14  ;;  %v2412_v29 = vunpack.c.l.bf16 %v5896_v62  ;;  %v5913_v52 = vld [vmem:[%s6752_s8 + $0x34c] sm:%s7081_s14] }
  0x7a   : > { %v1876_v37 = vpack.c.bf16 %v6681_v31, %v1874_v24  ;;  %5537 = vmatpush1.bf16.msra.mxu1 %v6041_v61  ;;  %v4665_v56 = vld [vmem:[#allocation7 + $0x138] sm:$0xff]  ;;  %2124 = vst [vmem:[#allocation7 + $0x1b4] sm:$0xf] %v2122_v57  ;;  %2040 = vst [vmem:[#allocation7 + $0x19c] sm:$0xf] %v2038_v6  ;;  %v2366_v3 = vsel %vm6856_vm0, %v6720_v1, %v2360_v20  ;;  %v2392_v21 = vsel %vm6888_vm1, %v6720_v1, %v2386_v23  ;;  %v5927_v20 = vld [vmem:[%s6752_s8 + $0x3a4] sm:%s6952_s22] }
  0x7b   : > { %5500 = vmatpush1.bf16.msra.mxu0 %v6055_v28  ;;  %v1978_v28 = vunpack.c.l.bf16 %v5871_v5  ;;  %5538 = vmatprep.subr.bf16.mxu1 %v6050_v16  ;;  %v2146_v60 = vsel %vm6903_vm2, %v6720_v1, %v2140_v48  ;;  %v5889_v61 = vld [vmem:[%s6752_s8 + $0x2bc] sm:%s7081_s14]  ;;  %v6065_v63 = vcombine.low %v7256_v46, %v4665_v56  ;;  %v6066_v0 = vcombine.high %v7256_v46, %v4665_v56  ;;  %v4672_v5 = vld [vmem:[#allocation7 + $0x170] sm:$0xff] }
  0x7c   : > { %1878 = vst [vmem:[#allocation7 + $0x178] sm:$0xf] %v1876_v37  ;;  %5501 = vmatprep.subr.bf16.mxu0 %v6064_v35  ;;  %v2148_v10 = vpack.c.bf16 %v6681_v31, %v2146_v60  ;;  %v6071_v12 = vcombine.low %v4668_v4, %v4672_v5  ;;  %v6072_v13 = vcombine.high %v4668_v4, %v4672_v5  ;;  %v5902_v16 = vld [vmem:[%s6752_s8 + $0x310] sm:%s6844_s26]  ;;  %v4669_v24 = vld [vmem:[#allocation7 + $0x158] sm:$0xff]  ;;  %2176 = vst [vmem:[#allocation7 + $0x1bc] sm:$0xf] %v2174_v18 }
  0x7d   : > { %v1984_v42 = vsel %vm6888_vm1, %v6720_v1, %v1978_v28  ;;  %v2302_v28 = vunpack.c.l.bf16 %v5889_v61  ;;  %v2496_v22 = vunpack.c.l.bf16 %v5902_v16  ;;  %v2368_v37 = vpack.c.bf16 %v6681_v31, %v2366_v3  ;;  %v5910_v35 = vld [vmem:[%s6752_s8 + $0x340] sm:%s6844_s26]  ;;  %v5918_v56 = vld [vmem:[%s6752_s8 + $0x370] sm:%s6844_s26] }
  0x7e   : > { %v1986_v9 = vpack.c.bf16 %v6681_v31, %v1984_v42  ;;  %5539 = vmatpush1.bf16.msra.mxu1 %v6049_v15  ;;  %v2256_v15 = vsel %vm6888_vm1, %v6720_v1, %v2250_v54  ;;  %2150 = vst [vmem:[#allocation7 + $0x1b8] sm:$0xf] %v2148_v10  ;;  %v2394_v33 = vpack.c.bf16 %v6681_v31, %v2392_v21  ;;  %v5905_v46 = vld [vmem:[%s6752_s8 + $0x31c] sm:%s7081_s14]  ;;  %v5919_v57 = vld [vmem:[%s6752_s8 + $0x374] sm:%s6952_s22]  ;;  %v2632_v61 = vunpack.c.l.bf16 %v5910_v35 }
  0x7f   : > { %5502 = vmatpush1.bf16.msra.mxu0 %v6063_v40  ;;  %5540 = vmatprep.subr.bf16.mxu1 %v6058_v32  ;;  %v2258_v19 = vpack.c.bf16 %v6681_v31, %v2256_v15  ;;  %v2438_v32 = vunpack.c.l.bf16 %v5897_v11  ;;  %v2282_v39 = vsel %vm6903_vm2, %v6720_v1, %v2276_v25  ;;  %v2308_v40 = vsel %vm7016_vm3, %v6720_v1, %v2302_v28 }
  0x80   : > { %1988 = vst [vmem:[#allocation7 + $0x194] sm:$0xf] %v1986_v9  ;;  %5503 = vmatprep.subr.bf16.mxu0 %v6072_v13  ;;  %v2284_v9 = vpack.c.bf16 %v6681_v31, %v2282_v39  ;;  %v2310_v44 = vpack.c.bf16 %v6681_v31, %v2308_v40  ;;  %2370 = vst [vmem:[#allocation7 + $0x1f0] sm:$0xf] %v2368_v37  ;;  %v2418_v47 = vsel %vm6903_vm2, %v6720_v1, %v2412_v29  ;;  %v5920_v29 = vld [vmem:[%s6752_s8 + $0x378] sm:%s6969_s28]  ;;  %v5928_v37 = vld [vmem:[%s6752_s8 + $0x3a8] sm:%s6969_s28] }
  0x81   : > { %2260 = vst [vmem:[#allocation7 + $0x1d4] sm:$0xf] %v2258_v19  ;;  %2396 = vst [vmem:[#allocation7 + $0x1f4] sm:$0xf] %v2394_v33  ;;  %v2444_v48 = vsel %vm7016_vm3, %v6720_v1, %v2438_v32  ;;  %v2502_v49 = vsel %vm6856_vm0, %v6720_v1, %v2496_v22  ;;  %v4680_v7 = vld [vmem:[#allocation7 + $0x1b0] sm:$0xff]  ;;  %v2420_v53 = vpack.c.bf16 %v6681_v31, %v2418_v47  ;;  %v4677_v60 = vld [vmem:[#allocation7 + $0x198] sm:$0xff]  ;;  %v2658_v62 = vunpack.c.l.bf16 %v5911_v41 }
  0x82   : > { %5541 = vmatpush1.bf16.msra.mxu1 %v6057_v30  ;;  %v2522_v30 = vunpack.c.l.bf16 %v5903_v17  ;;  %2286 = vst [vmem:[#allocation7 + $0x1d8] sm:$0xf] %v2284_v9  ;;  %2312 = vst [vmem:[#allocation7 + $0x1dc] sm:$0xf] %v2310_v44  ;;  %v2446_v54 = vpack.c.bf16 %v6681_v31, %v2444_v48  ;;  %v2504_v27 = vpack.c.bf16 %v6681_v31, %v2502_v49  ;;  %v2684_v4 = vunpack.c.l.bf16 %v5912_v51  ;;  %v5926_v19 = vld [vmem:[%s6752_s8 + $0x3a0] sm:%s6844_s26]  ;;  %v5929_v33 = vld [vmem:[%s6752_s8 + $0x3ac] sm:%s7081_s14] }
  0x83   : > { %5542 = vmatprep.subr.bf16.mxu1 %v6066_v0  ;;  %5504 = vmatpush1.bf16.msra.mxu0 %v6071_v12  ;;  %v4673_v36 = vld [vmem:[#allocation7 + $0x178] sm:$0xff]  ;;  %2422 = vst [vmem:[#allocation7 + $0x1f8] sm:$0xf] %v2420_v53  ;;  %v2574_v0 = vunpack.c.l.bf16 %v5905_v46  ;;  %v2710_v5 = vunpack.c.l.bf16 %v5913_v52  ;;  %v2638_v10 = vsel %vm6856_vm0, %v6720_v1, %v2632_v61  ;;  %v2664_v11 = vsel %vm6888_vm1, %v6720_v1, %v2658_v62  ;;  %v5934_v53 = vld [vmem:[%s6752_s8 + $0x3d0] sm:%s6844_s26] }
  0x84   : > { %v6073_v42 = vcombine.low %v4669_v24, %v4673_v36  ;;  %v6074_v43 = vcombine.high %v4669_v24, %v4673_v36  ;;  %v2528_v50 = vsel %vm6888_vm1, %v6720_v1, %v2522_v30  ;;  %2448 = vst [vmem:[#allocation7 + $0x1fc] sm:$0xf] %v2446_v54  ;;  %2506 = vst [vmem:[#allocation7 + $0x210] sm:$0xf] %v2504_v27  ;;  %v2768_v12 = vunpack.c.l.bf16 %v5918_v56  ;;  %v5921_v32 = vld [vmem:[%s6752_s8 + $0x37c] sm:%s7081_s14]  ;;  %v5935_v54 = vld [vmem:[%s6752_s8 + $0x3d4] sm:%s6952_s22] }
  0x85   : > { %v2530_v55 = vpack.c.bf16 %v6681_v31, %v2528_v50  ;;  %v4681_v6 = vld [vmem:[#allocation7 + $0x1b8] sm:$0xff]  ;;  %v2794_v13 = vunpack.c.l.bf16 %v5919_v57  ;;  %v2640_v17 = vpack.c.bf16 %v6681_v31, %v2638_v10  ;;  %v2666_v18 = vpack.c.bf16 %v6681_v31, %v2664_v11 }
  0x86   : > { %5543 = vmatpush1.bf16.msra.mxu1 %v6065_v63  ;;  %v2548_v63 = vunpack.c.l.bf16 %v5904_v45  ;;  %v6081_v14 = vcombine.low %v4677_v60, %v4681_v6  ;;  %v6082_v15 = vcombine.high %v4677_v60, %v4681_v6  ;;  %v2580_v24 = vsel %vm7016_vm3, %v6720_v1, %v2574_v0  ;;  %v5943_v60 = vld [vmem:[%s6752_s8 + $0x404] sm:%s6952_s22] }
  0x87   : > { %v4676_v2 = vld [vmem:[#allocation7 + $0x190] sm:$0xff]  ;;  %5544 = vmatprep.subr.bf16.mxu1 %v6074_v43  ;;  %2532 = vst [vmem:[#allocation7 + $0x214] sm:$0xf] %v2530_v55  ;;  %v2690_v25 = vsel %vm6903_vm2, %v6720_v1, %v2684_v4  ;;  %v2716_v28 = vsel %vm7016_vm3, %v6720_v1, %v2710_v5  ;;  %2642 = vst [vmem:[#allocation7 + $0x230] sm:$0xf] %v2640_v17  ;;  %v2582_v22 = vpack.c.bf16 %v6681_v31, %v2580_v24  ;;  %v5936_v4 = vld [vmem:[%s6752_s8 + $0x3d8] sm:%s6969_s28] }
  0x88   : > { %v6079_v58 = vcombine.low %v4676_v2, %v4680_v7  ;;  %v6080_v59 = vcombine.high %v4676_v2, %v4680_v7  ;;  %v4684_v16 = vld [vmem:[#allocation7 + $0x1d0] sm:$0xff]  ;;  %v2554_v23 = vsel %vm6903_vm2, %v6720_v1, %v2548_v63  ;;  %2668 = vst [vmem:[#allocation7 + $0x234] sm:$0xf] %v2666_v18  ;;  %v2692_v30 = vpack.c.bf16 %v6681_v31, %v2690_v25  ;;  %v5937_v5 = vld [vmem:[%s6752_s8 + $0x3dc] sm:%s7081_s14]  ;;  %v5944_v18 = vld [vmem:[%s6752_s8 + $0x408] sm:%s6969_s28] }
  0x89   : > { %v4688_v3 = vld [vmem:[#allocation7 + $0x1f0] sm:$0xff]  ;;  %v2556_v21 = vpack.c.bf16 %v6681_v31, %v2554_v23  ;;  %v2718_v36 = vpack.c.bf16 %v6681_v31, %v2716_v28  ;;  %v4685_v35 = vld [vmem:[#allocation7 + $0x1d8] sm:$0xff]  ;;  %v2774_v41 = vsel %vm6856_vm0, %v6720_v1, %v2768_v12  ;;  %2584 = vst [vmem:[#allocation7 + $0x21c] sm:$0xf] %v2582_v22  ;;  %v2904_v9 = vunpack.c.l.bf16 %v5926_v19  ;;  %v4754_v23 = vld [vmem:[%s7758_s1] sm:$0xf] }
  0x8a   : > { %5545 = vmatpush1.bf16.msra.mxu1 %v6073_v42  ;;  %5505 = vmatprep.subr.bf16.mxu0 %v6080_v59  ;;  %v6087_v39 = vcombine.low %v4684_v16, %v4688_v3  ;;  %v6088_v40 = vcombine.high %v4684_v16, %v4688_v3  ;;  %v2800_v42 = vsel %vm6888_vm1, %v6720_v1, %v2794_v13  ;;  %v2930_v44 = vunpack.c.l.bf16 %v5927_v20  ;;  %v5942_v59 = vld [vmem:[%s6752_s8 + $0x400] sm:%s6844_s26]  ;;  %v5945_v19 = vld [vmem:[%s6752_s8 + $0x40c] sm:%s7081_s14] }
  0x8b   : > { %5506 = vmatpush1.bf16.msra.mxu0 %v6079_v58  ;;  %5546 = vmatprep.subr.bf16.mxu1 %v6082_v15  ;;  %2558 = vst [vmem:[#allocation7 + $0x218] sm:$0xf] %v2556_v21  ;;  %2694 = vst [vmem:[#allocation7 + $0x238] sm:$0xf] %v2692_v30  ;;  %v2776_v43 = vpack.c.bf16 %v6681_v31, %v2774_v41  ;;  %v2802_v2 = vpack.c.bf16 %v6681_v31, %v2800_v42  ;;  %v4689_v45 = vld [vmem:[#allocation7 + $0x1f8] sm:$0xff]  ;;  %v2820_v46 = vunpack.c.l.bf16 %v5920_v29  ;;  %v5950_v20 = vld [vmem:[%s6752_s8 + $0x430] sm:%s6844_s26] }
  0x8c   : > { %2720 = vst [vmem:[#allocation7 + $0x23c] sm:$0xf] %v2718_v36  ;;  %5507 = vmatprep.subr.bf16.mxu0 %v6088_v40  ;;  %v2846_v47 = vunpack.c.l.bf16 %v5921_v32  ;;  %v2956_v48 = vunpack.c.l.bf16 %v5928_v37  ;;  %v2982_v49 = vunpack.c.l.bf16 %v5929_v33  ;;  %v6089_v50 = vcombine.low %v4685_v35, %v4689_v45  ;;  %v5951_v21 = vld [vmem:[%s6752_s8 + $0x434] sm:%s6952_s22]  ;;  %4757 = vperm.xlu0 %6545, %v4754_v23   ;;  %v5958_v33 = vld [vmem:[%s6752_s8 + $0x460] sm:%s6844_s26] }
  0x8d   : > { %v6090_v51 = vcombine.high %v4685_v35, %v4689_v45  ;;  %2778 = vst [vmem:[#allocation7 + $0x250] sm:$0xf] %v2776_v43  ;;  %2804 = vst [vmem:[#allocation7 + $0x254] sm:$0xf] %v2802_v2  ;;  %v2910_v52 = vsel %vm6856_vm0, %v6720_v1, %v2904_v9  ;;  %v2936_v7 = vsel %vm6888_vm1, %v6720_v1, %v2930_v44  ;;  %v3040_v12 = vunpack.c.l.bf16 %v5934_v53  ;;  %v5952_v43 = vld [vmem:[%s6752_s8 + $0x438] sm:%s6969_s28] }
  0x8e   : > { %5547 = vmatpush1.bf16.msra.mxu1 %v6081_v14  ;;  %v4692_v27 = vld [vmem:[#allocation7 + $0x210] sm:$0xff]  ;;  %v2912_v55 = vpack.c.bf16 %v6681_v31, %v2910_v52  ;;  %v2938_v56 = vpack.c.bf16 %v6681_v31, %v2936_v7  ;;  %v2826_v57 = vsel %vm6903_vm2, %v6720_v1, %v2820_v46  ;;  %v2852_v58 = vsel %vm7016_vm3, %v6720_v1, %v2846_v47  ;;  %v5953_v2 = vld [vmem:[%s6752_s8 + $0x43c] sm:%s7081_s14] }
  0x8f   : > { %5508 = vmatpush1.bf16.msra.mxu0 %v6087_v39  ;;  %5548 = vmatprep.subr.bf16.mxu1 %v6090_v51  ;;  %v2828_v61 = vpack.c.bf16 %v6681_v31, %v2826_v57  ;;  %v2854_v62 = vpack.c.bf16 %v6681_v31, %v2852_v58  ;;  %v2962_v63 = vsel %vm6903_vm2, %v6720_v1, %v2956_v48  ;;  %v4696_v6 = vld [vmem:[#allocation7 + $0x230] sm:$0xff]  ;;  %v3066_v13 = vunpack.c.l.bf16 %v5935_v54  ;;  %v5959_v39 = vld [vmem:[%s6752_s8 + $0x464] sm:%s6952_s22]  ;;  %v5968_v23 = vld [vmem:[%s6752_s8 + $0x498] sm:%s6969_s28] }
  0x90   : > { %v2988_v0 = vsel %vm7016_vm3, %v6720_v1, %v2982_v49  ;;  %2914 = vst [vmem:[#allocation7 + $0x270] sm:$0xf] %v2912_v55  ;;  %2940 = vst [vmem:[#allocation7 + $0x274] sm:$0xf] %v2938_v56  ;;  %v2964_v10 = vpack.c.bf16 %v6681_v31, %v2962_v63  ;;  %v6095_v14 = vcombine.low %v4692_v27, %v4696_v6  ;;  %v3176_v16 = vunpack.c.l.bf16 %v5942_v59 }
  0x91   : > { %v2990_v11 = vpack.c.bf16 %v6681_v31, %v2988_v0  ;;  %v6096_v15 = vcombine.high %v4692_v27, %v4696_v6  ;;  %2830 = vst [vmem:[#allocation7 + $0x258] sm:$0xf] %v2828_v61  ;;  %2856 = vst [vmem:[#allocation7 + $0x25c] sm:$0xf] %v2854_v62  ;;  %v3202_v17 = vunpack.c.l.bf16 %v5943_v60  ;;  %v3046_v28 = vsel %vm6856_vm0, %v6720_v1, %v3040_v12  ;;  %v5960_v60 = vld [vmem:[%s6752_s8 + $0x468] sm:%s6969_s28]  ;;  %v5966_v6 = vld [vmem:[%s6752_s8 + $0x490] sm:%s6844_s26] }
  0x92   : > { %5549 = vmatpush1.bf16.msra.mxu1 %v6089_v50  ;;  %v4693_v24 = vld [vmem:[#allocation7 + $0x218] sm:$0xff]  ;;  %2966 = vst [vmem:[#allocation7 + $0x278] sm:$0xf] %v2964_v10  ;;  %v3072_v29 = vsel %vm6888_vm1, %v6720_v1, %v3066_v13  ;;  %v3092_v32 = vunpack.c.l.bf16 %v5936_v4  ;;  %v3118_v3 = vunpack.c.l.bf16 %v5937_v5  ;;  %v3048_v36 = vpack.c.bf16 %v6681_v31, %v3046_v28  ;;  %v5961_v61 = vld [vmem:[%s6752_s8 + $0x46c] sm:%s7081_s14] }
  0x93   : > { %v4697_v25 = vld [vmem:[#allocation7 + $0x238] sm:$0xff]  ;;  %2992 = vst [vmem:[#allocation7 + $0x27c] sm:$0xf] %v2990_v11  ;;  %5509 = vmatprep.subr.bf16.mxu0 %v6096_v15  ;;  %v3074_v37 = vpack.c.bf16 %v6681_v31, %v3072_v29  ;;  %v3182_v40 = vsel %vm6856_vm0, %v6720_v1, %v3176_v16  ;;  %v3208_v35 = vsel %vm6888_vm1, %v6720_v1, %v3202_v17  ;;  %v3228_v48 = vunpack.c.l.bf16 %v5944_v18  ;;  %v5974_v15 = vld [vmem:[%s6752_s8 + $0x4c0] sm:%s6844_s26] }
  0x94   : > { %v6097_v22 = vcombine.low %v4693_v24, %v4697_v25  ;;  %v6098_v30 = vcombine.high %v4693_v24, %v4697_v25  ;;  %5510 = vmatpush1.bf16.msra.mxu0 %v6095_v14  ;;  %v3098_v41 = vsel %vm6903_vm2, %v6720_v1, %v3092_v32  ;;  %v3124_v42 = vsel %vm7016_vm3, %v6720_v1, %v3118_v3  ;;  %v4700_v9 = vld [vmem:[#allocation7 + $0x250] sm:$0xff]  ;;  %v5975_v16 = vld [vmem:[%s6752_s8 + $0x4c4] sm:%s6952_s22]  ;;  %v5969_v24 = vld [vmem:[%s6752_s8 + $0x49c] sm:%s7081_s14] }
  0x95   : > { %3050 = vst [vmem:[#allocation7 + $0x290] sm:$0xf] %v3048_v36  ;;  %3076 = vst [vmem:[#allocation7 + $0x294] sm:$0xf] %v3074_v37  ;;  %v3184_v44 = vpack.c.bf16 %v6681_v31, %v3182_v40  ;;  %v3210_v45 = vpack.c.bf16 %v6681_v31, %v3208_v35  ;;  %v3100_v46 = vpack.c.bf16 %v6681_v31, %v3098_v41  ;;  %v3254_v49 = vunpack.c.l.bf16 %v5945_v19  ;;  %v5967_v10 = vld [vmem:[%s6752_s8 + $0x494] sm:%s6952_s22] }
  0x96   : > { %5550 = vmatprep.subr.bf16.mxu1 %v6098_v30  ;;  %v3126_v47 = vpack.c.bf16 %v6681_v31, %v3124_v42  ;;  %v3312_v50 = vunpack.c.l.bf16 %v5950_v20  ;;  %v3338_v51 = vunpack.c.l.bf16 %v5951_v21  ;;  %v3448_v7 = vunpack.c.l.bf16 %v5958_v33 }
  0x97   : > { %5551 = vmatpush1.bf16.msra.mxu1 %v6097_v22  ;;  %v4704_v52 = vld [vmem:[#allocation7 + $0x270] sm:$0xff]  ;;  %3186 = vst [vmem:[#allocation7 + $0x2b0] sm:$0xf] %v3184_v44  ;;  %3212 = vst [vmem:[#allocation7 + $0x2b4] sm:$0xf] %v3210_v45  ;;  %v3474_v53 = vunpack.c.l.bf16 %v5959_v39  ;;  %v3364_v54 = vunpack.c.l.bf16 %v5952_v43  ;;  %v3390_v27 = vunpack.c.l.bf16 %v5953_v2  ;;  %v3234_v58 = vsel %vm6903_vm2, %v6720_v1, %v3228_v48 }
  0x98   : > { %3102 = vst [vmem:[#allocation7 + $0x298] sm:$0xf] %v3100_v46  ;;  %3128 = vst [vmem:[#allocation7 + $0x29c] sm:$0xf] %v3126_v47  ;;  %v6103_v55 = vcombine.low %v4700_v9, %v4704_v52  ;;  %v6104_v56 = vcombine.high %v4700_v9, %v4704_v52  ;;  %v4701_v57 = vld [vmem:[#allocation7 + $0x258] sm:$0xff]  ;;  %v3260_v59 = vsel %vm7016_vm3, %v6720_v1, %v3254_v49  ;;  %v3500_v21 = vunpack.c.l.bf16 %v5960_v60  ;;  %v5976_v9 = vld [vmem:[%s6752_s8 + $0x4c8] sm:%s6969_s28] }
  0x99   : > { %v3236_v63 = vpack.c.bf16 %v6681_v31, %v3234_v58  ;;  %v3262_v0 = vpack.c.bf16 %v6681_v31, %v3260_v59  ;;  %v3318_v4 = vsel %vm6856_vm0, %v6720_v1, %v3312_v50  ;;  %v3344_v5 = vsel %vm6888_vm1, %v6720_v1, %v3338_v51  ;;  %v5977_v44 = vld [vmem:[%s6752_s8 + $0x4cc] sm:%s7081_s14]  ;;  %v5983_v51 = vld [vmem:[%s6752_s8 + $0x4f4] sm:%s6952_s22] }
  0x9a   : > { %v4705_v62 = vld [vmem:[#allocation7 + $0x278] sm:$0xff]  ;;  %5511 = vmatprep.subr.bf16.mxu0 %v6104_v56  ;;  %v3320_v13 = vpack.c.bf16 %v6681_v31, %v3318_v4  ;;  %v3346_v14 = vpack.c.bf16 %v6681_v31, %v3344_v5  ;;  %v3454_v17 = vsel %vm6856_vm0, %v6720_v1, %v3448_v7  ;;  %v3480_v18 = vsel %vm6888_vm1, %v6720_v1, %v3474_v53  ;;  %v5982_v50 = vld [vmem:[%s6752_s8 + $0x4f0] sm:%s6844_s26] }
  0x9b   : > { %v6105_v11 = vcombine.low %v4701_v57, %v4705_v62  ;;  %v6106_v12 = vcombine.high %v4701_v57, %v4705_v62  ;;  %5512 = vmatpush1.bf16.msra.mxu0 %v6103_v55  ;;  %3238 = vst [vmem:[#allocation7 + $0x2b8] sm:$0xf] %v3236_v63  ;;  %3264 = vst [vmem:[#allocation7 + $0x2bc] sm:$0xf] %v3262_v0  ;;  %v3370_v19 = vsel %vm6903_vm2, %v6720_v1, %v3364_v54  ;;  %v5991_v55 = vld [vmem:[%s6752_s8 + $0x524] sm:%s6952_s22]  ;;  %v5985_v62 = vld [vmem:[%s6752_s8 + $0x4fc] sm:%s7081_s14] }
  0x9c   : > { %v3396_v20 = vsel %vm7016_vm3, %v6720_v1, %v3390_v27  ;;  %v4708_v25 = vld [vmem:[#allocation7 + $0x290] sm:$0xff]  ;;  %3322 = vst [vmem:[#allocation7 + $0x2d0] sm:$0xf] %v3320_v13  ;;  %3348 = vst [vmem:[#allocation7 + $0x2d4] sm:$0xf] %v3346_v14  ;;  %v3456_v28 = vpack.c.bf16 %v6681_v31, %v3454_v17  ;;  %v3482_v29 = vpack.c.bf16 %v6681_v31, %v3480_v18  ;;  %v3526_v22 = vunpack.c.l.bf16 %v5961_v61  ;;  %v5990_v27 = vld [vmem:[%s6752_s8 + $0x520] sm:%s6844_s26] }
  0x9d   : > { %5552 = vmatprep.subr.bf16.mxu1 %v6106_v12  ;;  %v3372_v32 = vpack.c.bf16 %v6681_v31, %v3370_v19  ;;  %v3398_v3 = vpack.c.bf16 %v6681_v31, %v3396_v20  ;;  %v3584_v30 = vunpack.c.l.bf16 %v5966_v6  ;;  %v3610_v36 = vunpack.c.l.bf16 %v5967_v10  ;;  %v5984_v61 = vld [vmem:[%s6752_s8 + $0x4f8] sm:%s6969_s28] }
  0x9e   : > { %5553 = vmatpush1.bf16.msra.mxu1 %v6105_v11  ;;  %v4712_v37 = vld [vmem:[#allocation7 + $0x2b0] sm:$0xff]  ;;  %3458 = vst [vmem:[#allocation7 + $0x2f0] sm:$0xf] %v3456_v28  ;;  %3484 = vst [vmem:[#allocation7 + $0x2f4] sm:$0xf] %v3482_v29  ;;  %v3720_v33 = vunpack.c.l.bf16 %v5974_v15  ;;  %v3746_v39 = vunpack.c.l.bf16 %v5975_v16  ;;  %v3636_v40 = vunpack.c.l.bf16 %v5968_v23  ;;  %v3662_v35 = vunpack.c.l.bf16 %v5969_v24 }
  0x9f   : > { %3374 = vst [vmem:[#allocation7 + $0x2d8] sm:$0xf] %v3372_v32  ;;  %3400 = vst [vmem:[#allocation7 + $0x2dc] sm:$0xf] %v3398_v3  ;;  %v6111_v41 = vcombine.low %v4708_v25, %v4712_v37  ;;  %v6112_v42 = vcombine.high %v4708_v25, %v4712_v37  ;;  %v3506_v43 = vsel %vm6903_vm2, %v6720_v1, %v3500_v21  ;;  %v4709_v45 = vld [vmem:[#allocation7 + $0x298] sm:$0xff]  ;;  %v3772_v10 = vunpack.c.l.bf16 %v5976_v9  ;;  %v5992_v21 = vld [vmem:[%s6752_s8 + $0x528] sm:%s6969_s28] }
  0xa0   : > { %v3532_v2 = vsel %vm7016_vm3, %v6720_v1, %v3526_v22  ;;  %v3508_v46 = vpack.c.bf16 %v6681_v31, %v3506_v43  ;;  %v3590_v48 = vsel %vm6856_vm0, %v6720_v1, %v3584_v30  ;;  %v3616_v49 = vsel %vm6888_vm1, %v6720_v1, %v3610_v36  ;;  %v5993_v22 = vld [vmem:[%s6752_s8 + $0x52c] sm:%s7081_s14]  ;;  %v6006_v9 = vld [vmem:[%s6752_s8 + $0x580] sm:%s6844_s26] }
  0xa1   : > { %v3534_v47 = vpack.c.bf16 %v6681_v31, %v3532_v2  ;;  %5513 = vmatprep.subr.bf16.mxu0 %v6112_v42  ;;  %v3592_v52 = vpack.c.bf16 %v6681_v31, %v3590_v48  ;;  %v3618_v7 = vpack.c.bf16 %v6681_v31, %v3616_v49  ;;  %v3726_v53 = vsel %vm6856_vm0, %v6720_v1, %v3720_v33 }
  0xa2   : > { %v3752_v54 = vsel %vm6888_vm1, %v6720_v1, %v3746_v39  ;;  %v4713_v56 = vld [vmem:[#allocation7 + $0x2b8] sm:$0xff]  ;;  %5514 = vmatpush1.bf16.msra.mxu0 %v6111_v41  ;;  %3510 = vst [vmem:[#allocation7 + $0x2f8] sm:$0xf] %v3508_v46  ;;  %v3728_v57 = vpack.c.bf16 %v6681_v31, %v3726_v53  ;;  %v3642_v59 = vsel %vm6903_vm2, %v6720_v1, %v3636_v40  ;;  %v3798_v11 = vunpack.c.l.bf16 %v5977_v44  ;;  %v5998_v39 = vld [vmem:[%s6752_s8 + $0x550] sm:%s6844_s26]  ;;  %v6007_v44 = vld [vmem:[%s6752_s8 + $0x584] sm:%s6952_s22] }
  0xa3   : > { %3536 = vst [vmem:[#allocation7 + $0x2fc] sm:$0xf] %v3534_v47  ;;  %v3754_v58 = vpack.c.bf16 %v6681_v31, %v3752_v54  ;;  %v3668_v60 = vsel %vm7016_vm3, %v6720_v1, %v3662_v35  ;;  %v6113_v63 = vcombine.low %v4709_v45, %v4713_v56  ;;  %v6114_v0 = vcombine.high %v4709_v45, %v4713_v56  ;;  %v4716_v4 = vld [vmem:[#allocation7 + $0x2d0] sm:$0xff] }
  0xa4   : > { %3594 = vst [vmem:[#allocation7 + $0x310] sm:$0xf] %v3592_v52  ;;  %3620 = vst [vmem:[#allocation7 + $0x314] sm:$0xf] %v3618_v7  ;;  %v3644_v5 = vpack.c.bf16 %v6681_v31, %v3642_v59  ;;  %v3670_v6 = vpack.c.bf16 %v6681_v31, %v3668_v60  ;;  %v3856_v12 = vunpack.c.l.bf16 %v5982_v50  ;;  %v3882_v13 = vunpack.c.l.bf16 %v5983_v51  ;;  %v5999_v40 = vld [vmem:[%s6752_s8 + $0x554] sm:%s6952_s22] }
  0xa5   : > { %3730 = vst [vmem:[#allocation7 + $0x330] sm:$0xf] %v3728_v57  ;;  %3756 = vst [vmem:[#allocation7 + $0x334] sm:$0xf] %v3754_v58  ;;  %5554 = vmatprep.subr.bf16.mxu1 %v6114_v0  ;;  %v4720_v14 = vld [vmem:[#allocation7 + $0x2f0] sm:$0xff]  ;;  %v3992_v15 = vunpack.c.l.bf16 %v5990_v27  ;;  %v4018_v16 = vunpack.c.l.bf16 %v5991_v55  ;;  %v3908_v17 = vunpack.c.l.bf16 %v5984_v61  ;;  %v3934_v18 = vunpack.c.l.bf16 %v5985_v62  ;;  %v6000_v57 = vld [vmem:[%s6752_s8 + $0x558] sm:%s6969_s28] }
  0xa6   : > { %3646 = vst [vmem:[#allocation7 + $0x318] sm:$0xf] %v3644_v5  ;;  %3672 = vst [vmem:[#allocation7 + $0x31c] sm:$0xf] %v3670_v6  ;;  %5555 = vmatpush1.bf16.msra.mxu1 %v6113_v63  ;;  %v6119_v19 = vcombine.low %v4716_v4, %v4720_v14  ;;  %v6120_v20 = vcombine.high %v4716_v4, %v4720_v14  ;;  %v3778_v23 = vsel %vm6903_vm2, %v6720_v1, %v3772_v10  ;;  %v4717_v25 = vld [vmem:[#allocation7 + $0x2d8] sm:$0xff]  ;;  %v6008_v63 = vld [vmem:[%s6752_s8 + $0x588] sm:%s6969_s28] }
  0xa7   : > { %v3804_v24 = vsel %vm7016_vm3, %v6720_v1, %v3798_v11  ;;  %v3780_v28 = vpack.c.bf16 %v6681_v31, %v3778_v23  ;;  %v3862_v32 = vsel %vm6856_vm0, %v6720_v1, %v3856_v12  ;;  %v3888_v3 = vsel %vm6888_vm1, %v6720_v1, %v3882_v13  ;;  %v6001_v58 = vld [vmem:[%s6752_s8 + $0x55c] sm:%s7081_s14]  ;;  %v6009_v0 = vld [vmem:[%s6752_s8 + $0x58c] sm:%s7081_s14] }
  0xa8   : > { %v3806_v29 = vpack.c.bf16 %v6681_v31, %v3804_v24  ;;  %5515 = vmatprep.subr.bf16.mxu0 %v6120_v20  ;;  %v3864_v30 = vpack.c.bf16 %v6681_v31, %v3862_v32  ;;  %v3890_v36 = vpack.c.bf16 %v6681_v31, %v3888_v3  ;;  %v3998_v37 = vsel %vm6856_vm0, %v6720_v1, %v3992_v15 }
  0xa9   : > { %v4024_v33 = vsel %vm6888_vm1, %v6720_v1, %v4018_v16  ;;  %5516 = vmatpush1.bf16.msra.mxu0 %v6119_v19  ;;  %3782 = vst [vmem:[#allocation7 + $0x338] sm:$0xf] %v3780_v28  ;;  %v4000_v41 = vpack.c.bf16 %v6681_v31, %v3998_v37  ;;  %v3914_v43 = vsel %vm6903_vm2, %v6720_v1, %v3908_v17  ;;  %v4044_v51 = vunpack.c.l.bf16 %v5992_v21  ;;  %v6014_v16 = vld [vmem:[%s6752_s8 + $0x5b0] sm:%s6844_s26]  ;;  %v6023_v28 = vld [vmem:[%s6752_s8 + $0x5e4] sm:%s6952_s22] }
  0xaa   : > { %v4721_v35 = vld [vmem:[#allocation7 + $0x2f8] sm:$0xff]  ;;  %3808 = vst [vmem:[#allocation7 + $0x33c] sm:$0xf] %v3806_v29  ;;  %v4026_v42 = vpack.c.bf16 %v6681_v31, %v4024_v33  ;;  %v3940_v2 = vsel %vm7016_vm3, %v6720_v1, %v3934_v18  ;;  %3866 = vst [vmem:[#allocation7 + $0x350] sm:$0xf] %v3864_v30  ;;  %v3916_v48 = vpack.c.bf16 %v6681_v31, %v3914_v43  ;;  %v4070_v52 = vunpack.c.l.bf16 %v5993_v22 }
  0xab   : > { %v6121_v45 = vcombine.low %v4717_v25, %v4721_v35  ;;  %v6122_v46 = vcombine.high %v4717_v25, %v4721_v35  ;;  %v4724_v47 = vld [vmem:[#allocation7 + $0x310] sm:$0xff]  ;;  %3892 = vst [vmem:[#allocation7 + $0x354] sm:$0xf] %v3890_v36  ;;  %v3942_v49 = vpack.c.bf16 %v6681_v31, %v3940_v2  ;;  %4002 = vst [vmem:[#allocation7 + $0x370] sm:$0xf] %v4000_v41  ;;  %v4128_v7 = vunpack.c.l.bf16 %v5998_v39  ;;  %v6022_v25 = vld [vmem:[%s6752_s8 + $0x5e0] sm:%s6844_s26] }
  0xac   : > { %v4728_v50 = vld [vmem:[#allocation7 + $0x330] sm:$0xff]  ;;  %4028 = vst [vmem:[#allocation7 + $0x374] sm:$0xf] %v4026_v42  ;;  %v4154_v53 = vunpack.c.l.bf16 %v5999_v40  ;;  %3918 = vst [vmem:[#allocation7 + $0x358] sm:$0xf] %v3916_v48  ;;  %v4264_v55 = vunpack.c.l.bf16 %v6006_v9  ;;  %v4290_v56 = vunpack.c.l.bf16 %v6007_v44  ;;  %v4050_v59 = vsel %vm6903_vm2, %v6720_v1, %v4044_v51  ;;  %v6016_v30 = vld [vmem:[%s6752_s8 + $0x5b8] sm:%s6969_s28] }
  0xad   : > { %5556 = vmatprep.subr.bf16.mxu1 %v6122_v46  ;;  %v6127_v54 = vcombine.low %v4724_v47, %v4728_v50  ;;  %v6128_v27 = vcombine.high %v4724_v47, %v4728_v50  ;;  %3944 = vst [vmem:[#allocation7 + $0x35c] sm:$0xf] %v3942_v49  ;;  %v4076_v60 = vsel %vm7016_vm3, %v6720_v1, %v4070_v52  ;;  %v4725_v4 = vld [vmem:[#allocation7 + $0x318] sm:$0xff]  ;;  %v4180_v14 = vunpack.c.l.bf16 %v6000_v57  ;;  %v6024_v41 = vld [vmem:[%s6752_s8 + $0x5e8] sm:%s6969_s28] }
  0xae   : > { %5557 = vmatpush1.bf16.msra.mxu1 %v6121_v45  ;;  %v4134_v61 = vsel %vm6856_vm0, %v6720_v1, %v4128_v7  ;;  %v4160_v62 = vsel %vm6888_vm1, %v6720_v1, %v4154_v53  ;;  %v4052_v5 = vpack.c.bf16 %v6681_v31, %v4050_v59  ;;  %v4078_v6 = vpack.c.bf16 %v6681_v31, %v4076_v60  ;;  %v6015_v17 = vld [vmem:[%s6752_s8 + $0x5b4] sm:%s6952_s22]  ;;  %v6017_v36 = vld [vmem:[%s6752_s8 + $0x5bc] sm:%s7081_s14] }
  0xaf   : > { %5517 = vmatprep.subr.bf16.mxu0 %v6128_v27  ;;  %v4136_v10 = vpack.c.bf16 %v6681_v31, %v4134_v61  ;;  %v4162_v11 = vpack.c.bf16 %v6681_v31, %v4160_v62  ;;  %v4270_v12 = vsel %vm6856_vm0, %v6720_v1, %v4264_v55  ;;  %v4296_v13 = vsel %vm6888_vm1, %v6720_v1, %v4290_v56  ;;  %v6025_v42 = vld [vmem:[%s6752_s8 + $0x5ec] sm:%s7081_s14] }
  0xb0   : > { %5518 = vmatpush1.bf16.msra.mxu0 %v6127_v54  ;;  %v4206_v15 = vunpack.c.l.bf16 %v6001_v58  ;;  %4054 = vst [vmem:[#allocation7 + $0x378] sm:$0xf] %v4052_v5  ;;  %4080 = vst [vmem:[#allocation7 + $0x37c] sm:$0xf] %v4078_v6  ;;  %v4272_v19 = vpack.c.bf16 %v6681_v31, %v4270_v12  ;;  %v4298_v20 = vpack.c.bf16 %v6681_v31, %v4296_v13  ;;  %v4316_v23 = vunpack.c.l.bf16 %v6008_v63 }
  0xb1   : > { %v4729_v18 = vld [vmem:[#allocation7 + $0x338] sm:$0xff]  ;;  %4138 = vst [vmem:[#allocation7 + $0x390] sm:$0xf] %v4136_v10  ;;  %4164 = vst [vmem:[#allocation7 + $0x394] sm:$0xf] %v4162_v11  ;;  %v4342_v24 = vunpack.c.l.bf16 %v6009_v0  ;;  %v4186_v21 = vsel %vm6903_vm2, %v6720_v1, %v4180_v14  ;;  %v4400_v45 = vunpack.c.l.bf16 %v6014_v16  ;;  %v4426_v46 = vunpack.c.l.bf16 %v6015_v17 }
  0xb2   : > { %v6129_v29 = vcombine.low %v4725_v4, %v4729_v18  ;;  %v6130_v32 = vcombine.high %v4725_v4, %v4729_v18  ;;  %v4732_v3 = vld [vmem:[#allocation7 + $0x350] sm:$0xff]  ;;  %v4212_v22 = vsel %vm7016_vm3, %v6720_v1, %v4206_v15  ;;  %4274 = vst [vmem:[#allocation7 + $0x3b0] sm:$0xf] %v4272_v19  ;;  %4300 = vst [vmem:[#allocation7 + $0x3b4] sm:$0xf] %v4298_v20  ;;  %v4536_v47 = vunpack.c.l.bf16 %v6022_v25 }
  0xb3   : > { %v4736_v37 = vld [vmem:[#allocation7 + $0x370] sm:$0xff]  ;;  %v4188_v33 = vpack.c.bf16 %v6681_v31, %v4186_v21  ;;  %v4214_v39 = vpack.c.bf16 %v6681_v31, %v4212_v22  ;;  %v4322_v40 = vsel %vm6903_vm2, %v6720_v1, %v4316_v23  ;;  %v4348_v35 = vsel %vm7016_vm3, %v6720_v1, %v4342_v24 }
  0xb4   : > { %5558 = vmatprep.subr.bf16.mxu1 %v6130_v32  ;;  %v6135_v43 = vcombine.low %v4732_v3, %v4736_v37  ;;  %v6136_v2 = vcombine.high %v4732_v3, %v4736_v37  ;;  %v4324_v9 = vpack.c.bf16 %v6681_v31, %v4322_v40  ;;  %v4350_v44 = vpack.c.bf16 %v6681_v31, %v4348_v35  ;;  %v4733_v49 = vld [vmem:[#allocation7 + $0x358] sm:$0xff] }
  0xb5   : > { %5559 = vmatpush1.bf16.msra.mxu1 %v6129_v29  ;;  %4190 = vst [vmem:[#allocation7 + $0x398] sm:$0xf] %v4188_v33  ;;  %4216 = vst [vmem:[#allocation7 + $0x39c] sm:$0xf] %v4214_v39  ;;  %v4562_v48 = vunpack.c.l.bf16 %v6023_v28  ;;  %v4452_v50 = vunpack.c.l.bf16 %v6016_v30  ;;  %v4478_v51 = vunpack.c.l.bf16 %v6017_v36  ;;  %v4588_v52 = vunpack.c.l.bf16 %v6024_v41 }
  0xb6   : > { %5519 = vmatprep.subr.bf16.mxu0 %v6136_v2  ;;  %4326 = vst [vmem:[#allocation7 + $0x3b8] sm:$0xf] %v4324_v9  ;;  %4352 = vst [vmem:[#allocation7 + $0x3bc] sm:$0xf] %v4350_v44  ;;  %v4614_v7 = vunpack.c.l.bf16 %v6025_v42  ;;  %v4406_v53 = vsel %vm6856_vm0, %v6720_v1, %v4400_v45  ;;  %v4432_v54 = vsel %vm6888_vm1, %v6720_v1, %v4426_v46 }
  0xb7   : > { %5520 = vmatpush1.bf16.msra.mxu0 %v6135_v43  ;;  %v4542_v27 = vsel %vm6856_vm0, %v6720_v1, %v4536_v47  ;;  %v4568_v55 = vsel %vm6888_vm1, %v6720_v1, %v4562_v48  ;;  %v4737_v56 = vld [vmem:[#allocation7 + $0x378] sm:$0xff]  ;;  %v4408_v58 = vpack.c.bf16 %v6681_v31, %v4406_v53  ;;  %v4434_v59 = vpack.c.bf16 %v6681_v31, %v4432_v54  ;;  %v6671_v28 = vld.sshfl [vmem:[%s7757_s0] sm:$0x33 pattern:$0x76325410] }
  0xb8   : > { %v4740_v57 = vld [vmem:[#allocation7 + $0x390] sm:$0xff]  ;;  %v4544_v60 = vpack.c.bf16 %v6681_v31, %v4542_v27  ;;  %v4570_v61 = vpack.c.bf16 %v6681_v31, %v4568_v55  ;;  %v6137_v62 = vcombine.low %v4733_v49, %v4737_v56  ;;  %v6138_v63 = vcombine.high %v4733_v49, %v4737_v56 }
  0xb9   : > { %v4458_v8 = vsel %vm6903_vm2, %v6720_v1, %v4452_v50  ;;  %v4484_v26 = vsel %vm7016_vm3, %v6720_v1, %v4478_v51  ;;  %v4744_v0 = vld [vmem:[#allocation7 + $0x3b0] sm:$0xff]  ;;  %4410 = vst [vmem:[#allocation7 + $0x3d0] sm:$0xf] %v4408_v58  ;;  %4436 = vst [vmem:[#allocation7 + $0x3d4] sm:$0xf] %v4434_v59  ;;  %v4594_v6 = vsel %vm6903_vm2, %v6720_v1, %v4588_v52 }
  0xba   : > { %4546 = vst [vmem:[#allocation7 + $0x3f0] sm:$0xf] %v4544_v60  ;;  %4572 = vst [vmem:[#allocation7 + $0x3f4] sm:$0xf] %v4570_v61  ;;  %v4460_v4 = vpack.c.bf16 %v6681_v31, %v4458_v8  ;;  %v4486_v5 = vpack.c.bf16 %v6681_v31, %v4484_v26  ;;  %v4620_v10 = vsel %vm7016_vm3, %v6720_v1, %v4614_v7  ;;  %5560 = vmatprep.subr.bf16.mxu1 %v6138_v63 }
  0xbb   : > { %v6143_v11 = vcombine.low %v4740_v57, %v4744_v0  ;;  %v6144_v12 = vcombine.high %v4740_v57, %v4744_v0  ;;  %v4596_v13 = vpack.c.bf16 %v6681_v31, %v4594_v6  ;;  %v4622_v14 = vpack.c.bf16 %v6681_v31, %v4620_v10  ;;  %5561 = vmatpush1.bf16.msra.mxu1 %v6137_v62 }
  0xbc   : > { %v4741_v15 = vld [vmem:[#allocation7 + $0x398] sm:$0xff]  ;;  %4462 = vst [vmem:[#allocation7 + $0x3d8] sm:$0xf] %v4460_v4  ;;  %4488 = vst [vmem:[#allocation7 + $0x3dc] sm:$0xf] %v4486_v5 }
  0xbd   : > { %5521 = vmatprep.subr.bf16.mxu0 %v6144_v12  ;;  %v4745_v16 = vld [vmem:[#allocation7 + $0x3b8] sm:$0xff]  ;;  %4598 = vst [vmem:[#allocation7 + $0x3f8] sm:$0xf] %v4596_v13  ;;  %4624 = vst [vmem:[#allocation7 + $0x3fc] sm:$0xf] %v4622_v14 }
  0xbe   : > { %v6145_v34 = vcombine.low %v4741_v15, %v4745_v16  ;;  %v6146_v17 = vcombine.high %v4741_v15, %v4745_v16  ;;  %5522 = vmatpush1.bf16.msra.mxu0 %v6143_v11 }
  0xc0   : > { %5562 = vmatprep.subr.bf16.mxu1 %v6146_v17  ;;  %v4748_v38 = vld [vmem:[#allocation7 + $0x3d0] sm:$0xff] }
  0xc1   : > { %5563 = vmatpush1.bf16.msra.mxu1 %v6145_v34  ;;  %v4752_v18 = vld [vmem:[#allocation7 + $0x3f0] sm:$0xff] }
  0xc2   : > { %v6151_v19 = vcombine.low %v4748_v38, %v4752_v18  ;;  %v6152_v20 = vcombine.high %v4748_v38, %v4752_v18 }
  0xc3   : > { %v4749_v31 = vld [vmem:[#allocation7 + $0x3d8] sm:$0xff] }
  0xc4   : > { %5523 = vmatprep.subr.bf16.mxu0 %v6152_v20  ;;  %v4753_v23 = vld [vmem:[#allocation7 + $0x3f8] sm:$0xff] }
  0xc5   : > { %v6153_v24 = vcombine.low %v4749_v31, %v4753_v23  ;;  %v6154_v25 = vcombine.high %v4749_v31, %v4753_v23  ;;  %5524 = vmatpush1.bf16.msra.mxu0 %v6151_v19 }
  0xc7   : > { %5564 = vmatprep.subr.bf16.mxu1 %v6154_v25 }
  0xc8   : > { %5565 = vmatpush1.bf16.msra.mxu1 %v6153_v24  ;;  %5526 = vmatmul.mubr.bf16.vlgmr.msra.gmra.mrb[4].mxu0 %v6671_v28 }
  0xcb   : > { %5567 = vmatmul.mubr.bf16.vlgmr.msra.gmra.mrb[4].mxu1 %v6671_v28 }
 0x10b   : > { %v4758_v32 = vpop.permute.xlu0 %4757 }
 0x12d   : > { %v5486_v29 = vpop.f32.mrb[0].mxu1 }
 0x12e   : > { %v5488_v3 = vpop.f32.mrb[1].mxu1  ;;  %v5487_v21 = vadd.f32 %v5486_v29, %v4758_v32 }
 0x12f   : > { %v5489_v22 = vadd.f32 %v5488_v3, %v4758_v32  ;;  %v5490_v30 = vpop.f32.mrb[2].mxu1 }
 0x130   : > { %v5491_v36 = vpop.f32.mrb[3].mxu1  ;;  %v5617_v42 = vmul.f32 %v5487_v21, %v5487_v21  ;;  %v5599_v9 = vsel %vm5595_vm4, %v5487_v21, 0.0 }
 0x131   : > { %v5584_v33 = vcombine.low %v5487_v21, %v5489_v22  ;;  %v5618_v48 = vmul.f32 %v5489_v22, %v5489_v22  ;;  %v5601_v7 = vsel %vm5595_vm4, %v5489_v22, 0.0 }
 0x132   : > { %v5626_v52 = vsel %vm5595_vm4, %v5617_v42, 0.0 }
 0x133   : > { %5592 = vst [vmem:[%s7724_s20 + $0x8] sm:$0xff] %v5584_v33  ;;  %v5628_v27 = vsel %vm5595_vm4, %v5618_v48, 0.0 }
 0x134   : > { %v5445_v37 = vpop.f32.mrb[0].mxu0 }
 0x135   : > { %v5446_v39 = vadd.f32 %v5445_v37, %v4758_v32  ;;  %v5447_v40 = vpop.f32.mrb[1].mxu0 }
 0x136   : > { %v5448_v35 = vadd.f32 %v5447_v40, %v4758_v32  ;;  %v5449_v41 = vpop.f32.mrb[2].mxu0 }
 0x137   : > { %v5596_v43 = vsel %vm5595_vm4, %v5446_v39, 0.0  ;;  %v5615_v2 = vmul.f32 %v5446_v39, %v5446_v39  ;;  %v5450_v44 = vpop.f32.mrb[3].mxu0 }
 0x138   : > { %v5583_v45 = vcombine.low %v5446_v39, %v5448_v35  ;;  %v5597_v46 = vsel %vm5595_vm4, %v5448_v35, 0.0  ;;  %v5616_v47 = vmul.f32 %v5448_v35, %v5448_v35 }
 0x139   : > { %v5598_v49 = vadd.f32 %v5597_v46, %v5596_v43  ;;  %v5623_v50 = vsel %vm5595_vm4, %v5615_v2, 0.0 }
 0x13a   : > { %5591 = vst [vmem:[%s7724_s20] sm:$0xff] %v5583_v45  ;;  %v5624_v51 = vsel %vm5595_vm4, %v5616_v47, 0.0 }
 0x13b   : > { %v5625_v53 = vadd.f32 %v5624_v51, %v5623_v50  ;;  %v5600_v54 = vadd.f32 %v5599_v9, %v5598_v49 }
 0x13d   : > { %v5627_v55 = vadd.f32 %v5626_v52, %v5625_v53  ;;  %v5602_v56 = vadd.f32 %v5601_v7, %v5600_v54 }
 0x13f   : > { %v5629_v57 = vadd.f32 %v5628_v27, %v5627_v55 }
 0x19b   : > { %v5527_v58 = vpop.f32.mrb[4].mxu0 }
 0x19c   : > { %v5528_v59 = vadd.f32 %v5527_v58, %v4758_v32  ;;  %v5529_v60 = vpop.f32.mrb[5].mxu0 }
 0x19d   : > { %v5530_v61 = vadd.f32 %v5529_v60, %v4758_v32  ;;  %v5531_v62 = vpop.f32.mrb[6].mxu0 }
 0x19e   : > { %v5603_v63 = vsel %vm5595_vm4, %v5528_v59, 0.0  ;;  %v5619_v8 = vmul.f32 %v5528_v59, %v5528_v59  ;;  %v5568_v26 = vpop.f32.mrb[4].mxu1  ;;  %v5532_v0 = vpop.f32.mrb[7].mxu0 }
 0x19f   : > { %v5604_v4 = vadd.f32 %v5603_v63, %v5602_v56  ;;  %v5569_v5 = vadd.f32 %v5568_v26, %v4758_v32  ;;  %v5585_v6 = vcombine.low %v5528_v59, %v5530_v61  ;;  %v5605_v10 = vsel %vm5595_vm4, %v5530_v61, 0.0  ;;  %v5570_v11 = vpop.f32.mrb[5].mxu1 }
 0x1a0   : > { %v5620_v12 = vmul.f32 %v5530_v61, %v5530_v61  ;;  %v5571_v13 = vadd.f32 %v5570_v11, %v4758_v32  ;;  %v5572_v14 = vpop.f32.mrb[6].mxu1  ;;  %v5630_v15 = vsel %vm5595_vm4, %v5619_v8, 0.0 }
 0x1a1   : > { %5593 = vst [vmem:[%s7724_s20 + $0x10] sm:$0xff] %v5585_v6  ;;  %v5573_v16 = vpop.f32.mrb[7].mxu1  ;;  %v5606_v34 = vadd.f32 %v5605_v10, %v5604_v4  ;;  %v5621_v17 = vmul.f32 %v5569_v5, %v5569_v5  ;;  %v5631_v38 = vadd.f32 %v5630_v15, %v5629_v57  ;;  %v5607_v19 = vsel %vm5595_vm4, %v5569_v5, 0.0 }
 0x1a2   : > { %v5586_v18 = vcombine.low %v5569_v5, %v5571_v13  ;;  %v5622_v20 = vmul.f32 %v5571_v13, %v5571_v13  ;;  %v5632_v31 = vsel %vm5595_vm4, %v5620_v12, 0.0  ;;  %v5609_v25 = vsel %vm5595_vm4, %v5571_v13, 0.0 }
 0x1a3   : > { %v5608_v23 = vadd.f32 %v5607_v19, %v5606_v34  ;;  %v5633_v24 = vadd.f32 %v5632_v31, %v5631_v38  ;;  %v5634_v28 = vsel %vm5595_vm4, %v5621_v17, 0.0 }
 0x1a4   : > { %5594 = vst [vmem:[%s7724_s20 + $0x18] sm:$0xff] %v5586_v18  ;;  %v5636_v3 = vsel %vm5595_vm4, %v5622_v20, 0.0 }
 0x1a5   : > { %v5610_v29 = vadd.f32 %v5609_v25, %v5608_v23  ;;  %v5635_v32 = vadd.f32 %v5634_v28, %v5633_v24 }
 0x1a7   : > { %5611 = vadd.xlane.f32.xlu0 %v5610_v29  ;;  %v5637_v21 = vadd.f32 %v5636_v3, %v5635_v32 }
 0x1a9   : > { %5638 = vadd.xlane.f32.xlu1 %v5637_v21 }
 0x234   : > { %v5612_v22 = vpop.xlane.xlu0 %5611 }
 0x235   : > { %5614 = vst.msk [vmem:[%s270_s25] sm:$0xf] %vm5613_vm5, %v5612_v22 }
 0x236   : > { %v5639_v30 = vpop.xlane.xlu1 %5638 }
 0x237   : > { %5640 = vst.msk [vmem:[%s274_s30] sm:$0xf] %vm5613_vm5, %v5639_v30 }
 0x238 PF: > { %s22_s23 = sadd.s32 1, %s6678_s23  }
 0x239   : > { %p19_p10 = scmp.ge.s32.totalorder %s22_s23, 4  }
 0x23b   :  { %21 = sbr.rel (!%p19_p10) target bundleno = 3 (0x3), region = 596 }

// kernel: down_layer_residual_forward.7
= control target key start
LH: loop header
LB: loop body
LE: loop exit
PB: predicated region body
PF: predicated region fallthrough
CT: control target
= control target key end

     0   :  { %s4125_s23 = smov 0   ;;  %s4834_s0 = inlined_call_operand.vmem [shape: bf16[8,128], index: 0, kind: input, shape index: {}]   ;;  %s4835_s1 = inlined_call_operand.vmem [shape: f32[8,1], index: 1, kind: input, shape index: {}]   ;;  %s4836_s2 = inlined_call_operand.vmem [shape: bf16[108,1536], index: 2, kind: input, shape index: {}]   ;;  %s4837_s3 = inlined_call_operand.<no memory space> [shape: bf16[], index: 3, kind: input, shape index: {}]   ;;  %s4838_s4 = inlined_call_operand.vmem [shape: f32[8,2048], index: 4, kind: output, shape index: {0}]   ;;  %s4839_s5 = inlined_call_operand.vmem [shape: f32[2,8,1], index: 5, kind: output, shape index: {1}]   ;;  %s4840_s6 = inlined_call_operand.vmem [shape: f32[2,8,1], index: 6, kind: output, shape index: {2}]  }
   0x1   :  { %v12_v0 = vstv %s4837_s3 }
   0x2   :  { %v4123_v1 = vunpack.i.l.bf16 %v12_v0 }
   0x3 LB: > { %s4131_s24 = sadd.s32 4294967295, %s4081_s23   ;;  %p3640_p0 = scmp.ge.s32.totalorder %s4081_s23, 1  ;;  %s4081_s23 = sphi %s4125_s23, %s22_s23  }
   0x4   : > { %p207_p1 = scmp.lt.s32.totalorder %s4081_s23, 3 }
   0x6   : > { %p208_p2 = pnand %p3640_p0, %p207_p1 }
   0x8   : > { %211 = sbr.rel (%p208_p2) target bundleno = 497 (0x1f1), region = 32 }
   0xf   : > { %s4136_s3 = sshll.u32 %s4131_s24, 3  ;;  %v4140_v2 = vpack.c.bf16 %v4123_v1, %v4123_v1  ;;  %v2991_v3 = vld [vmem:[%s4835_s1] sm:$0xff]  ;;  %v4083_v4 = vmov 0   ;;  %v2662_v9 = vlaneseq  ;;  %vm3498_vm13 = vcmask 7168  }
  0x10   : > { %p252_p3 = scmp.lt.s32.totalorder %s4136_s3, 11  ;;  %3349 = vmatprep.mubr.bf16.mxu0 %v4083_v4  ;;  %3390 = vmatprep.mubr.bf16.mxu1 %v4083_v4  ;;  %s326_s29 = sadd.s32 4, %s4136_s3 }
  0x11   : > { %3964 = vst [vmem:[#allocation7 + $0x1d0] sm:$0xff] %v4140_v2   ;;  %3969 = vst [vmem:[#allocation7 + $0x1d8] sm:$0xff] %v4140_v2   ;;  %4025 = vset.pattern.permute.xlu0 %v4083_v4  ;;  %s4162_s9 = ssub.s32 11, %s326_s29  ;;  %v2663_v16 = vshrl.u32 %v2662_v9, 7  ;;  %s357_s11 = sadd.s32 5, %s4136_s3 }
  0x12   : > { %3984 = vst [vmem:[#allocation7 + $0x1f0] sm:$0xff] %v4140_v2   ;;  %3989 = vst [vmem:[#allocation7 + $0x1f8] sm:$0xff] %v4140_v2   ;;  %s253_s27 = scalar_select %p252_p3, %s4136_s3, 11  ;;  %2994 = vperm.xlu0 %4025, %v2991_v3   ;;  %v344_v46 = vstv %s4162_s9 }
  0x13   : > { %p328_p4 = scmp.lt.s32.totalorder %s4162_s9, 0  ;;  %v4176_v27 = vadd.s32 104, %v2663_v16  ;;  %s4181_s17 = ssub.s32 11, %s357_s11  ;;  %vm4236_vm1 = vcmp.lt.s32.totalorder %v344_v46, 0 }
  0x14   : > { %s3642_s28 = sshll.u32 %s253_s27, 2  ;;  %s388_s19 = sadd.s32 6, %s4136_s3  ;;  %v375_v51 = vstv %s4181_s17 }
  0x15   : > { %s4158_s8 = scalar_lea.vmem %s4836_s2, %s3642_s28  ;;  %s419_s21 = sadd.s32 7, %s4136_s3  ;;  %vm2665_vm0 = vcmp.lt.s32.totalorder %v4176_v27, 108  ;;  %vm4253_vm2 = vcmp.lt.s32.totalorder %v375_v51, 0 }
  0x16   : > { %v275_v5 = vld [vmem:[%s4158_s8] sm:$0xff]   ;;  %v4026_v6 = vld [vmem:[%s4158_s8 + $0x30] sm:$0xff]   ;;  %v4027_v7 = vld [vmem:[%s4158_s8 + $0x8] sm:$0xff]   ;;  %s329_s10 = scalar_select %p328_p4, 0, 255 }
  0x17   : > { %285 = vst [vmem:[#allocation7] sm:$0xff] %v275_v5   ;;  %v4028_v8 = vld [vmem:[%s4158_s8 + $0x38] sm:$0xff]   ;;  %v4031_v10 = vld [vmem:[%s4158_s8 + $0x60] sm:$0xff]   ;;  %v4032_v13 = vld [vmem:[%s4158_s8 + $0x90] sm:$0xff]   ;;  %p359_p5 = scmp.lt.s32.totalorder %s4181_s17, 0  ;;  %s4197_s25 = ssub.s32 11, %s388_s19 }
  0x18   : > { %v3762_v11 = vcombine.high %v4027_v7, %v4028_v8  ;;  %v3761_v12 = vcombine.low %v4027_v7, %v4028_v8  ;;  %v4034_v14 = vld [vmem:[%s4158_s8 + $0x68] sm:$0xff]   ;;  %v4035_v15 = vld [vmem:[%s4158_s8 + $0x98] sm:$0xff]   ;;  %v3768_v18 = vcombine.high %v4031_v10, %v4032_v13  ;;  %v4039_v19 = vld [vmem:[%s4158_s8 + $0xc0] sm:$0xff]   ;;  %s330_s12 = sshrl.u32 %s329_s10, 1  ;;  %v3767_v28 = vcombine.low %v4031_v10, %v4032_v13  ;;  %s4204_s26 = ssub.s32 11, %s419_s21 }
  0x19   : > { %v3770_v22 = vcombine.high %v4034_v14, %v4035_v15  ;;  %v3769_v23 = vcombine.low %v4034_v14, %v4035_v15  ;;  %v4040_v24 = vld [vmem:[%s4158_s8 + $0xf0] sm:$0xff]   ;;  %v4042_v25 = vld [vmem:[%s4158_s8 + $0xc8] sm:$0xff]   ;;  %v4043_v26 = vld [vmem:[%s4158_s8 + $0xf8] sm:$0xff]   ;;  %s331_s13 = sor.u32 %s330_s12, %s329_s10  ;;  %v406_v53 = vstv %s4197_s25  ;;  %s2300_s27 = sor.u32 2, %s4162_s9 }
  0x1a   : > { %3358 = vmatprep.subr.bf16.mxu1 %v3762_v11  ;;  %v4047_v29 = vld [vmem:[%s4158_s8 + $0x120] sm:$0xff]   ;;  %s332_s14 = sand.u32 85, %s331_s13  ;;  %v3776_v30 = vcombine.high %v4039_v19, %v4040_v24  ;;  %v3778_v31 = vcombine.high %v4042_v25, %v4043_v26  ;;  %v3777_v32 = vcombine.low %v4042_v25, %v4043_v26  ;;  %v4048_v33 = vld [vmem:[%s4158_s8 + $0x150] sm:$0xff]   ;;  %v4050_v34 = vld [vmem:[%s4158_s8 + $0x128] sm:$0xff]   ;;  %v3775_v36 = vcombine.low %v4039_v19, %v4040_v24  ;;  %s2333_s30 = sor.u32 2, %s4181_s17 }
  0x1b   : > { %3359 = vmatpush1.bf16.msra.mxu1 %v3761_v12  ;;  %s333_s15 = sshrl.u32 %s332_s14, 1  ;;  %v4051_v35 = vld [vmem:[%s4158_s8 + $0x158] sm:$0xff]   ;;  %v4185_v37 = vld [vmem:[%s4158_s8 + $0x180] sm:$0xff]   ;;  %v3784_v38 = vcombine.high %v4047_v29, %v4048_v33  ;;  %v4056_v41 = vld [vmem:[%s4158_s8 + $0x1b0] sm:$0xff]   ;;  %v3783_v44 = vcombine.low %v4047_v29, %v4048_v33  ;;  %v437_v55 = vstv %s4204_s26  ;;  %p390_p6 = scmp.lt.s32.totalorder %s4197_s25, 0  ;;  %vm4466_vm3 = vcmp.lt.s32.totalorder %v406_v53, 0 }
  0x1c   : > { %3360 = vmatprep.subr.bf16.mxu1 %v3770_v22  ;;  %s334_s16 = sor.u32 %s333_s15, %s332_s14  ;;  %v3786_v39 = vcombine.high %v4050_v34, %v4051_v35  ;;  %v3785_v40 = vcombine.low %v4050_v34, %v4051_v35  ;;  %v4058_v42 = vld [vmem:[%s4158_s8 + $0x188] sm:$0xff]   ;;  %v4059_v43 = vld [vmem:[%s4158_s8 + $0x1b8] sm:$0xff]   ;;  %v4194_v45 = vld [vmem:[%s4158_s8 + $0x1e0] sm:$0xff]   ;;  %v3792_v47 = vcombine.high %v4185_v37, %v4056_v41  ;;  %v3791_v56 = vcombine.low %v4185_v37, %v4056_v41  ;;  %p421_p7 = scmp.lt.s32.totalorder %s4204_s26, 0 }
  0x1d   : > { %s335_s18 = sand.u32 51, %s334_s16  ;;  %v3794_v48 = vcombine.high %v4058_v42, %v4059_v43  ;;  %v3793_v49 = vcombine.low %v4058_v42, %v4059_v43  ;;  %v4201_v50 = vld [vmem:[%s4158_s8 + $0x210] sm:$0xff]   ;;  %v4066_v52 = vld [vmem:[%s4158_s8 + $0x1e8] sm:$0xff]   ;;  %v4067_v54 = vld [vmem:[%s4158_s8 + $0x218] sm:$0xff]   ;;  %v4224_v60 = vstv %s2300_s27  ;;  %p4271_p8 = scmp.lt.s32.totalorder %s2300_s27, 0  ;;  %vm4483_vm4 = vcmp.lt.s32.totalorder %v437_v55, 0 }
  0x1e   : > { %v2927_v17 = vld [vmem:[#allocation7] sm:$0xff]  ;;  %s336_s20 = sshrl.u32 %s335_s18, 2  ;;  %v3800_v57 = vcombine.high %v4194_v45, %v4201_v50  ;;  %v3751_v59 = vld [vmem:[%s4158_s8 + $0x270] sm:$0xff]   ;;  %v3802_v61 = vcombine.high %v4066_v52, %v4067_v54  ;;  %v3801_v62 = vcombine.low %v4066_v52, %v4067_v54  ;;  %v4227_v3 = vld [vmem:[%s4158_s8 + $0x248] sm:$0xff]   ;;  %v3799_v5 = vcombine.low %v4194_v45, %v4201_v50  ;;  %s2366_s14 = sor.u32 2, %s4197_s25 }
  0x1f   : > { %v3760_v20 = vcombine.high %v2927_v17, %v4026_v6  ;;  %v3759_v21 = vcombine.low %v2927_v17, %v4026_v6  ;;  %3361 = vmatpush1.bf16.msra.mxu1 %v3769_v23  ;;  %s337_s22 = sor.u32 %s336_s20, %s335_s18  ;;  %v4217_v58 = vld [vmem:[%s4158_s8 + $0x240] sm:$0xff]   ;;  %v2660_v63 = vunpack.c.l.bf16 %v3751_v59  ;;  %v2682_v0 = vunpack.c.h.bf16 %v3751_v59  ;;  %v3753_v6 = vld [vmem:[%s4158_s8 + $0x278] sm:$0xff]   ;;  %s2399_s16 = sor.u32 2, %s4204_s26 }
  0x20   : > { %3362 = vmatprep.subr.bf16.mxu1 %v3778_v31  ;;  %s4210_s28 = sand.u32 15, %s337_s22  ;;  %v4243_v9 = vstv %s2333_s30  ;;  %v2704_v12 = vunpack.c.l.bf16 %v3753_v6  ;;  %v2726_v13 = vunpack.c.h.bf16 %v3753_v6  ;;  %v4084_v17 = vmov 0.0   ;;  %p4315_p9 = scmp.lt.s32.totalorder %s2333_s30, 0 }
  0x21   : > { %3317 = vmatprep.subr.bf16.mxu0 %v3760_v20  ;;  %s360_s29 = scalar_select %p359_p5, 0, 255  ;;  %v3651_v7 = vld [vmem:[%s4158_s8 + $0x10] sm:%s4210_s28]  ;;  %v2666_v10 = vsel %vm2665_vm0, %v2660_v63, %v4123_v1  ;;  %v2688_v11 = vsel %vm2665_vm0, %v2682_v0, %v4123_v1  ;;  %v3659_v15 = vld [vmem:[%s4158_s8 + $0x40] sm:%s4210_s28]  ;;  %vm2319_vm5 = vcmp.lt.s32.totalorder %v4224_v60, 0  ;;  %vm2352_vm6 = vcmp.lt.s32.totalorder %v4243_v9, 0 }
  0x22   : > { %3318 = vmatpush1.bf16.msra.mxu0 %v3759_v21  ;;  %v3667_v16 = vld [vmem:[%s4158_s8 + $0x70] sm:%s4210_s28]  ;;  %v2690_v19 = vpack.c.bf16 %v4084_v17, %v2688_v11  ;;  %v340_v20 = vunpack.c.l.bf16 %v3651_v7  ;;  %v516_v21 = vunpack.c.l.bf16 %v3659_v15  ;;  %v3675_v22 = vld [vmem:[%s4158_s8 + $0xa0] sm:%s4210_s28]  ;;  %v2710_v24 = vsel %vm2665_vm0, %v2704_v12, %v4123_v1  ;;  %p4323_p10 = scmp.lt.s32.totalorder %s2366_s14, 0  ;;  %p4329_p11 = scmp.lt.s32.totalorder %s2399_s16, 0 }
  0x23   : > { %3319 = vmatprep.subr.bf16.mxu0 %v3768_v18  ;;  %3363 = vmatpush1.bf16.msra.mxu1 %v3777_v32  ;;  %s361_s7 = sshrl.u32 %s360_s29, 1  ;;  %v2668_v18 = vpack.c.bf16 %v4084_v17, %v2666_v10  ;;  %v3683_v23 = vld [vmem:[%s4158_s8 + $0xd0] sm:%s4210_s28]  ;;  %v2732_v25 = vsel %vm2665_vm0, %v2726_v13, %v4123_v1  ;;  %v692_v26 = vunpack.c.l.bf16 %v3667_v16  ;;  %v3691_v29 = vld [vmem:[%s4158_s8 + $0x100] sm:%s4210_s28]  ;;  %v2712_v31 = vpack.c.bf16 %v4084_v17, %v2710_v24  ;;  %s2520_s30 = sor.u32 1, %s4162_s9 }
  0x24   : > { %3364 = vmatprep.subr.bf16.mxu1 %v3786_v39  ;;  %s4251_s10 = sor.u32 %s361_s7, %s360_s29  ;;  %2692 = vst [vmem:[#allocation7 + $0x1a4] sm:$0xf] %v2690_v19  ;;  %v2734_v32 = vpack.c.bf16 %v4084_v17, %v2732_v25  ;;  %v346_v33 = vsel %vm4236_vm1, %v4123_v1, %v340_v20  ;;  %v522_v34 = vsel %vm4236_vm1, %v4123_v1, %v516_v21  ;;  %v3707_v35 = vld [vmem:[%s4158_s8 + $0x160] sm:%s4210_s28]  ;;  %v4311_v42 = vld [vmem:[%s4158_s8 + $0x1f0] sm:%s4210_s28]  ;;  %v1044_v45 = vunpack.c.l.bf16 %v3683_v23  ;;  %p4383_p12 = scmp.lt.s32.totalorder %s2520_s30, 0 }
  0x25   : > { %s363_s11 = sand.u32 85, %s4251_s10  ;;  %2670 = vst [vmem:[#allocation7 + $0x1a0] sm:$0xf] %v2668_v18  ;;  %v353_v37 = vpack.c.bf16 %v4084_v17, %v346_v33  ;;  %v698_v39 = vsel %vm4236_vm1, %v4123_v1, %v692_v26  ;;  %v3723_v41 = vld [vmem:[%s4158_s8 + $0x1c0] sm:%s4210_s28]  ;;  %2714 = vst [vmem:[#allocation7 + $0x1a8] sm:$0xf] %v2712_v31  ;;  %v1220_v46 = vunpack.c.l.bf16 %v3691_v29  ;;  %v2100_v54 = vunpack.c.l.bf16 %v4311_v42 }
  0x26   : > { %3320 = vmatpush1.bf16.msra.mxu0 %v3767_v28  ;;  %s364_s13 = sshrl.u32 %s363_s11, 1  ;;  %v868_v28 = vunpack.c.l.bf16 %v3675_v22  ;;  %2736 = vst [vmem:[#allocation7 + $0x1ac] sm:$0xf] %v2734_v32  ;;  %v705_v43 = vpack.c.bf16 %v4084_v17, %v698_v39  ;;  %v1924_v50 = vunpack.c.l.bf16 %v3723_v41  ;;  %v1050_v51 = vsel %vm4236_vm1, %v4123_v1, %v1044_v45  ;;  %p262_p2 = scmp.lt.s32.totalorder %s4136_s3, 15 }
  0x27   : > { %3321 = vmatprep.subr.bf16.mxu0 %v3776_v30  ;;  %3365 = vmatpush1.bf16.msra.mxu1 %v3785_v40  ;;  %v3699_v30 = vld [vmem:[%s4158_s8 + $0x130] sm:%s4210_s28]  ;;  %s365_s15 = sor.u32 %s364_s13, %s363_s11  ;;  %355 = vst [vmem:[#allocation7 + $0x10] sm:$0xf] %v353_v37  ;;  %v1226_v52 = vsel %vm4236_vm1, %v4123_v1, %v1220_v46  ;;  %v2417_v60 = vstv %s2399_s16  ;;  %p267_p3 = scmp.lt.s32.totalorder %s4131_s24, 1 }
  0x28   : > { %3366 = vmatprep.subr.bf16.mxu1 %v3794_v48  ;;  %s366_s18 = sand.u32 51, %s365_s15  ;;  %v874_v40 = vsel %vm4236_vm1, %v4123_v1, %v868_v28  ;;  %v1572_v48 = vunpack.c.l.bf16 %v3707_v35  ;;  %707 = vst [vmem:[#allocation7 + $0x50] sm:$0xf] %v705_v43  ;;  %v1930_v21 = vsel %vm4236_vm1, %v4123_v1, %v1924_v50  ;;  %vm2418_vm8 = vcmp.lt.s32.totalorder %v2417_v60, 0  ;;  %s4862_s3 = smov (!%p262_p2, %s4136_s3), 15 }
  0x29   : > { %s367_s20 = sshrl.u32 %s366_s18, 2  ;;  %v1937_v45 = vpack.c.bf16 %v4084_v17, %v1930_v21  ;;  %s4864_s24 = smov (!%p267_p3, %s4131_s24), 1 }
  0x2a   : > { %3322 = vmatpush1.bf16.msra.mxu0 %v3775_v36  ;;  %v3715_v36 = vld [vmem:[%s4158_s8 + $0x190] sm:%s4210_s28]  ;;  %s368_s22 = sor.u32 %s367_s20, %s366_s18  ;;  %v1578_v0 = vsel %vm4236_vm1, %v4123_v1, %v1572_v48 }
  0x2b   : > { %3323 = vmatprep.subr.bf16.mxu0 %v3784_v38  ;;  %3367 = vmatpush1.bf16.msra.mxu1 %v3793_v49  ;;  %v529_v38 = vpack.c.bf16 %v4084_v17, %v522_v34  ;;  %v1748_v49 = vunpack.c.l.bf16 %v3715_v36  ;;  %s4333_s29 = sand.u32 15, %s368_s22  ;;  %v1585_v12 = vpack.c.bf16 %v4084_v17, %v1578_v0  ;;  %1939 = vst [vmem:[#allocation7 + $0x130] sm:$0xf] %v1937_v45 }
  0x2c   : > { %3368 = vmatprep.subr.bf16.mxu1 %v3802_v61  ;;  %v3660_v59 = vld [vmem:[%s4158_s8 + $0x44] sm:%s4333_s29]  ;;  %s391_s7 = scalar_select %p390_p6, 0, 255  ;;  %v1057_v61 = vpack.c.bf16 %v4084_v17, %v1050_v51  ;;  %v3668_v7 = vld [vmem:[%s4158_s8 + $0x74] sm:%s4333_s29] }
  0x2d   : > { %531 = vst [vmem:[#allocation7 + $0x30] sm:$0xf] %v529_v38  ;;  %v547_v6 = vunpack.c.l.bf16 %v3660_v59  ;;  %s4363_s10 = scalar_select %p421_p7, 0, 255  ;;  %v3676_v10 = vld [vmem:[%s4158_s8 + $0xa4] sm:%s4333_s29]  ;;  %v723_v15 = vunpack.c.l.bf16 %v3668_v7  ;;  %v3684_v18 = vld [vmem:[%s4158_s8 + $0xd4] sm:%s4333_s29]  ;;  %v1754_v20 = vsel %vm4236_vm1, %v4123_v1, %v1748_v49 }
  0x2e   : > { %3324 = vmatpush1.bf16.msra.mxu0 %v3783_v44  ;;  %v881_v44 = vpack.c.bf16 %v4084_v17, %v874_v40  ;;  %v2979_v13 = vld [vmem:[#allocation7 + $0x1a0] sm:$0xff]  ;;  %s392_s11 = sshrl.u32 %s391_s7, 1  ;;  %v899_v16 = vunpack.c.l.bf16 %v3676_v10  ;;  %1059 = vst [vmem:[#allocation7 + $0x90] sm:$0xf] %v1057_v61  ;;  %v3700_v26 = vld [vmem:[%s4158_s8 + $0x134] sm:%s4333_s29]  ;;  %v2980_v29 = vld [vmem:[#allocation7 + $0x1a8] sm:$0xff]  ;;  %v1075_v39 = vunpack.c.l.bf16 %v3684_v18 }
  0x2f   : > { %3325 = vmatprep.subr.bf16.mxu0 %v3792_v47  ;;  %3369 = vmatpush1.bf16.msra.mxu1 %v3801_v62  ;;  %v1396_v47 = vunpack.c.l.bf16 %v3699_v30  ;;  %v1233_v62 = vpack.c.bf16 %v4084_v17, %v1226_v52  ;;  %v3692_v19 = vld [vmem:[%s4158_s8 + $0x104] sm:%s4333_s29]  ;;  %v3808_v22 = vcombine.high %v4217_v58, %v2979_v13  ;;  %v3807_v23 = vcombine.low %v4217_v58, %v2979_v13  ;;  %s423_s15 = sshrl.u32 %s4363_s10, 1  ;;  %v3716_v33 = vld [vmem:[%s4158_s8 + $0x194] sm:%s4333_s29] }
  0x30   : > { %883 = vst [vmem:[#allocation7 + $0x70] sm:$0xf] %v881_v44  ;;  %v553_v25 = vsel %vm4253_vm2, %v4123_v1, %v547_v6  ;;  %1587 = vst [vmem:[#allocation7 + $0xf0] sm:$0xf] %v1585_v12  ;;  %v3708_v28 = vld [vmem:[%s4158_s8 + $0x164] sm:%s4333_s29]  ;;  %s424_s20 = sor.u32 %s423_s15, %s4363_s10  ;;  %v729_v31 = vsel %vm4253_vm2, %v4123_v1, %v723_v15  ;;  %v905_v32 = vsel %vm4253_vm2, %v4123_v1, %v899_v16  ;;  %v1251_v40 = vunpack.c.l.bf16 %v3692_v19 }
  0x31   : > { %v1402_v63 = vsel %vm4236_vm1, %v4123_v1, %v1396_v47  ;;  %1235 = vst [vmem:[#allocation7 + $0xb0] sm:$0xf] %v1233_v62  ;;  %v560_v30 = vpack.c.bf16 %v4084_v17, %v553_v25  ;;  %v3724_v34 = vld [vmem:[%s4158_s8 + $0x1c4] sm:%s4333_s29]  ;;  %v3810_v35 = vcombine.high %v4227_v3, %v2980_v29  ;;  %v3809_v36 = vcombine.low %v4227_v3, %v2980_v29  ;;  %v3732_v47 = vld [vmem:[%s4158_s8 + $0x1f4] sm:%s4333_s29]  ;;  %s4502_s12 = scalar_select %p4315_p9, 0, 255 }
  0x32   : > { %3326 = vmatpush1.bf16.msra.mxu0 %v3791_v56  ;;  %v4344_v56 = vstv %s2366_s14  ;;  %v1409_v11 = vpack.c.bf16 %v4084_v17, %v1402_v63  ;;  %s393_s14 = sor.u32 %s392_s11, %s391_s7  ;;  %s425_s7 = sand.u32 85, %s424_s20  ;;  %v736_v37 = vpack.c.bf16 %v4084_v17, %v729_v31  ;;  %v912_v38 = vpack.c.bf16 %v4084_v17, %v905_v32  ;;  %v4443_v62 = vld [vmem:[%s4834_s0] sm:$0xf] }
  0x33   : > { %3327 = vmatprep.subr.bf16.mxu0 %v3800_v57  ;;  %v3652_v57 = vld [vmem:[%s4158_s8 + $0x14] sm:%s4333_s29]  ;;  %s394_s18 = sand.u32 85, %s393_s14  ;;  %562 = vst [vmem:[#allocation7 + $0x34] sm:$0xf] %v560_v30  ;;  %s426_s11 = sshrl.u32 %s425_s7, 1  ;;  %v1427_v41 = vunpack.c.l.bf16 %v3700_v26  ;;  %v1603_v43 = vunpack.c.l.bf16 %v3708_v28  ;;  %3370 = vmatprep.subr.bf16.mxu1 %v3810_v35  ;;  %v1761_v3 = vpack.c.bf16 %v4084_v17, %v1754_v20  ;;  %v1779_v44 = vunpack.c.l.bf16 %v3716_v33  ;;  %v4460_v7 = vld [vmem:[%s4158_s8 + $0x280] sm:%s4210_s28] }
  0x34   : > { %1411 = vst [vmem:[#allocation7 + $0xd0] sm:$0xf] %v1409_v11  ;;  %s395_s22 = sshrl.u32 %s394_s18, 1  ;;  %s427_s15 = sor.u32 %s426_s11, %s425_s7  ;;  %738 = vst [vmem:[#allocation7 + $0x54] sm:$0xf] %v736_v37  ;;  %v1955_v46 = vunpack.c.l.bf16 %v3724_v34  ;;  %3371 = vmatpush1.bf16.msra.mxu1 %v3809_v36  ;;  %v1081_v48 = vsel %vm4253_vm2, %v4123_v1, %v1075_v39  ;;  %v1257_v49 = vsel %vm4253_vm2, %v4123_v1, %v1251_v40  ;;  %v2131_v6 = vunpack.c.l.bf16 %v3732_v47 }
  0x35   : > { %s396_s10 = sor.u32 %s395_s22, %s394_s18  ;;  %914 = vst [vmem:[#allocation7 + $0x74] sm:$0xf] %v912_v38  ;;  %s428_s20 = sand.u32 51, %s427_s15  ;;  %v1433_v50 = vsel %vm4253_vm2, %v4123_v1, %v1427_v41  ;;  %v1609_v51 = vsel %vm4253_vm2, %v4123_v1, %v1603_v43  ;;  %3372 = vmatprep.subr.bf16.mxu1 %v4140_v2  ;;  %v1088_v52 = vpack.c.bf16 %v4084_v17, %v1081_v48  ;;  %1763 = vst [vmem:[#allocation7 + $0x110] sm:$0xf] %v1761_v3 }
  0x36   : > { %3328 = vmatpush1.bf16.msra.mxu0 %v3799_v5  ;;  %v371_v5 = vunpack.c.l.bf16 %v3652_v57  ;;  %s397_s14 = sand.u32 51, %s396_s10  ;;  %s429_s7 = sshrl.u32 %s428_s20, 2  ;;  %v1264_v57 = vpack.c.bf16 %v4084_v17, %v1257_v49  ;;  %v1440_v59 = vpack.c.bf16 %v4084_v17, %v1433_v50  ;;  %v1616_v61 = vpack.c.bf16 %v4084_v17, %v1609_v51 }
  0x37   : > { %3329 = vmatprep.subr.bf16.mxu0 %v3808_v22  ;;  %s398_s18 = sshrl.u32 %s397_s14, 2  ;;  %s430_s15 = sor.u32 %s429_s7, %s428_s20  ;;  %v1785_v63 = vsel %vm4253_vm2, %v4123_v1, %v1779_v44  ;;  %v1961_v0 = vsel %vm4253_vm2, %v4123_v1, %v1955_v46  ;;  %1090 = vst [vmem:[#allocation7 + $0x94] sm:$0xf] %v1088_v52  ;;  %v2137_v20 = vsel %vm4253_vm2, %v4123_v1, %v2131_v6  ;;  %v2752_v25 = vunpack.c.l.bf16 %v4460_v7 }
  0x38   : > { %v377_v24 = vsel %vm4253_vm2, %v4123_v1, %v371_v5  ;;  %s399_s22 = sor.u32 %s398_s18, %s397_s14  ;;  %v2106_v5 = vsel %vm4236_vm1, %v4123_v1, %v2100_v54  ;;  %s4470_s18 = sand.u32 15, %s430_s15  ;;  %1266 = vst [vmem:[#allocation7 + $0xb4] sm:$0xf] %v1264_v57  ;;  %1442 = vst [vmem:[#allocation7 + $0xd4] sm:$0xf] %v1440_v59  ;;  %v1792_v54 = vpack.c.bf16 %v4084_v17, %v1785_v63  ;;  %3373 = vmatpush1.bf16.msra.mxu1 %v4140_v2 }
  0x39   : > { %v384_v58 = vpack.c.bf16 %v4084_v17, %v377_v24  ;;  %s4445_s14 = sand.u32 15, %s399_s22  ;;  %1618 = vst [vmem:[#allocation7 + $0xf4] sm:$0xf] %v1616_v61  ;;  %v1968_v12 = vpack.c.bf16 %v4084_v17, %v1961_v0  ;;  %v2113_v53 = vpack.c.bf16 %v4084_v17, %v2106_v5  ;;  %s4842_s28 = sor.u32 1, %s4181_s17  ;;  %v3654_v15 = vld [vmem:[%s4158_s8 + $0x1c] sm:%s4470_s18]  ;;  %v3662_v19 = vld [vmem:[%s4158_s8 + $0x4c] sm:%s4470_s18]  ;;  %v2144_v24 = vpack.c.bf16 %v4084_v17, %v2137_v20 }
  0x3a   : > { %3330 = vmatpush1.bf16.msra.mxu0 %v3807_v23  ;;  %v3653_v10 = vld [vmem:[%s4158_s8 + $0x18] sm:%s4445_s14]  ;;  %v3661_v42 = vld [vmem:[%s4158_s8 + $0x48] sm:%s4445_s14]  ;;  %s4494_s20 = scalar_select %p4271_p8, 0, 255  ;;  %v2933_v21 = vld [vmem:[#allocation7 + $0x30] sm:$0xff]  ;;  %v433_v22 = vunpack.c.l.bf16 %v3654_v15  ;;  %v609_v55 = vunpack.c.l.bf16 %v3662_v19  ;;  %vm2385_vm7 = vcmp.lt.s32.totalorder %v4344_v56, 0 }
  0x3b   : > { %386 = vst [vmem:[#allocation7 + $0x14] sm:$0xf] %v384_v58  ;;  %3331 = vmatprep.subr.bf16.mxu0 %v4140_v2  ;;  %v402_v13 = vunpack.c.l.bf16 %v3653_v10  ;;  %v578_v18 = vunpack.c.l.bf16 %v3661_v42  ;;  %v3669_v23 = vld [vmem:[%s4158_s8 + $0x78] sm:%s4445_s14]  ;;  %1794 = vst [vmem:[#allocation7 + $0x114] sm:$0xf] %v1792_v54  ;;  %v4511_v30 = vld [vmem:[#allocation7 + $0x50] sm:$0xff]  ;;  %3391 = vmatmul.mubr.bf16.vlgmr.msra.gmra.mrb[0].mxu1 %v4443_v62 }
  0x3c   : > { %1970 = vst [vmem:[#allocation7 + $0x134] sm:$0xf] %v1968_v12  ;;  %2115 = vst [vmem:[#allocation7 + $0x150] sm:$0xf] %v2113_v53  ;;  %v4513_v31 = vld [vmem:[#allocation7 + $0x70] sm:$0xff]  ;;  %v3670_v32 = vld [vmem:[%s4158_s8 + $0x7c] sm:%s4470_s18]  ;;  %v439_v34 = vsel %vm4483_vm4, %v4123_v1, %v433_v22  ;;  %v615_v36 = vsel %vm4483_vm4, %v4123_v1, %v609_v55  ;;  %v754_v45 = vunpack.c.l.bf16 %v3669_v23  ;;  %3472 = vmatprep.mubr.bf16.mxu1 %v4083_v4 }
  0x3d   : > { %v408_v29 = vsel %vm4466_vm3, %v4123_v1, %v402_v13  ;;  %v584_v58 = vsel %vm4466_vm3, %v4123_v1, %v578_v18  ;;  %s2303_s19 = sshrl.u32 %s4494_s20, 1  ;;  %p4520_p13 = scmp.lt.s32.totalorder %s4842_s28, 0  ;;  %v3677_v37 = vld [vmem:[%s4158_s8 + $0xa8] sm:%s4445_s14]  ;;  %2146 = vst [vmem:[#allocation7 + $0x154] sm:$0xf] %v2144_v24  ;;  %v446_v39 = vpack.c.bf16 %v4084_v17, %v439_v34  ;;  %v622_v40 = vpack.c.bf16 %v4084_v17, %v615_v36  ;;  %v3685_v3 = vld [vmem:[%s4158_s8 + $0xd8] sm:%s4445_s14] }
  0x3e   : > { %3332 = vmatpush1.bf16.msra.mxu0 %v4140_v2  ;;  %v415_v33 = vpack.c.bf16 %v4084_v17, %v408_v29  ;;  %v591_v35 = vpack.c.bf16 %v4084_v17, %v584_v58  ;;  %v3678_v38 = vld [vmem:[%s4158_s8 + $0xac] sm:%s4470_s18]  ;;  %s4539_s7 = sor.u32 %s2303_s19, %s4494_s20  ;;  %s2336_s10 = sshrl.u32 %s4502_s12, 1  ;;  %v3771_v41 = vcombine.low %v4511_v30, %v4513_v31  ;;  %v3772_v43 = vcombine.high %v4511_v30, %v4513_v31  ;;  %v3686_v44 = vld [vmem:[%s4158_s8 + $0xdc] sm:%s4470_s18] }
  0x3f   : > { %s2305_s11 = sand.u32 85, %s4539_s7  ;;  %s4554_s15 = sor.u32 %s2336_s10, %s4502_s12  ;;  %v785_v46 = vunpack.c.l.bf16 %v3670_v32  ;;  %v930_v47 = vunpack.c.l.bf16 %v3677_v37  ;;  %v961_v48 = vunpack.c.l.bf16 %v3678_v38  ;;  %v3693_v49 = vld [vmem:[%s4158_s8 + $0x108] sm:%s4445_s14]  ;;  %448 = vst [vmem:[#allocation7 + $0x1c] sm:$0xf] %v446_v39  ;;  %624 = vst [vmem:[#allocation7 + $0x3c] sm:$0xf] %v622_v40  ;;  %v1106_v57 = vunpack.c.l.bf16 %v3685_v3 }
  0x40   : > { %417 = vst [vmem:[#allocation7 + $0x18] sm:$0xf] %v415_v33  ;;  %593 = vst [vmem:[#allocation7 + $0x38] sm:$0xf] %v591_v35  ;;  %v3694_v50 = vld [vmem:[%s4158_s8 + $0x10c] sm:%s4470_s18]  ;;  %s2306_s20 = sshrl.u32 %s2305_s11, 1  ;;  %v1137_v59 = vunpack.c.l.bf16 %v3686_v44  ;;  %v1282_v61 = vunpack.c.l.bf16 %v3693_v49 }
  0x41   : > { %3350 = vmatmul.mubr.bf16.vlgmr.msra.gmra.mrb[0].mxu0 %v4443_v62  ;;  %s2338_s19 = sand.u32 85, %s4554_s15  ;;  %v4562_v51 = vld [vmem:[#allocation7 + $0x90] sm:$0xff]  ;;  %v1313_v63 = vunpack.c.l.bf16 %v3694_v50  ;;  %s2307_s12 = sor.u32 %s2306_s20, %s2305_s11  ;;  %v791_v0 = vsel %vm4483_vm4, %v4123_v1, %v785_v46  ;;  %v936_v5 = vsel %vm4466_vm3, %v4123_v1, %v930_v47  ;;  %v967_v6 = vsel %vm4483_vm4, %v4123_v1, %v961_v48  ;;  %v3701_v15 = vld [vmem:[%s4158_s8 + $0x138] sm:%s4445_s14]  ;;  %v3709_v22 = vld [vmem:[%s4158_s8 + $0x168] sm:%s4445_s14] }
  0x42   : > { %v2929_v2 = vld [vmem:[#allocation7 + $0x10] sm:$0xff]  ;;  %3431 = vmatprep.mubr.bf16.mxu0 %v4083_v4  ;;  %s2339_s7 = sshrl.u32 %s2338_s19, 1  ;;  %v760_v4 = vsel %vm4466_vm3, %v4123_v1, %v754_v45  ;;  %s2308_s10 = sand.u32 51, %s2307_s12  ;;  %v798_v54 = vpack.c.bf16 %v4084_v17, %v791_v0  ;;  %v943_v12 = vpack.c.bf16 %v4084_v17, %v936_v5  ;;  %v974_v53 = vpack.c.bf16 %v4084_v17, %v967_v6  ;;  %v3702_v18 = vld [vmem:[%s4158_s8 + $0x13c] sm:%s4470_s18]  ;;  %v3725_v50 = vld [vmem:[%s4158_s8 + $0x1c8] sm:%s4445_s14] }
  0x43   : > { %v3763_v26 = vcombine.low %v2929_v2, %v2933_v21  ;;  %v3764_v28 = vcombine.high %v2929_v2, %v2933_v21  ;;  %v4564_v52 = vld [vmem:[#allocation7 + $0xb0] sm:$0xff]  ;;  %s4580_s11 = sor.u32 %s2339_s7, %s2338_s19  ;;  %v767_v42 = vpack.c.bf16 %v4084_v17, %v760_v4  ;;  %s2309_s15 = sshrl.u32 %s2308_s10, 2  ;;  %v1112_v2 = vsel %vm4466_vm3, %v4123_v1, %v1106_v57  ;;  %v3717_v30 = vld [vmem:[%s4158_s8 + $0x198] sm:%s4445_s14] }
  0x44   : > { %v4578_v10 = vld [vmem:[#allocation7 + $0xd0] sm:$0xff]  ;;  %s2341_s20 = sand.u32 51, %s4580_s11  ;;  %v3779_v19 = vcombine.low %v4562_v51, %v4564_v52  ;;  %v3780_v20 = vcombine.high %v4562_v51, %v4564_v52  ;;  %v1143_v21 = vsel %vm4483_vm4, %v4123_v1, %v1137_v59  ;;  %s4609_s19 = sor.u32 %s2309_s15, %s2308_s10  ;;  %800 = vst [vmem:[#allocation7 + $0x5c] sm:$0xf] %v798_v54  ;;  %945 = vst [vmem:[#allocation7 + $0x78] sm:$0xf] %v943_v12  ;;  %v1458_v36 = vunpack.c.l.bf16 %v3701_v15 }
  0x45   : > { %3399 = vmatprep.subr.bf16.mxu0 %v3764_v28  ;;  %v4586_v13 = vld [vmem:[#allocation7 + $0xf0] sm:$0xff]  ;;  %s2342_s12 = sshrl.u32 %s2341_s20, 2  ;;  %769 = vst [vmem:[#allocation7 + $0x58] sm:$0xf] %v767_v42  ;;  %976 = vst [vmem:[#allocation7 + $0x7c] sm:$0xf] %v974_v53  ;;  %v1119_v24 = vpack.c.bf16 %v4084_v17, %v1112_v2  ;;  %v1288_v28 = vsel %vm4466_vm3, %v4123_v1, %v1282_v61  ;;  %v1319_v29 = vsel %vm4483_vm4, %v4123_v1, %v1313_v63 }
  0x46   : > { %3400 = vmatpush1.bf16.msra.mxu0 %v3763_v26  ;;  %v3710_v55 = vld [vmem:[%s4158_s8 + $0x16c] sm:%s4470_s18]  ;;  %v1150_v26 = vpack.c.bf16 %v4084_v17, %v1143_v21  ;;  %v3718_v31 = vld [vmem:[%s4158_s8 + $0x19c] sm:%s4470_s18]  ;;  %s4627_s7 = sor.u32 %s2342_s12, %s2341_s20  ;;  %s4841_s10 = sor.u32 1, %s4197_s25  ;;  %v1295_v32 = vpack.c.bf16 %v4084_v17, %v1288_v28  ;;  %v1326_v33 = vpack.c.bf16 %v4084_v17, %v1319_v29  ;;  %v3787_v34 = vcombine.low %v4578_v10, %v4586_v13 }
  0x47   : > { %3401 = vmatprep.subr.bf16.mxu0 %v3772_v43  ;;  %v4607_v23 = vld [vmem:[#allocation7 + $0x110] sm:$0xff]  ;;  %v3788_v35 = vcombine.high %v4578_v10, %v4586_v13  ;;  %s2311_s11 = sand.u32 15, %s4609_s19  ;;  %s2344_s15 = sand.u32 15, %s4627_s7  ;;  %1121 = vst [vmem:[#allocation7 + $0x98] sm:$0xf] %v1119_v24  ;;  %v1489_v37 = vunpack.c.l.bf16 %v3702_v18  ;;  %v1634_v38 = vunpack.c.l.bf16 %v3709_v22  ;;  %v1665_v39 = vunpack.c.l.bf16 %v3710_v55  ;;  %v2930_v40 = vld [vmem:[#allocation7 + $0x18] sm:$0xff] }
  0x48   : > { %v4621_v58 = vld [vmem:[#allocation7 + $0x130] sm:$0xff]  ;;  %1152 = vst [vmem:[#allocation7 + $0x9c] sm:$0xf] %v1150_v26  ;;  %s2368_s20 = scalar_select %p4323_p10, 0, 255  ;;  %v1810_v44 = vunpack.c.l.bf16 %v3717_v30  ;;  %v1841_v45 = vunpack.c.l.bf16 %v3718_v31  ;;  %v1464_v48 = vsel %vm4466_vm3, %v4123_v1, %v1458_v36  ;;  %v3739_v63 = vld [vmem:[%s4158_s8 + $0x220] sm:%s2311_s11]  ;;  %v1986_v18 = vunpack.c.l.bf16 %v3725_v50 }
  0x49   : > { %1297 = vst [vmem:[#allocation7 + $0xb8] sm:$0xf] %v1295_v32  ;;  %1328 = vst [vmem:[#allocation7 + $0xbc] sm:$0xf] %v1326_v33  ;;  %v3795_v43 = vcombine.low %v4607_v23, %v4621_v58  ;;  %v3796_v3 = vcombine.high %v4607_v23, %v4621_v58  ;;  %s2401_s21 = scalar_select %p4329_p11, 0, 255  ;;  %v1495_v49 = vsel %vm4483_vm4, %v4123_v1, %v1489_v37  ;;  %v2313_v21 = vunpack.c.l.bf16 %v3739_v63 }
  0x4a   : > { %3402 = vmatpush1.bf16.msra.mxu0 %v3771_v41  ;;  %v2934_v41 = vld [vmem:[#allocation7 + $0x38] sm:$0xff]  ;;  %v3726_v51 = vld [vmem:[%s4158_s8 + $0x1cc] sm:%s4470_s18]  ;;  %s2369_s12 = sshrl.u32 %s2368_s20, 1  ;;  %p4658_p0 = scmp.lt.s32.totalorder %s4841_s10, 0  ;;  %v1471_v52 = vpack.c.bf16 %v4084_v17, %v1464_v48  ;;  %v1502_v57 = vpack.c.bf16 %v4084_v17, %v1495_v49  ;;  %v1640_v59 = vsel %vm4466_vm3, %v4123_v1, %v1634_v38  ;;  %v1671_v61 = vsel %vm4483_vm4, %v4123_v1, %v1665_v39  ;;  %v3740_v4 = vld [vmem:[%s4158_s8 + $0x224] sm:%s2344_s15] }
  0x4b   : > { %3403 = vmatprep.subr.bf16.mxu0 %v3780_v20  ;;  %v3765_v46 = vcombine.low %v2930_v40, %v2934_v41  ;;  %v3766_v47 = vcombine.high %v2930_v40, %v2934_v41  ;;  %s4676_s10 = sor.u32 %s2369_s12, %s2368_s20  ;;  %s2402_s28 = sshrl.u32 %s2401_s21, 1  ;;  %v1647_v0 = vpack.c.bf16 %v4084_v17, %v1640_v59  ;;  %v1678_v5 = vpack.c.bf16 %v4084_v17, %v1671_v61  ;;  %v3733_v42 = vld [vmem:[%s4158_s8 + $0x1f8] sm:%s4445_s14]  ;;  %v3758_v50 = vld [vmem:[%s4158_s8 + $0x28c] sm:%s4470_s18] }
  0x4c   : > { %v1816_v6 = vsel %vm4466_vm3, %v4123_v1, %v1810_v44  ;;  %v1847_v10 = vsel %vm4483_vm4, %v4123_v1, %v1841_v45  ;;  %v3734_v54 = vld [vmem:[%s4158_s8 + $0x1fc] sm:%s4470_s18]  ;;  %s2371_s19 = sand.u32 85, %s4676_s10  ;;  %s4692_s7 = sor.u32 %s2402_s28, %s2401_s21  ;;  %1473 = vst [vmem:[#allocation7 + $0xd8] sm:$0xf] %v1471_v52  ;;  %1504 = vst [vmem:[#allocation7 + $0xdc] sm:$0xf] %v1502_v57  ;;  %v2346_v22 = vunpack.c.l.bf16 %v3740_v4  ;;  %v1992_v24 = vsel %vm4466_vm3, %v4123_v1, %v1986_v18 }
  0x4d   : > { %3440 = vmatprep.subr.bf16.mxu1 %v3766_v47  ;;  %v2938_v12 = vld [vmem:[#allocation7 + $0x58] sm:$0xff]  ;;  %v1823_v13 = vpack.c.bf16 %v4084_v17, %v1816_v6  ;;  %v1854_v15 = vpack.c.bf16 %v4084_v17, %v1847_v10  ;;  %s2372_s11 = sshrl.u32 %s2371_s19, 1  ;;  %s2404_s15 = sand.u32 85, %s4692_s7  ;;  %1649 = vst [vmem:[#allocation7 + $0xf8] sm:$0xf] %v1647_v0  ;;  %v2162_v28 = vunpack.c.l.bf16 %v3733_v42  ;;  %v2193_v29 = vunpack.c.l.bf16 %v3734_v54  ;;  %v2969_v10 = vld [vmem:[#allocation7 + $0x150] sm:$0xff] }
  0x4e   : > { %3404 = vmatpush1.bf16.msra.mxu0 %v3779_v19  ;;  %3441 = vmatpush1.bf16.msra.mxu1 %v3765_v46  ;;  %v2942_v53 = vld [vmem:[#allocation7 + $0x78] sm:$0xff]  ;;  %v2017_v19 = vunpack.c.l.bf16 %v3726_v51  ;;  %1680 = vst [vmem:[#allocation7 + $0xfc] sm:$0xf] %v1678_v5  ;;  %s2373_s28 = sor.u32 %s2372_s11, %s2371_s19  ;;  %s2405_s10 = sshrl.u32 %s2404_s15, 1  ;;  %v1999_v31 = vpack.c.bf16 %v4084_v17, %v1992_v24  ;;  %v2320_v33 = vsel %vm2319_vm5, %v4123_v1, %v2313_v21  ;;  %v3757_v46 = vld [vmem:[%s4158_s8 + $0x288] sm:%s4445_s14]  ;;  %v2845_v5 = vunpack.c.l.bf16 %v3758_v50 }
  0x4f   : > { %3405 = vmatprep.subr.bf16.mxu0 %v3788_v35  ;;  %v3773_v20 = vcombine.low %v2938_v12, %v2942_v53  ;;  %v3774_v2 = vcombine.high %v2938_v12, %v2942_v53  ;;  %v2946_v55 = vld [vmem:[#allocation7 + $0x98] sm:$0xff]  ;;  %1825 = vst [vmem:[#allocation7 + $0x118] sm:$0xf] %v1823_v13  ;;  %1856 = vst [vmem:[#allocation7 + $0x11c] sm:$0xf] %v1854_v15  ;;  %s2374_s20 = sand.u32 51, %s2373_s28  ;;  %s2406_s21 = sor.u32 %s2405_s10, %s2404_s15  ;;  %v2327_v38 = vpack.c.bf16 %v4084_v17, %v2320_v33 }
  0x50   : > { %v2023_v26 = vsel %vm4483_vm4, %v4123_v1, %v2017_v19  ;;  %v2950_v30 = vld [vmem:[#allocation7 + $0xb8] sm:$0xff]  ;;  %s2375_s12 = sshrl.u32 %s2374_s20, 2  ;;  %s2407_s19 = sand.u32 51, %s2406_s21  ;;  %v3756_v35 = vld [vmem:[%s4158_s8 + $0x284] sm:%s4333_s29]  ;;  %2001 = vst [vmem:[#allocation7 + $0x138] sm:$0xf] %v1999_v31  ;;  %v2168_v39 = vsel %vm4466_vm3, %v4123_v1, %v2162_v28  ;;  %v2199_v23 = vsel %vm4483_vm4, %v4123_v1, %v2193_v29  ;;  %v2758_v58 = vsel %vm4236_vm1, %v4123_v1, %v2752_v25 }
  0x51   : > { %3442 = vmatprep.subr.bf16.mxu1 %v3774_v2  ;;  %v2030_v32 = vpack.c.bf16 %v4084_v17, %v2023_v26  ;;  %v3781_v36 = vcombine.low %v2946_v55, %v2950_v30  ;;  %v3782_v37 = vcombine.high %v2946_v55, %v2950_v30  ;;  %s2376_s7 = sor.u32 %s2375_s12, %s2374_s20  ;;  %s2408_s11 = sshrl.u32 %s2407_s19, 2  ;;  %2329 = vst [vmem:[#allocation7 + $0x170] sm:$0xf] %v2327_v38  ;;  %v2783_v7 = vunpack.c.l.bf16 %v3756_v35 }
  0x52   : > { %3406 = vmatpush1.bf16.msra.mxu0 %v3787_v34  ;;  %v2353_v34 = vsel %vm2352_vm6, %v4123_v1, %v2346_v22  ;;  %3443 = vmatpush1.bf16.msra.mxu1 %v3773_v20  ;;  %s2377_s29 = sand.u32 15, %s2376_s7  ;;  %s2409_s15 = sor.u32 %s2408_s11, %s2407_s19  ;;  %v2175_v40 = vpack.c.bf16 %v4084_v17, %v2168_v39  ;;  %v2206_v41 = vpack.c.bf16 %v4084_v17, %v2199_v23  ;;  %v2814_v4 = vunpack.c.l.bf16 %v3757_v46 }
  0x53   : > { %3407 = vmatprep.subr.bf16.mxu0 %v3796_v3  ;;  %2032 = vst [vmem:[#allocation7 + $0x13c] sm:$0xf] %v2030_v32  ;;  %v2360_v9 = vpack.c.bf16 %v4084_v17, %v2353_v34  ;;  %3444 = vmatprep.subr.bf16.mxu1 %v3782_v37  ;;  %s2410_s16 = sand.u32 15, %s2409_s15  ;;  %v2763_v3 = vsel %vm2665_vm0, %v2758_v58, %v4123_v1  ;;  %s2619_s28 = sor.u32 1, %s4204_s26  ;;  %v2954_v8 = vld [vmem:[#allocation7 + $0xd8] sm:$0xff]  ;;  %v2538_v2 = vstv %s2520_s30  ;;  %v2985_v37 = vld [vmem:[#allocation7 + $0x1d0] sm:$0xff] }
  0x54   : > { %v3742_v44 = vld [vmem:[%s4158_s8 + $0x22c] sm:%s2410_s16]  ;;  %s2522_s10 = scalar_select %p4383_p12, 0, 255  ;;  %v2765_v45 = vpack.c.bf16 %v4084_v17, %v2763_v3  ;;  %2177 = vst [vmem:[#allocation7 + $0x158] sm:$0xf] %v2175_v40  ;;  %v2789_v49 = vsel %vm4253_vm2, %v4123_v1, %v2783_v7  ;;  %v2820_v42 = vsel %vm4466_vm3, %v4123_v1, %v2814_v4  ;;  %v2851_v13 = vsel %vm4483_vm4, %v4123_v1, %v2845_v5 }
  0x55   : > { %2362 = vst [vmem:[#allocation7 + $0x174] sm:$0xf] %v2360_v9  ;;  %v2958_v47 = vld [vmem:[#allocation7 + $0xf8] sm:$0xff]  ;;  %2208 = vst [vmem:[#allocation7 + $0x15c] sm:$0xf] %v2206_v41  ;;  %v2412_v48 = vunpack.c.l.bf16 %v3742_v44  ;;  %v2794_v59 = vsel %vm2665_vm0, %v2789_v49, %v4123_v1  ;;  %p4759_p1 = scmp.lt.s32.totalorder %s2619_s28, 0  ;;  %v2825_v53 = vsel %vm2665_vm0, %v2820_v42, %v4123_v1  ;;  %v2856_v18 = vsel %vm2665_vm0, %v2851_v13, %v4123_v1 }
  0x56   : > { %3408 = vmatpush1.bf16.msra.mxu0 %v3795_v43  ;;  %v3741_v43 = vld [vmem:[%s4158_s8 + $0x228] sm:%s2377_s29]  ;;  %3445 = vmatpush1.bf16.msra.mxu1 %v3781_v36  ;;  %s2555_s20 = scalar_select %p4520_p13, 0, 255  ;;  %v3789_v51 = vcombine.low %v2954_v8, %v2958_v47  ;;  %v3790_v52 = vcombine.high %v2954_v8, %v2958_v47  ;;  %2767 = vst [vmem:[#allocation7 + $0x1b0] sm:$0xf] %v2765_v45  ;;  %v2962_v14 = vld [vmem:[#allocation7 + $0x118] sm:$0xff]  ;;  %v2637_v36 = vstv %s2619_s28 }
  0x57   : > { %v2379_v25 = vunpack.c.l.bf16 %v3741_v43  ;;  %s2523_s13 = sshrl.u32 %s2522_s10, 1  ;;  %v2419_v63 = vsel %vm2418_vm8, %v4123_v1, %v2412_v48  ;;  %v2796_v56 = vpack.c.bf16 %v4084_v17, %v2794_v59  ;;  %v2827_v11 = vpack.c.bf16 %v4084_v17, %v2825_v53  ;;  %v2989_v9 = vld [vmem:[#allocation7 + $0x1f0] sm:$0xff]  ;;  %v2986_v47 = vld [vmem:[#allocation7 + $0x1d8] sm:$0xff] }
  0x58   : > { %s2524_s18 = sor.u32 %s2523_s13, %s2522_s10  ;;  %s2556_s22 = sshrl.u32 %s2555_s20, 1  ;;  %3446 = vmatprep.subr.bf16.mxu1 %v3790_v52  ;;  %v2426_v0 = vpack.c.bf16 %v4084_v17, %v2419_v63  ;;  %v2858_v16 = vpack.c.bf16 %v4084_v17, %v2856_v18  ;;  %vm2539_vm9 = vcmp.lt.s32.totalorder %v2538_v2, 0  ;;  %vm2638_vm12 = vcmp.lt.s32.totalorder %v2637_v36, 0  ;;  %v2990_v48 = vld [vmem:[#allocation7 + $0x1f8] sm:$0xff] }
  0x59   : > { %v2386_v57 = vsel %vm2385_vm7, %v4123_v1, %v2379_v25  ;;  %s2525_s21 = sand.u32 85, %s2524_s18  ;;  %s2557_s12 = sor.u32 %s2556_s22, %s2555_s20  ;;  %2798 = vst [vmem:[#allocation7 + $0x1b4] sm:$0xf] %v2796_v56  ;;  %2829 = vst [vmem:[#allocation7 + $0x1b8] sm:$0xf] %v2827_v11  ;;  %v3820_v7 = vcombine.high %v2985_v37, %v2989_v9  ;;  %v3819_v45 = vcombine.low %v2985_v37, %v2989_v9 }
  0x5a   : > { %v2393_v61 = vpack.c.bf16 %v4084_v17, %v2386_v57  ;;  %3447 = vmatpush1.bf16.msra.mxu1 %v3789_v51  ;;  %v2966_v6 = vld [vmem:[#allocation7 + $0x138] sm:$0xff]  ;;  %s2526_s19 = sshrl.u32 %s2525_s21, 1  ;;  %s2558_s7 = sand.u32 85, %s2557_s12  ;;  %2428 = vst [vmem:[#allocation7 + $0x17c] sm:$0xf] %v2426_v0  ;;  %v3822_v52 = vcombine.high %v2986_v47, %v2990_v48 }
  0x5b   : > { %v3797_v54 = vcombine.low %v2962_v14, %v2966_v6  ;;  %v3798_v12 = vcombine.high %v2962_v14, %v2966_v6  ;;  %s2527_s11 = sor.u32 %s2526_s19, %s2525_s21  ;;  %s2559_s29 = sshrl.u32 %s2558_s7, 1  ;;  %2860 = vst [vmem:[#allocation7 + $0x1bc] sm:$0xf] %v2858_v16 }
  0x5c   : > { %2395 = vst [vmem:[#allocation7 + $0x178] sm:$0xf] %v2393_v61  ;;  %v2973_v15 = vld [vmem:[#allocation7 + $0x170] sm:$0xff]  ;;  %s2528_s15 = sand.u32 51, %s2527_s11  ;;  %s2560_s16 = sor.u32 %s2559_s29, %s2558_s7  ;;  %v2970_v27 = vld [vmem:[#allocation7 + $0x158] sm:$0xff] }
  0x5d   : > { %3448 = vmatprep.subr.bf16.mxu1 %v3798_v12  ;;  %v3803_v19 = vcombine.low %v2969_v10, %v2973_v15  ;;  %v3804_v20 = vcombine.high %v2969_v10, %v2973_v15  ;;  %s2529_s10 = sshrl.u32 %s2528_s15, 2  ;;  %s2561_s20 = sand.u32 51, %s2560_s16 }
  0x5e   : > { %3449 = vmatpush1.bf16.msra.mxu1 %v3797_v54  ;;  %s2530_s13 = sor.u32 %s2529_s10, %s2528_s15  ;;  %s2562_s18 = sshrl.u32 %s2561_s20, 2 }
  0x5f   : > { %s4859_s22 = sor.u32 1, %s4181_s17  ;;  %3409 = vmatprep.subr.bf16.mxu0 %v3804_v20  ;;  %s2531_s21 = sand.u32 15, %s2530_s13 }
  0x60   : > { %v2571_v21 = vstv %s4859_s22  ;;  %s2563_s12 = sor.u32 %s2562_s18, %s2561_s20  ;;  %3410 = vmatpush1.bf16.msra.mxu0 %v3803_v19  ;;  %v3747_v22 = vld [vmem:[%s4158_s8 + $0x250] sm:%s2531_s21]  ;;  %s4860_s22 = sor.u32 1, %s4197_s25 }
  0x61   : > { %s2564_s9 = sand.u32 15, %s2563_s12  ;;  %v2533_v55 = vunpack.c.l.bf16 %v3747_v22  ;;  %vm2572_vm10 = vcmp.lt.s32.totalorder %v2571_v21, 0  ;;  %v2604_v35 = vstv %s4860_s22  ;;  %v2981_v38 = vld [vmem:[#allocation7 + $0x1b0] sm:$0xff] }
  0x62   : > { %v3748_v24 = vld [vmem:[%s4158_s8 + $0x254] sm:%s2564_s9]  ;;  %s2588_s30 = scalar_select %p4658_p0, 0, 255  ;;  %vm2605_vm11 = vcmp.lt.s32.totalorder %v2604_v35, 0 }
  0x63   : > { %v2974_v26 = vld [vmem:[#allocation7 + $0x178] sm:$0xff]  ;;  %v2566_v28 = vunpack.c.l.bf16 %v3748_v24  ;;  %s2621_s17 = scalar_select %p4759_p1, 0, 255  ;;  %v2540_v31 = vsel %vm2539_vm9, %v4123_v1, %v2533_v55 }
  0x64   : > { %v3805_v29 = vcombine.low %v2970_v27, %v2974_v26  ;;  %v3806_v30 = vcombine.high %v2970_v27, %v2974_v26  ;;  %s2589_s19 = sshrl.u32 %s2588_s30, 1  ;;  %v2547_v32 = vpack.c.bf16 %v4084_v17, %v2540_v31  ;;  %v2982_v46 = vld [vmem:[#allocation7 + $0x1b8] sm:$0xff] }
  0x65   : > { %v2573_v33 = vsel %vm2572_vm10, %v4123_v1, %v2566_v28  ;;  %s2590_s7 = sor.u32 %s2589_s19, %s2588_s30  ;;  %s2622_s11 = sshrl.u32 %s2621_s17, 1 }
  0x66   : > { %3450 = vmatprep.subr.bf16.mxu1 %v3806_v30  ;;  %v2580_v34 = vpack.c.bf16 %v4084_v17, %v2573_v33  ;;  %s2591_s27 = sand.u32 85, %s2590_s7  ;;  %s2623_s29 = sor.u32 %s2622_s11, %s2621_s17  ;;  %2549 = vst [vmem:[#allocation7 + $0x190] sm:$0xf] %v2547_v32 }
  0x67   : > { %3451 = vmatpush1.bf16.msra.mxu1 %v3805_v29  ;;  %s2592_s14 = sshrl.u32 %s2591_s27, 1  ;;  %s2624_s15 = sand.u32 85, %s2623_s29 }
  0x68   : > { %2582 = vst [vmem:[#allocation7 + $0x194] sm:$0xf] %v2580_v34  ;;  %s2593_s16 = sor.u32 %s2592_s14, %s2591_s27  ;;  %s2625_s10 = sshrl.u32 %s2624_s15, 1 }
  0x69   : > { %s2594_s20 = sand.u32 51, %s2593_s16  ;;  %s2626_s13 = sor.u32 %s2625_s10, %s2624_s15 }
  0x6a   : > { %s2595_s18 = sshrl.u32 %s2594_s20, 2  ;;  %s2627_s21 = sand.u32 51, %s2626_s13 }
  0x6b   : > { %s2596_s12 = sor.u32 %s2595_s18, %s2594_s20  ;;  %s2628_s9 = sshrl.u32 %s2627_s21, 2 }
  0x6c   : > { %s2597_s30 = sand.u32 15, %s2596_s12  ;;  %s2629_s17 = sor.u32 %s2628_s9, %s2627_s21 }
  0x6d   : > { %v3749_v60 = vld [vmem:[%s4158_s8 + $0x258] sm:%s2597_s30]  ;;  %s2630_s19 = sand.u32 15, %s2629_s17 }
  0x6e   : > { %v2599_v39 = vunpack.c.l.bf16 %v3749_v60  ;;  %v3750_v23 = vld [vmem:[%s4158_s8 + $0x25c] sm:%s2630_s19]  ;;  %s3645_s8 = sshll.u32 %s4862_s3, 3  ;;  %s3646_s3 = sshll.u32 %s4864_s24, 3 }
  0x6f   : > { %v2977_v58 = vld [vmem:[#allocation7 + $0x190] sm:$0xff]  ;;  %v2632_v40 = vunpack.c.l.bf16 %v3750_v23  ;;  %s4813_s28 = scalar_lea.vmem %s4838_s4, %s3645_s8  ;;  %s270_s27 = scalar_lea.vmem %s4839_s5, %s3646_s3 }
  0x70   : > { %v3811_v41 = vcombine.low %v2977_v58, %v2981_v38  ;;  %v3812_v43 = vcombine.high %v2977_v58, %v2981_v38  ;;  %v2606_v3 = vsel %vm2605_vm11, %v4123_v1, %v2599_v39  ;;  %s274_s15 = scalar_lea.vmem %s4840_s6, %s3646_s3 }
  0x71   : > { %v2613_v8 = vpack.c.bf16 %v4084_v17, %v2606_v3  ;;  %v2639_v25 = vsel %vm2638_vm12, %v4123_v1, %v2632_v40 }
  0x72   : > { %3411 = vmatprep.subr.bf16.mxu0 %v3812_v43  ;;  %v2646_v44 = vpack.c.bf16 %v4084_v17, %v2639_v25  ;;  %v3821_v17 = vcombine.low %v2986_v47, %v2990_v48 }
  0x73   : > { %2615 = vst [vmem:[#allocation7 + $0x198] sm:$0xf] %v2613_v8  ;;  %3412 = vmatpush1.bf16.msra.mxu0 %v3811_v41 }
  0x74   : > { %2648 = vst [vmem:[#allocation7 + $0x19c] sm:$0xf] %v2646_v44  ;;  %3413 = vmatprep.subr.bf16.mxu0 %v3820_v7 }
  0x77   : > { %3414 = vmatpush1.bf16.msra.mxu0 %v3819_v45 }
  0x7a   : > { %3432 = vmatmul.mubr.bf16.vlgmr.msra.gmra.mrb[4].mxu0 %v4443_v62 }
  0x7b   : > { %v2978_v49 = vld [vmem:[#allocation7 + $0x198] sm:$0xff] }
  0x7c   : > { %v3813_v50 = vcombine.low %v2978_v49, %v2982_v46  ;;  %v3814_v51 = vcombine.high %v2978_v49, %v2982_v46 }
  0x7e   : > { %3452 = vmatprep.subr.bf16.mxu1 %v3814_v51 }
  0x7f   : > { %3453 = vmatpush1.bf16.msra.mxu1 %v3813_v50 }
  0x80   : > { %3454 = vmatprep.subr.bf16.mxu1 %v3822_v52 }
  0x83   : > { %3455 = vmatpush1.bf16.msra.mxu1 %v3821_v17 }
  0x86   : > { %3473 = vmatmul.mubr.bf16.vlgmr.msra.gmra.mrb[4].mxu1 %v4443_v62 }
  0x91   : > { %v2995_v57 = vpop.permute.xlu0 %2994 }
 0x10e   : > { %v3392_v4 = vpop.f32.mrb[0].mxu1 }
 0x10f   : > { %v3393_v0 = vadd.f32 %v3392_v4, %v2995_v57  ;;  %v3394_v6 = vpop.f32.mrb[1].mxu1 }
 0x110   : > { %v3395_v54 = vadd.f32 %v3394_v6, %v2995_v57  ;;  %v3396_v12 = vpop.f32.mrb[2].mxu1 }
 0x111   : > { %3483 = vst [vmem:[%s4813_s28 + $0x10] sm:$0xff] %v3393_v0  ;;  %v3502_v53 = vmul.f32 %v3393_v0, %v3393_v0  ;;  %v3397_v13 = vpop.f32.mrb[3].mxu1 }
 0x112   : > { %3484 = vst [vmem:[%s4813_s28 + $0x18] sm:$0xff] %v3395_v54  ;;  %v3503_v18 = vmul.f32 %v3395_v54, %v3395_v54 }
 0x114   : > { %v3351_v59 = vpop.f32.mrb[0].mxu0 }
 0x115   : > { %v3352_v14 = vadd.f32 %v3351_v59, %v2995_v57  ;;  %v3353_v61 = vpop.f32.mrb[1].mxu0 }
 0x116   : > { %v3354_v63 = vadd.f32 %v3353_v61, %v2995_v57  ;;  %v3355_v56 = vpop.f32.mrb[2].mxu0 }
 0x117   : > { %3481 = vst [vmem:[%s4813_s28] sm:$0xff] %v3352_v14  ;;  %v3500_v62 = vmul.f32 %v3352_v14, %v3352_v14  ;;  %v3356_v5 = vpop.f32.mrb[3].mxu0 }
 0x118   : > { %3482 = vst [vmem:[%s4813_s28 + $0x8] sm:$0xff] %v3354_v63  ;;  %v3489_v10 = vadd.f32 %v3354_v63, %v3352_v14  ;;  %v3501_v42 = vmul.f32 %v3354_v63, %v3354_v63 }
 0x11a   : > { %v3508_v15 = vadd.f32 %v3501_v42, %v3500_v62  ;;  %v3490_v11 = vadd.f32 %v3489_v10, %v3393_v0 }
 0x11c   : > { %v3509_v19 = vadd.f32 %v3508_v15, %v3502_v53  ;;  %v3491_v20 = vadd.f32 %v3490_v11, %v3395_v54 }
 0x11e   : > { %v3510_v2 = vadd.f32 %v3509_v19, %v3503_v18 }
 0x14d   : > { %v3433_v16 = vpop.f32.mrb[4].mxu0 }
 0x14e   : > { %v3434_v21 = vadd.f32 %v3433_v16, %v2995_v57  ;;  %v3435_v27 = vpop.f32.mrb[5].mxu0 }
 0x14f   : > { %v3436_v22 = vadd.f32 %v3435_v27, %v2995_v57  ;;  %v3437_v55 = vpop.f32.mrb[6].mxu0 }
 0x150   : > { %3485 = vst [vmem:[%s4813_s28 + $0x20] sm:$0xff] %v3434_v21  ;;  %v3492_v24 = vadd.f32 %v3491_v20, %v3434_v21  ;;  %v3504_v26 = vmul.f32 %v3434_v21, %v3434_v21  ;;  %v3438_v28 = vpop.f32.mrb[7].mxu0 }
 0x151   : > { %3486 = vst [vmem:[%s4813_s28 + $0x28] sm:$0xff] %v3436_v22  ;;  %v3505_v29 = vmul.f32 %v3436_v22, %v3436_v22 }
 0x152   : > { %v3493_v30 = vadd.f32 %v3492_v24, %v3436_v22  ;;  %v3511_v31 = vadd.f32 %v3510_v2, %v3504_v26 }
 0x154   : > { %v3512_v32 = vadd.f32 %v3511_v31, %v3505_v29 }
 0x159   : > { %v3474_v33 = vpop.f32.mrb[4].mxu1 }
 0x15a   : > { %v3475_v34 = vadd.f32 %v3474_v33, %v2995_v57  ;;  %v3476_v35 = vpop.f32.mrb[5].mxu1 }
 0x15b   : > { %v3477_v36 = vadd.f32 %v3476_v35, %v2995_v57  ;;  %v3478_v37 = vpop.f32.mrb[6].mxu1 }
 0x15c   : > { %3487 = vst [vmem:[%s4813_s28 + $0x30] sm:$0xff] %v3475_v34  ;;  %v3479_v38 = vpop.f32.mrb[7].mxu1  ;;  %v3494_v60 = vadd.f32 %v3493_v30, %v3475_v34  ;;  %v3506_v9 = vmul.f32 %v3475_v34, %v3475_v34 }
 0x15d   : > { %3488 = vst [vmem:[%s4813_s28 + $0x38] sm:$0xff] %v3477_v36  ;;  %v3507_v23 = vmul.f32 %v3477_v36, %v3477_v36 }
 0x15e   : > { %v3495_v39 = vadd.f32 %v3494_v60, %v3477_v36  ;;  %v3513_v58 = vadd.f32 %v3512_v32, %v3506_v9 }
 0x160   : > { %3496 = vadd.xlane.f32.xlu0 %v3495_v39  ;;  %v3514_v40 = vadd.f32 %v3513_v58, %v3507_v23 }
 0x162   : > { %3515 = vadd.xlane.f32.xlu1 %v3514_v40 }
 0x1ed   : > { %v3497_v41 = vpop.xlane.xlu0 %3496 }
 0x1ee   : > { %3499 = vst.msk [vmem:[%s270_s27] sm:$0xff] %vm3498_vm13, %v3497_v41 }
 0x1ef   : > { %v3516_v43 = vpop.xlane.xlu1 %3515 }
 0x1f0   : > { %3517 = vst.msk [vmem:[%s274_s15] sm:$0xff] %vm3498_vm13, %v3516_v43 }
 0x1f1 PF: > { %s22_s23 = sadd.s32 1, %s4081_s23  }
 0x1f2   : > { %p19_p4 = scmp.ge.s32.totalorder %s22_s23, 4  }
 0x1f4   :  { %21 = sbr.rel (!%p19_p4) target bundleno = 3 (0x3), region = 324 }

// kernel: down_layer_residual_forward.5
= control target key start
LH: loop header
LB: loop body
LE: loop exit
PB: predicated region body
PF: predicated region fallthrough
CT: control target
= control target key end

     0   :  { %s722_s21 = smov 0   ;;  %s790_s0 = inlined_call_operand.vmem [shape: f32[8,2048], index: 0, kind: input, shape index: {}]   ;;  %s791_s1 = inlined_call_operand.vmem [shape: f32[8,1], index: 1, kind: input, shape index: {}]   ;;  %s792_s2 = inlined_call_operand.vmem [shape: f32[8,1], index: 2, kind: input, shape index: {}]   ;;  %s793_s3 = inlined_call_operand.vmem [shape: bf16[8,2048], index: 3, kind: input, shape index: {}]   ;;  %s794_s4 = inlined_call_operand.vmem [shape: bf16[8,8], index: 4, kind: input, shape index: {}]   ;;  %s795_s5 = inlined_call_operand.vmem [shape: f32[8,1], index: 5, kind: input, shape index: {}]   ;;  %s796_s6 = inlined_call_operand.vmem [shape: f32[8,2048], index: 6, kind: output, shape index: {}]  }
   0x1 LB: > { %s630_s22 = sadd.s32 4294967295, %s684_s21   ;;  %p634_p0 = scmp.ge.s32.totalorder %s684_s21, 1  ;;  %s684_s21 = sphi %s722_s21, %s16_s21  }
   0x2   : > { %p224_p1 = scmp.lt.s32.totalorder %s684_s21, 3 }
   0x4   : > { %p225_p2 = pnand %p634_p0, %p224_p1 }
   0x5   : > { %s635_s23 = sshll.u32 (!%p225_p2), %s630_s22, 3  ;;  %v686_v0 = vmov (!%p225_p2), 0   ;;  %v510_v1 = vld [vmem:[%s791_s1] sm:$0xff] (!%p225_p2)  ;;  %vm313_vm0 = vcmask (!%p225_p2), 1043456   ;;  %vm309_vm1 = vcmask (!%p225_p2), 64512  }
   0x6   : > { %228 = sbr.rel (%p225_p2) target bundleno = 251 (0xfb), region = 44  ;;  %p260_p3 = scmp.lt.s32.totalorder (!%p225_p2), %s635_s23, 15  ;;  %370 = vmatprep.mubr.bf16.mxu0 (!%p225_p2), %v686_v0  ;;  %411 = vmatprep.mubr.bf16.mxu1 (!%p225_p2), %v686_v0  ;;  %v524_v2 = vld [vmem:[%s792_s2] sm:$0xff] (!%p225_p2) }
   0x7   : > { %668 = vset.pattern.permute.xlu0 (!%p225_p2), %v686_v0  ;;  %669 = vset.pattern.permute.xlu1 (!%p225_p2), %v686_v0  ;;  %v283_v3 = vld [vmem:[%s795_s5] sm:$0xff] (!%p225_p2) }
   0x8   : > { %513 = vperm.xlu0 (!%p225_p2), %668, %v510_v1   ;;  %527 = vperm.xlu1 (!%p225_p2), %669, %v524_v2   ;;  %v278_v18 = vld [vmem:[%s794_s4] sm:$0xf] (!%p225_p2) }
   0xc   : > { %286 = vperm.xlu0 (!%p225_p2), %668, %v283_v3  }
   0xd   : > { %s798_s23 = smov (!%p260_p3, %s635_s23), 15 }
   0xe   : > { %s638_s30 = sshll.u32 %s798_s23, 2  ;;  %s636_s12 = sshll.u32 %s798_s23, 3 }
   0xf   : > { %s269_s9 = scalar_lea.vmem %s793_s3, %s638_s30  ;;  %s762_s15 = scalar_lea.vmem %s790_s0, %s636_s12 }
  0x10   : > { %v279_v4 = vld [vmem:[%s269_s9] sm:$0xff]  ;;  %v280_v5 = vld [vmem:[%s269_s9 + $0x8] sm:$0xff]  ;;  %v281_v6 = vld [vmem:[%s269_s9 + $0x10] sm:$0xff]  ;;  %s777_s18 = scalar_lea.vmem %s796_s6, %s636_s12 }
  0x11   : > { %v642_v7 = vcombine.high %v279_v4, %v279_v4  ;;  %v644_v8 = vcombine.high %v280_v5, %v280_v5  ;;  %v641_v9 = vcombine.low %v279_v4, %v279_v4  ;;  %v643_v10 = vcombine.low %v280_v5, %v280_v5  ;;  %v282_v11 = vld [vmem:[%s269_s9 + $0x18] sm:$0xff]  ;;  %v502_v22 = vld [vmem:[%s762_s15] sm:$0xff]  ;;  %v504_v23 = vld [vmem:[%s762_s15 + $0x10] sm:$0xff] }
  0x12   : > { %v646_v12 = vcombine.high %v281_v6, %v281_v6  ;;  %v648_v13 = vcombine.high %v282_v11, %v282_v11  ;;  %v645_v14 = vcombine.low %v281_v6, %v281_v6  ;;  %v647_v15 = vcombine.low %v282_v11, %v282_v11  ;;  %v503_v24 = vld [vmem:[%s762_s15 + $0x8] sm:$0xff]  ;;  %v505_v25 = vld [vmem:[%s762_s15 + $0x18] sm:$0xff]  ;;  %v506_v38 = vld [vmem:[%s762_s15 + $0x20] sm:$0xff] }
  0x13   : > { %649 = vmatprep.subr.msk.bf16.mxu0 %vm313_vm0, %v642_v7  ;;  %651 = vmatprep.subr.msk.bf16.mxu1 %vm313_vm0, %v644_v8  ;;  %v315_v16 = vsel %vm313_vm0, %v641_v9, 0  ;;  %v321_v17 = vsel %vm313_vm0, %v643_v10, 0  ;;  %v508_v39 = vld [vmem:[%s762_s15 + $0x30] sm:$0xff]  ;;  %v507_v54 = vld [vmem:[%s762_s15 + $0x28] sm:$0xff]  ;;  %v509_v55 = vld [vmem:[%s762_s15 + $0x38] sm:$0xff] }
  0x14   : > { %339 = vmatpush1.bf16.msra.mxu0 %v315_v16  ;;  %380 = vmatpush1.bf16.msra.mxu1 %v321_v17  ;;  %v327_v19 = vsel %vm313_vm0, %v645_v14, 0  ;;  %v333_v20 = vsel %vm313_vm0, %v647_v15, 0 }
  0x15   : > { %653 = vmatprep.subr.msk.bf16.mxu0 %vm313_vm0, %v646_v12  ;;  %655 = vmatprep.subr.msk.bf16.mxu1 %vm313_vm0, %v648_v13 }
  0x17   : > { %650 = vmatmul.mubr.msk.bf16.vlgmr.msra.gmra.mrb[0].mxu0 %vm309_vm1, %v278_v18  ;;  %652 = vmatmul.mubr.msk.bf16.vlgmr.msra.gmra.mrb[0].mxu1 %vm309_vm1, %v278_v18 }
  0x18   : > { %421 = vmatpush1.bf16.msra.mxu0 %v327_v19  ;;  %462 = vmatpush1.bf16.msra.mxu1 %v333_v20 }
  0x19   : > { %452 = vmatprep.mubr.bf16.mxu0 %v686_v0  ;;  %493 = vmatprep.mubr.bf16.mxu1 %v686_v0 }
  0x1f   : > { %654 = vmatmul.mubr.msk.bf16.vlgmr.msra.gmra.mrb[4].mxu0 %vm309_vm1, %v278_v18  ;;  %656 = vmatmul.mubr.msk.bf16.vlgmr.msra.gmra.mrb[4].mxu1 %vm309_vm1, %v278_v18 }
  0x87   : > { %v514_v21 = vpop.permute.xlu0 %513  ;;  %v528_v28 = vpop.permute.xlu1 %527 }
  0x88   : > { %v516_v26 = vmul.f32 %v514_v21, %v502_v22  ;;  %v518_v27 = vmul.f32 %v514_v21, %v504_v23  ;;  %v517_v29 = vmul.f32 %v514_v21, %v503_v24  ;;  %v519_v30 = vmul.f32 %v514_v21, %v505_v25 }
  0x89   : > { %v520_v52 = vmul.f32 %v514_v21, %v506_v38  ;;  %v522_v53 = vmul.f32 %v514_v21, %v508_v39  ;;  %v521_v62 = vmul.f32 %v514_v21, %v507_v54  ;;  %v523_v63 = vmul.f32 %v514_v21, %v509_v55 }
  0x8a   : > { %v530_v32 = vadd.f32 %v528_v28, %v516_v26  ;;  %v532_v33 = vadd.f32 %v528_v28, %v518_v27  ;;  %v531_v36 = vadd.f32 %v528_v28, %v517_v29  ;;  %v533_v37 = vadd.f32 %v528_v28, %v519_v30 }
  0x8b   : > { %v287_v31 = vpop.permute.xlu0 %286  ;;  %v534_v0 = vadd.f32 %v528_v28, %v520_v52  ;;  %v536_v1 = vadd.f32 %v528_v28, %v522_v53  ;;  %v535_v9 = vadd.f32 %v528_v28, %v521_v62  ;;  %v537_v11 = vadd.f32 %v528_v28, %v523_v63 }
  0xea   : > { %v372_v34 = vpop.f32.mrb[0].mxu0  ;;  %v413_v35 = vpop.f32.mrb[0].mxu1 }
  0xeb   : > { %v373_v40 = vadd.f32 %v372_v34, %v287_v31  ;;  %v414_v41 = vadd.f32 %v413_v35, %v287_v31  ;;  %v374_v42 = vpop.f32.mrb[1].mxu0  ;;  %v415_v43 = vpop.f32.mrb[1].mxu1 }
  0xec   : > { %v375_v44 = vadd.f32 %v374_v42, %v287_v31  ;;  %v416_v45 = vadd.f32 %v415_v43, %v287_v31  ;;  %v376_v46 = vpop.f32.mrb[2].mxu0  ;;  %v417_v47 = vpop.f32.mrb[2].mxu1 }
  0xed   : > { %v538_v48 = vadd.f32 %v530_v32, %v373_v40  ;;  %v540_v49 = vadd.f32 %v532_v33, %v414_v41  ;;  %v377_v50 = vpop.f32.mrb[3].mxu0  ;;  %v418_v51 = vpop.f32.mrb[3].mxu1 }
  0xee   : > { %v539_v56 = vadd.f32 %v531_v36, %v375_v44  ;;  %v541_v57 = vadd.f32 %v533_v37, %v416_v45 }
  0xef   : > { %v546_v58 = vmax.f32 %v538_v48, 0.0  ;;  %v548_v59 = vmax.f32 %v540_v49, 0.0 }
  0xf0   : > { %v547_v60 = vmax.f32 %v539_v56, 0.0  ;;  %v549_v61 = vmax.f32 %v541_v57, 0.0 }
  0xf1   : > { %554 = vst [vmem:[%s777_s18] sm:$0xff] %v546_v58  ;;  %556 = vst [vmem:[%s777_s18 + $0x10] sm:$0xff] %v548_v59 }
  0xf2   : > { %555 = vst [vmem:[%s777_s18 + $0x8] sm:$0xff] %v547_v60  ;;  %557 = vst [vmem:[%s777_s18 + $0x18] sm:$0xff] %v549_v61  ;;  %v454_v2 = vpop.f32.mrb[4].mxu0  ;;  %v495_v3 = vpop.f32.mrb[4].mxu1 }
  0xf3   : > { %v455_v4 = vadd.f32 %v454_v2, %v287_v31  ;;  %v496_v5 = vadd.f32 %v495_v3, %v287_v31  ;;  %v456_v6 = vpop.f32.mrb[5].mxu0  ;;  %v497_v7 = vpop.f32.mrb[5].mxu1 }
  0xf4   : > { %v457_v8 = vadd.f32 %v456_v6, %v287_v31  ;;  %v498_v10 = vadd.f32 %v497_v7, %v287_v31  ;;  %v458_v12 = vpop.f32.mrb[6].mxu0  ;;  %v499_v13 = vpop.f32.mrb[6].mxu1 }
  0xf5   : > { %v542_v14 = vadd.f32 %v534_v0, %v455_v4  ;;  %v544_v15 = vadd.f32 %v536_v1, %v496_v5  ;;  %v459_v16 = vpop.f32.mrb[7].mxu0  ;;  %v500_v17 = vpop.f32.mrb[7].mxu1 }
  0xf6   : > { %v543_v18 = vadd.f32 %v535_v9, %v457_v8  ;;  %v545_v19 = vadd.f32 %v537_v11, %v498_v10 }
  0xf7   : > { %v550_v20 = vmax.f32 %v542_v14, 0.0  ;;  %v552_v21 = vmax.f32 %v544_v15, 0.0 }
  0xf8   : > { %v551_v22 = vmax.f32 %v543_v18, 0.0  ;;  %v553_v23 = vmax.f32 %v545_v19, 0.0 }
  0xf9   : > { %558 = vst [vmem:[%s777_s18 + $0x20] sm:$0xff] %v550_v20  ;;  %560 = vst [vmem:[%s777_s18 + $0x30] sm:$0xff] %v552_v21 }
  0xfa   : > { %559 = vst [vmem:[%s777_s18 + $0x28] sm:$0xff] %v551_v22  ;;  %561 = vst [vmem:[%s777_s18 + $0x38] sm:$0xff] %v553_v23 }
  0xfb PF: > { %s16_s21 = sadd.s32 1, %s684_s21  }
  0xfc   : > { %p13_p4 = scmp.ge.s32.totalorder %s16_s21, 4  }
  0xfe   :  { %15 = sbr.rel (!%p13_p4) target bundleno = 1 (0x1), region = 77 }

</bundles_post_ra>
